<compile_context>
chip_gen: v7x
topology: tpu7x:2x2x1
jax: 0.10.0
libtpu: 0.0.40
codegen_flags: <defaults>
</compile_context>

<pallas_src>
import functools
import math

import jax
import jax.numpy as jnp
from jax import lax
from jax.experimental import pallas as pl
from jax.experimental.pallas import tpu as pltpu

# dtype used for MXU matmul operands (accumulation stays f32)
MXU_DTYPE = jnp.bfloat16

# Row-tile cap for the FFN kernel and q-tile cap for the MHA kernel.
MAX_FFN_ROW_TILE = 512
MAX_Q_TILE = 256


def _pick_tile(n, cap):
    """Largest tile <= cap that divides n (multiple of 8), else the full n."""
    if n <= cap:
        return n
    for t in range(cap - (cap % 8), 7, -8):
        if n % t == 0:
            return t
    return n  # fall back to a single (full) tile


def _vmem_limit_bytes():
    """Raise the scoped-VMEM limit above the per-chip defaults (16 MiB v5e /
    32 MiB v6e+v7x) while leaving headroom below physical capacity."""
    try:
        cap = pltpu.get_tpu_info().vmem_capacity_bytes
    except Exception:
        cap = 128 * 1024 * 1024
    return int(min(64 * 1024 * 1024, (cap * 3) // 4))


# ----------------------------------------------------------------------------
# Pallas kernels
# ----------------------------------------------------------------------------

def _fused_mha_ln_kernel(qsrc_ref, kvsrc_ref, wq_ref, bq_ref, wkv_ref, bkv_ref,
                         wo_ref, bo_ref, g_ref, b_ref, o_ref,
                         *, num_heads, causal, eps):
    """Fused multi-head attention + output proj + residual + LayerNorm.

    Grid: (batch, q-row-tile), both 'parallel'.
    qsrc_ref : [1, tq, D]   (also the residual input)
    kvsrc_ref: [1, Sk, D]
    wq/wo    : [D, D] bf16 (1/sqrt(dh) pre-folded into wq/bq)
    wkv      : [D, 2D] bf16 (K and V weights concatenated)
    o_ref    : [1, tq, D]   lane-dense output
    """
    x = qsrc_ref[0].astype(jnp.float32)          # [tq, D]  residual (f32)
    tq, D = x.shape
    dh = D // num_heads

    # ---- projections: activations cast once to bf16, weights already bf16 ----
    x_b = x.astype(MXU_DTYPE)
    kv_b = kvsrc_ref[0].astype(MXU_DTYPE)        # [Sk, D]
    Sk = kv_b.shape[0]

    q = jnp.dot(x_b, wq_ref[...],
                preferred_element_type=jnp.float32) + bq_ref[...]            # [tq, D]
    kvp = jnp.dot(kv_b, wkv_ref[...],
                  preferred_element_type=jnp.float32) + bkv_ref[...]         # [Sk, 2D]

    # ---- head-batched attention: single batched matmul for all heads ----
    # K/V sliced per-head directly out of packed kvp (no full-width [Sk,D] copies);
    # one bf16 cast per tensor.
    q3 = jnp.stack([q[:, h * dh:(h + 1) * dh]
                    for h in range(num_heads)], axis=0).astype(MXU_DTYPE)    # [H, tq, dh]
    k3 = jnp.stack([kvp[:, h * dh:(h + 1) * dh]
                    for h in range(num_heads)], axis=0).astype(MXU_DTYPE)    # [H, Sk, dh]
    v3 = jnp.stack([kvp[:, D + h * dh:D + (h + 1) * dh]
                    for h in range(num_heads)], axis=0).astype(MXU_DTYPE)    # [H, Sk, dh]

    s = jnp.einsum('hqd,hkd->hqk', q3, k3,
                   preferred_element_type=jnp.float32)                       # [H, tq, Sk]
    if causal:
        q_off = pl.program_id(1) * tq            # row offset of this q-tile
        row = lax.broadcasted_iota(jnp.int32, (1, tq, Sk), 1) + q_off
        col = lax.broadcasted_iota(jnp.int32, (1, tq, Sk), 2)
        s = jnp.where(row >= col, s, jnp.float32(-1e9))

    s = s - jnp.max(s, axis=-1, keepdims=True)
    p = jnp.exp(s)
    p = p * pl.reciprocal(jnp.sum(p, axis=-1, keepdims=True), approx=True)
    ctx3 = jnp.einsum('hqk,hkd->hqd', p.astype(MXU_DTYPE), v3,
                      preferred_element_type=jnp.float32)                    # [H, tq, dh]
    ctx = jnp.concatenate([ctx3[h] for h in range(num_heads)], axis=-1)      # [tq, D]

    # ---- output projection + residual + LayerNorm ----
    attn = jnp.dot(ctx.astype(MXU_DTYPE), wo_ref[...],
                   preferred_element_type=jnp.float32) + bo_ref[...]
    r = x + attn
    mu = jnp.mean(r, axis=-1, keepdims=True)
    var = jnp.mean((r - mu) * (r - mu), axis=-1, keepdims=True)
    rn = (r - mu) * lax.rsqrt(var + eps)
    o_ref[0] = (rn * g_ref[...] + b_ref[...]).astype(o_ref.dtype)


def _fused_ffn_ln_kernel(x_ref, w1_ref, b1_ref, w2_ref, b2_ref, g_ref, b_ref,
                         o_ref, *, eps):
    """Row-tile fused FFN + residual + LayerNorm.  x_ref/o_ref: [rb, D]; weights bf16."""
    x = x_ref[...].astype(jnp.float32)
    h = jnp.dot(x.astype(MXU_DTYPE), w1_ref[...],
                preferred_element_type=jnp.float32) + b1_ref[...]
    h = jnp.maximum(h, 0.0)
    y = jnp.dot(h.astype(MXU_DTYPE), w2_ref[...],
                preferred_element_type=jnp.float32) + b2_ref[...]
    r = x + y
    mu = jnp.mean(r, axis=-1, keepdims=True)
    var = jnp.mean((r - mu) * (r - mu), axis=-1, keepdims=True)
    rn = (r - mu) * lax.rsqrt(var + eps)
    o_ref[...] = (rn * g_ref[...] + b_ref[...]).astype(o_ref.dtype)


# ----------------------------------------------------------------------------
# Pallas wrappers
# ----------------------------------------------------------------------------

def fused_mha_layernorm(q_src, kv_src, p, gamma, beta, num_heads, causal,
                        eps=1e-5):
    """LayerNorm(q_src + MHA(q_src, kv_src, kv_src)) — one pallas_call, grid (B, Sq-tiles)."""
    B, Sq, D = q_src.shape
    Sk = kv_src.shape[1]
    tq = _pick_tile(Sq, MAX_Q_TILE)
    return pl.pallas_call(
        functools.partial(_fused_mha_ln_kernel, num_heads=num_heads,
                          causal=causal, eps=eps),
        out_shape=jax.ShapeDtypeStruct((B, Sq, D), q_src.dtype),
        grid=(B, Sq // tq),
        in_specs=[
            pl.BlockSpec((1, tq, D), lambda b, qi: (b, qi, 0)),   # q source / residual
            pl.BlockSpec((1, Sk, D), lambda b, qi: (b, 0, 0)),    # kv source (resident per b)
            pl.BlockSpec((D, D), lambda b, qi: (0, 0)),           # wq  (bf16, scale folded)
            pl.BlockSpec((1, D), lambda b, qi: (0, 0)),           # bq
            pl.BlockSpec((D, 2 * D), lambda b, qi: (0, 0)),       # wkv (bf16, concat K,V)
            pl.BlockSpec((1, 2 * D), lambda b, qi: (0, 0)),       # bkv
            pl.BlockSpec((D, D), lambda b, qi: (0, 0)),           # wo  (bf16)
            pl.BlockSpec((1, D), lambda b, qi: (0, 0)),           # bo
            pl.BlockSpec((1, D), lambda b, qi: (0, 0)),           # ln gamma
            pl.BlockSpec((1, D), lambda b, qi: (0, 0)),           # ln beta
        ],
        out_specs=pl.BlockSpec((1, tq, D), lambda b, qi: (b, qi, 0)),
        compiler_params=pltpu.CompilerParams(
            dimension_semantics=("parallel", "parallel"),         # shard over both TCs (v7x)
            vmem_limit_bytes=_vmem_limit_bytes()),
    )(q_src, kv_src, p["wq"], p["bq"].reshape(1, D), p["wkv"],
      p["bkv"].reshape(1, 2 * D), p["wo"], p["bo"].reshape(1, D),
      gamma.reshape(1, D), beta.reshape(1, D))


def fused_ffn_layernorm(x, w1, b1, w2, b2, gamma, beta, eps=1e-5):
    """LayerNorm(x + FFN(x)) — one pallas_call, row-tiled 'parallel' grid."""
    N, D = x.shape
    H = w1.shape[1]
    rb = _pick_tile(N, MAX_FFN_ROW_TILE)
    return pl.pallas_call(
        functools.partial(_fused_ffn_ln_kernel, eps=eps),
        out_shape=jax.ShapeDtypeStruct((N, D), x.dtype),
        grid=(N // rb,),
        in_specs=[
            pl.BlockSpec((rb, D), lambda i: (i, 0)),
            pl.BlockSpec((D, H), lambda i: (0, 0)),               # w1 (bf16)
            pl.BlockSpec((1, H), lambda i: (0, 0)),
            pl.BlockSpec((H, D), lambda i: (0, 0)),               # w2 (bf16)
            pl.BlockSpec((1, D), lambda i: (0, 0)),
            pl.BlockSpec((1, D), lambda i: (0, 0)),
            pl.BlockSpec((1, D), lambda i: (0, 0)),
        ],
        out_specs=pl.BlockSpec((rb, D), lambda i: (i, 0)),
        compiler_params=pltpu.CompilerParams(
            dimension_semantics=("parallel",),
            vmem_limit_bytes=_vmem_limit_bytes()),
    )(x, w1, b1.reshape(1, H), w2, b2.reshape(1, D),
      gamma.reshape(1, D), beta.reshape(1, D))


# ----------------------------------------------------------------------------
# Model glue (plain JAX): embedding lookup, positional encoding, layer plumbing
# ----------------------------------------------------------------------------

def positional_encoding(seq_len, d_model):
    # NOTE: assumes even d_model (as in the reference usage).
    pos = jnp.arange(seq_len, dtype=jnp.float32)[:, None]
    div = jnp.exp(jnp.arange(0, d_model, 2, dtype=jnp.float32)
                  * (-math.log(10000.0) / d_model))
    pe = jnp.zeros((seq_len, d_model), jnp.float32)
    pe = pe.at[:, 0::2].set(jnp.sin(pos * div))
    pe = pe.at[:, 1::2].set(jnp.cos(pos * div))
    return pe


def decoder_block(x, enc_output, p, num_heads):
    B, S, D = x.shape
    # self-attention (causal, mask generated in-kernel) + residual + norm1
    x = fused_mha_layernorm(x, x, p["self_attn"], p["ln1_g"], p["ln1_b"],
                            num_heads, causal=True)
    # encoder-decoder attention (memory_mask=None) + residual + norm2
    x = fused_mha_layernorm(x, enc_output, p["enc_dec_attn"],
                            p["ln2_g"], p["ln2_b"], num_heads, causal=False)
    # feed-forward + residual + norm3
    y = fused_ffn_layernorm(x.reshape(B * S, D), p["ff_w1"], p["ff_b1"],
                            p["ff_w2"], p["ff_b2"], p["ln3_g"], p["ln3_b"])
    return y.reshape(B, S, D)


def decoder_forward(tokens, enc_output, params, num_heads):
    # embedding lookup (glue) + precomputed sinusoidal positional encoding
    x = jnp.take(params["embedding"], tokens, axis=0)           # [B, S, D]
    S = x.shape[1]
    x = x + params["pos_encoding"][None, :S]
    # dropout = identity (eval mode)
    for lp in params["layers"]:
        x = decoder_block(x, enc_output, lp, num_heads)
    return x


# ----------------------------------------------------------------------------
# Deterministic parameter init (weights staged in bf16, attention scale folded)
# ----------------------------------------------------------------------------

def _init_linear(key, din, dout):
    w = jax.random.normal(key, (din, dout), jnp.float32) * 0.02
    b = jnp.zeros((dout,), jnp.float32)
    return w, b


def _init_mha(key, d, num_heads):
    ks = jax.random.split(key, 4)
    wq, bq = _init_linear(ks[0], d, d)
    wk, bk = _init_linear(ks[1], d, d)
    wv, bv = _init_linear(ks[2], d, d)
    wo, bo = _init_linear(ks[3], d, d)
    scale = 1.0 / math.sqrt(d // num_heads)
    return {
        # 1/sqrt(dh) folded into the Q projection; matmul weights stored bf16
        # (halves weight HBM->VMEM DMA and removes in-kernel casts).
        "wq": (wq * scale).astype(MXU_DTYPE),
        "bq": bq * scale,
        "wkv": jnp.concatenate([wk, wv], axis=1).astype(MXU_DTYPE),   # [D, 2D]
        "bkv": jnp.concatenate([bk, bv], axis=0),
        "wo": wo.astype(MXU_DTYPE),
        "bo": bo,
    }


def init_decoder_params(key, vocab_size, embed_dim, ff_hidden_dim, num_layers,
                        num_heads, max_len=64):
    keys = jax.random.split(key, num_layers + 1)
    params = {
        "embedding": jax.random.normal(keys[0], (vocab_size, embed_dim),
                                       jnp.float32) * 0.02,
        "pos_encoding": positional_encoding(max_len, embed_dim),  # hoisted constant
        "layers": [],
    }
    for li in range(num_layers):
        lk = jax.random.split(keys[li + 1], 4)
        w1, b1 = _init_linear(lk[2], embed_dim, ff_hidden_dim)
        w2, b2 = _init_linear(lk[3], ff_hidden_dim, embed_dim)
        params["layers"].append({
            "self_attn": _init_mha(lk[0], embed_dim, num_heads),
            "enc_dec_attn": _init_mha(lk[1], embed_dim, num_heads),
            "ff_w1": w1.astype(MXU_DTYPE), "ff_b1": b1,
            "ff_w2": w2.astype(MXU_DTYPE), "ff_b2": b2,
            "ln1_g": jnp.ones((embed_dim,), jnp.float32),
            "ln1_b": jnp.zeros((embed_dim,), jnp.float32),
            "ln2_g": jnp.ones((embed_dim,), jnp.float32),
            "ln2_b": jnp.zeros((embed_dim,), jnp.float32),
            "ln3_g": jnp.ones((embed_dim,), jnp.float32),
            "ln3_b": jnp.zeros((embed_dim,), jnp.float32),
        })
    return params


# ----------------------------------------------------------------------------
# Main
# ----------------------------------------------------------------------------

if __name__ == "__main__":
    vocab_size = 50
    embed_dim = 32
    num_heads = 4
    ff_hidden_dim = 64
    num_layers = 2
    B, tgt_len, src_len = 2, 8, 8

    root = jax.random.PRNGKey(0)
    k_tok, k_enc, k_param = jax.random.split(root, 3)

    tokens = jax.random.randint(k_tok, (B, tgt_len), 0, vocab_size, dtype=jnp.int32)
    enc_output = jax.random.normal(k_enc, (B, src_len, embed_dim), jnp.float32)

    params = init_decoder_params(k_param, vocab_size, embed_dim,
                                 ff_hidden_dim, num_layers, num_heads)

    # jit the whole forward: single XLA program, no per-pallas_call Python dispatch.
    fwd = jax.jit(functools.partial(decoder_forward, num_heads=num_heads))

    out = fwd(tokens, enc_output, params)
    out = jax.block_until_ready(out)
    assert out.shape == (B, tgt_len, embed_dim)
    assert jnp.all(jnp.isfinite(out))
    print("KERNEL_OK")
</pallas_src>

<mosaic_0001>
module attributes {stable_mosaic.version = 11 : i64} {
  func.func @_fused_ffn_ln_kernel(%arg0: i32, %arg1: memref<16x32xf32, #tpu.memory_space<vmem>>, %arg2: memref<32x64xbf16, #tpu.memory_space<vmem>>, %arg3: memref<1x64xf32, #tpu.memory_space<vmem>>, %arg4: memref<64x32xbf16, #tpu.memory_space<vmem>>, %arg5: memref<1x32xf32, #tpu.memory_space<vmem>>, %arg6: memref<1x32xf32, #tpu.memory_space<vmem>>, %arg7: memref<1x32xf32, #tpu.memory_space<vmem>>, %arg8: memref<16x32xf32, #tpu.memory_space<vmem>>) attributes {dimension_semantics = [#tpu.dimension_semantics<parallel>], iteration_bounds = array<i64: 1>, scalar_prefetch = 0 : i64, scratch_operands = 0 : i64, tpu.core_type = #tpu.core_type<tc>, window_params = [{transform_indices = @transform_0, window_bounds = array<i64: 16, 32>}, {pipeline_mode = #tpu.pipeline_mode<synchronous>, transform_indices = @transform_1, window_bounds = array<i64: 32, 64>}, {pipeline_mode = #tpu.pipeline_mode<synchronous>, transform_indices = @transform_2, window_bounds = array<i64: 1, 64>}, {pipeline_mode = #tpu.pipeline_mode<synchronous>, transform_indices = @transform_3, window_bounds = array<i64: 64, 32>}, {pipeline_mode = #tpu.pipeline_mode<synchronous>, transform_indices = @transform_4, window_bounds = array<i64: 1, 32>}, {pipeline_mode = #tpu.pipeline_mode<synchronous>, transform_indices = @transform_5, window_bounds = array<i64: 1, 32>}, {pipeline_mode = #tpu.pipeline_mode<synchronous>, transform_indices = @transform_6, window_bounds = array<i64: 1, 32>}, {transform_indices = @transform_7, window_bounds = array<i64: 16, 32>}]} {
    %c0 = arith.constant 0 : index
    %c0_0 = arith.constant 0 : index
    %0 = vector.load %arg1[%c0, %c0_0] : memref<16x32xf32, #tpu.memory_space<vmem>>, vector<16x32xf32>
    %1 = arith.truncf %0 : vector<16x32xf32> to vector<16x32xbf16>
    %c0_1 = arith.constant 0 : index
    %c0_2 = arith.constant 0 : index
    %2 = vector.load %arg2[%c0_1, %c0_2] : memref<32x64xbf16, #tpu.memory_space<vmem>>, vector<32x64xbf16>
    %cst = arith.constant dense<0.000000e+00> : vector<16x64xf32>
    %3 = tpu.matmul %1, %2, %cst {dimension_numbers = #tpu.dot_dimension_numbers<[1], [0], [0], [1], [0, 0, 1, 1], [], []>} : vector<16x32xbf16>, vector<32x64xbf16>, vector<16x64xf32> -> vector<16x64xf32>
    %c0_3 = arith.constant 0 : index
    %c0_4 = arith.constant 0 : index
    %4 = vector.load %arg3[%c0_3, %c0_4] : memref<1x64xf32, #tpu.memory_space<vmem>>, vector<1x64xf32>
    %5 = vector.broadcast %4 : vector<1x64xf32> to vector<16x64xf32>
    %6 = arith.addf %3, %5 : vector<16x64xf32>
    %cst_5 = arith.constant 0.000000e+00 : f32
    %7 = vector.broadcast %cst_5 : f32 to vector<16x64xf32>
    %8 = arith.maximumf %6, %7 : vector<16x64xf32>
    %9 = arith.truncf %8 : vector<16x64xf32> to vector<16x64xbf16>
    %c0_6 = arith.constant 0 : index
    %c0_7 = arith.constant 0 : index
    %10 = vector.load %arg4[%c0_6, %c0_7] : memref<64x32xbf16, #tpu.memory_space<vmem>>, vector<64x32xbf16>
    %cst_8 = arith.constant dense<0.000000e+00> : vector<16x32xf32>
    %11 = tpu.matmul %9, %10, %cst_8 {dimension_numbers = #tpu.dot_dimension_numbers<[1], [0], [0], [1], [0, 0, 1, 1], [], []>} : vector<16x64xbf16>, vector<64x32xbf16>, vector<16x32xf32> -> vector<16x32xf32>
    %c0_9 = arith.constant 0 : index
    %c0_10 = arith.constant 0 : index
    %12 = vector.load %arg5[%c0_9, %c0_10] : memref<1x32xf32, #tpu.memory_space<vmem>>, vector<1x32xf32>
    %13 = vector.broadcast %12 : vector<1x32xf32> to vector<16x32xf32>
    %14 = arith.addf %11, %13 : vector<16x32xf32>
    %15 = arith.addf %0, %14 : vector<16x32xf32>
    %cst_11 = arith.constant dense<0.000000e+00> : vector<16xf32>
    %16 = vector.multi_reduction <add>, %15, %cst_11 [1] : vector<16x32xf32> to vector<16xf32>
    %17 = vector.shape_cast %16 : vector<16xf32> to vector<16x1xf32>
    %cst_12 = arith.constant 3.200000e+01 : f32
    %18 = vector.broadcast %cst_12 : f32 to vector<16x1xf32>
    %19 = arith.divf %17, %18 : vector<16x1xf32>
    %20 = vector.broadcast %19 : vector<16x1xf32> to vector<16x32xf32>
    %21 = arith.subf %15, %20 : vector<16x32xf32>
    %22 = vector.broadcast %19 : vector<16x1xf32> to vector<16x32xf32>
    %23 = arith.subf %15, %22 : vector<16x32xf32>
    %24 = arith.mulf %21, %23 : vector<16x32xf32>
    %cst_13 = arith.constant dense<0.000000e+00> : vector<16xf32>
    %25 = vector.multi_reduction <add>, %24, %cst_13 [1] : vector<16x32xf32> to vector<16xf32>
    %26 = vector.shape_cast %25 : vector<16xf32> to vector<16x1xf32>
    %cst_14 = arith.constant 3.200000e+01 : f32
    %27 = vector.broadcast %cst_14 : f32 to vector<16x1xf32>
    %28 = arith.divf %26, %27 : vector<16x1xf32>
    %29 = vector.broadcast %19 : vector<16x1xf32> to vector<16x32xf32>
    %30 = arith.subf %15, %29 : vector<16x32xf32>
    %cst_15 = arith.constant 9.99999974E-6 : f32
    %31 = vector.broadcast %cst_15 : f32 to vector<16x1xf32>
    %32 = arith.addf %28, %31 : vector<16x1xf32>
    %33 = math.rsqrt %32 : vector<16x1xf32>
    %34 = vector.broadcast %33 : vector<16x1xf32> to vector<16x32xf32>
    %35 = arith.mulf %30, %34 : vector<16x32xf32>
    %c0_16 = arith.constant 0 : index
    %c0_17 = arith.constant 0 : index
    %36 = vector.load %arg6[%c0_16, %c0_17] : memref<1x32xf32, #tpu.memory_space<vmem>>, vector<1x32xf32>
    %37 = vector.broadcast %36 : vector<1x32xf32> to vector<16x32xf32>
    %38 = arith.mulf %35, %37 : vector<16x32xf32>
    %c0_18 = arith.constant 0 : index
    %c0_19 = arith.constant 0 : index
    %39 = vector.load %arg7[%c0_18, %c0_19] : memref<1x32xf32, #tpu.memory_space<vmem>>, vector<1x32xf32>
    %40 = vector.broadcast %39 : vector<1x32xf32> to vector<16x32xf32>
    %41 = arith.addf %38, %40 : vector<16x32xf32>
    %c0_20 = arith.constant 0 : index
    %c0_21 = arith.constant 0 : index
    %42 = vector.load %arg8[%c0_20, %c0_21] : memref<16x32xf32, #tpu.memory_space<vmem>>, vector<16x32xf32>
    tpu.vector_store %arg8[%c0_20, %c0_21], %41 {strides = array<i32>} : memref<16x32xf32, #tpu.memory_space<vmem>>, vector<16x32xf32>,
    return
  }
  func.func @transform_0(%arg0: i32) -> (i32, i32) {
    %c0_i32 = arith.constant 0 : i32
    %c0_i32_0 = arith.constant 0 : i32
    return %arg0, %c0_i32 : i32, i32
  }
  func.func @transform_1(%arg0: i32) -> (i32, i32) {
    %c0_i32 = arith.constant 0 : i32
    %c0_i32_0 = arith.constant 0 : i32
    %c0_i32_1 = arith.constant 0 : i32
    return %c0_i32, %c0_i32_0 : i32, i32
  }
  func.func @transform_2(%arg0: i32) -> (i32, i32) {
    %c0_i32 = arith.constant 0 : i32
    %c0_i32_0 = arith.constant 0 : i32
    %c0_i32_1 = arith.constant 0 : i32
    return %c0_i32, %c0_i32_0 : i32, i32
  }
  func.func @transform_3(%arg0: i32) -> (i32, i32) {
    %c0_i32 = arith.constant 0 : i32
    %c0_i32_0 = arith.constant 0 : i32
    %c0_i32_1 = arith.constant 0 : i32
    return %c0_i32, %c0_i32_0 : i32, i32
  }
  func.func @transform_4(%arg0: i32) -> (i32, i32) {
    %c0_i32 = arith.constant 0 : i32
    %c0_i32_0 = arith.constant 0 : i32
    %c0_i32_1 = arith.constant 0 : i32
    return %c0_i32, %c0_i32_0 : i32, i32
  }
  func.func @transform_5(%arg0: i32) -> (i32, i32) {
    %c0_i32 = arith.constant 0 : i32
    %c0_i32_0 = arith.constant 0 : i32
    %c0_i32_1 = arith.constant 0 : i32
    return %c0_i32, %c0_i32_0 : i32, i32
  }
  func.func @transform_6(%arg0: i32) -> (i32, i32) {
    %c0_i32 = arith.constant 0 : i32
    %c0_i32_0 = arith.constant 0 : i32
    %c0_i32_1 = arith.constant 0 : i32
    return %c0_i32, %c0_i32_0 : i32, i32
  }
  func.func @transform_7(%arg0: i32) -> (i32, i32) {
    %c0_i32 = arith.constant 0 : i32
    %c0_i32_0 = arith.constant 0 : i32
    return %arg0, %c0_i32 : i32, i32
  }
}

module attributes {stable_mosaic.version = 11 : i64} {
  func.func @_fused_mha_ln_kernel(%arg0: i32, %arg1: i32, %arg2: memref<1x8x32xf32, #tpu.memory_space<vmem>>, %arg3: memref<1x8x32xf32, #tpu.memory_space<vmem>>, %arg4: memref<32x32xbf16, #tpu.memory_space<vmem>>, %arg5: memref<1x32xf32, #tpu.memory_space<vmem>>, %arg6: memref<32x64xbf16, #tpu.memory_space<vmem>>, %arg7: memref<1x64xf32, #tpu.memory_space<vmem>>, %arg8: memref<32x32xbf16, #tpu.memory_space<vmem>>, %arg9: memref<1x32xf32, #tpu.memory_space<vmem>>, %arg10: memref<1x32xf32, #tpu.memory_space<vmem>>, %arg11: memref<1x32xf32, #tpu.memory_space<vmem>>, %arg12: memref<1x8x32xf32, #tpu.memory_space<vmem>>) attributes {dimension_semantics = [#tpu.dimension_semantics<parallel>, #tpu.dimension_semantics<parallel>], iteration_bounds = array<i64: 2, 1>, scalar_prefetch = 0 : i64, scratch_operands = 0 : i64, tpu.core_type = #tpu.core_type<tc>, window_params = [{transform_indices = @transform_0, window_bounds = array<i64: 1, 8, 32>}, {transform_indices = @transform_1, window_bounds = array<i64: 1, 8, 32>}, {pipeline_mode = #tpu.pipeline_mode<synchronous>, transform_indices = @transform_2, window_bounds = array<i64: 32, 32>}, {pipeline_mode = #tpu.pipeline_mode<synchronous>, transform_indices = @transform_3, window_bounds = array<i64: 1, 32>}, {pipeline_mode = #tpu.pipeline_mode<synchronous>, transform_indices = @transform_4, window_bounds = array<i64: 32, 64>}, {pipeline_mode = #tpu.pipeline_mode<synchronous>, transform_indices = @transform_5, window_bounds = array<i64: 1, 64>}, {pipeline_mode = #tpu.pipeline_mode<synchronous>, transform_indices = @transform_6, window_bounds = array<i64: 32, 32>}, {pipeline_mode = #tpu.pipeline_mode<synchronous>, transform_indices = @transform_7, window_bounds = array<i64: 1, 32>}, {pipeline_mode = #tpu.pipeline_mode<synchronous>, transform_indices = @transform_8, window_bounds = array<i64: 1, 32>}, {pipeline_mode = #tpu.pipeline_mode<synchronous>, transform_indices = @transform_9, window_bounds = array<i64: 1, 32>}, {transform_indices = @transform_10, window_bounds = array<i64: 1, 8, 32>}]} {
    %c0 = arith.constant 0 : index
    %c0_0 = arith.constant 0 : index
    %c0_1 = arith.constant 0 : index
    %0 = vector.load %arg2[%c0, %c0_0, %c0_1] : memref<1x8x32xf32, #tpu.memory_space<vmem>>, vector<1x8x32xf32>
    %1 = vector.shape_cast %0 : vector<1x8x32xf32> to vector<8x32xf32>
    %2 = arith.truncf %1 : vector<8x32xf32> to vector<8x32xbf16>
    %c0_2 = arith.constant 0 : index
    %c0_3 = arith.constant 0 : index
    %c0_4 = arith.constant 0 : index
    %3 = vector.load %arg3[%c0_2, %c0_3, %c0_4] : memref<1x8x32xf32, #tpu.memory_space<vmem>>, vector<1x8x32xf32>
    %4 = vector.shape_cast %3 : vector<1x8x32xf32> to vector<8x32xf32>
    %5 = arith.truncf %4 : vector<8x32xf32> to vector<8x32xbf16>
    %c0_5 = arith.constant 0 : index
    %c0_6 = arith.constant 0 : index
    %6 = vector.load %arg4[%c0_5, %c0_6] : memref<32x32xbf16, #tpu.memory_space<vmem>>, vector<32x32xbf16>
    %cst = arith.constant dense<0.000000e+00> : vector<8x32xf32>
    %7 = tpu.matmul %2, %6, %cst {dimension_numbers = #tpu.dot_dimension_numbers<[1], [0], [0], [1], [0, 0, 1, 1], [], []>} : vector<8x32xbf16>, vector<32x32xbf16>, vector<8x32xf32> -> vector<8x32xf32>
    %c0_7 = arith.constant 0 : index
    %c0_8 = arith.constant 0 : index
    %8 = vector.load %arg5[%c0_7, %c0_8] : memref<1x32xf32, #tpu.memory_space<vmem>>, vector<1x32xf32>
    %9 = vector.broadcast %8 : vector<1x32xf32> to vector<8x32xf32>
    %10 = arith.addf %7, %9 : vector<8x32xf32>
    %c0_9 = arith.constant 0 : index
    %c0_10 = arith.constant 0 : index
    %11 = vector.load %arg6[%c0_9, %c0_10] : memref<32x64xbf16, #tpu.memory_space<vmem>>, vector<32x64xbf16>
    %cst_11 = arith.constant dense<0.000000e+00> : vector<8x64xf32>
    %12 = tpu.matmul %5, %11, %cst_11 {dimension_numbers = #tpu.dot_dimension_numbers<[1], [0], [0], [1], [0, 0, 1, 1], [], []>} : vector<8x32xbf16>, vector<32x64xbf16>, vector<8x64xf32> -> vector<8x64xf32>
    %c0_12 = arith.constant 0 : index
    %c0_13 = arith.constant 0 : index
    %13 = vector.load %arg7[%c0_12, %c0_13] : memref<1x64xf32, #tpu.memory_space<vmem>>, vector<1x64xf32>
    %14 = vector.broadcast %13 : vector<1x64xf32> to vector<8x64xf32>
    %15 = arith.addf %12, %14 : vector<8x64xf32>
    %16 = vector.extract_strided_slice %10 {offsets = [0, 0], sizes = [8, 8], strides = [1, 1]} : vector<8x32xf32> to vector<8x8xf32>
    %17 = vector.extract_strided_slice %10 {offsets = [0, 8], sizes = [8, 8], strides = [1, 1]} : vector<8x32xf32> to vector<8x8xf32>
    %18 = vector.extract_strided_slice %10 {offsets = [0, 16], sizes = [8, 8], strides = [1, 1]} : vector<8x32xf32> to vector<8x8xf32>
    %19 = vector.extract_strided_slice %10 {offsets = [0, 24], sizes = [8, 8], strides = [1, 1]} : vector<8x32xf32> to vector<8x8xf32>
    %20 = vector.shape_cast %16 : vector<8x8xf32> to vector<1x8x8xf32>
    %21 = vector.shape_cast %17 : vector<8x8xf32> to vector<1x8x8xf32>
    %22 = vector.shape_cast %18 : vector<8x8xf32> to vector<1x8x8xf32>
    %23 = vector.shape_cast %19 : vector<8x8xf32> to vector<1x8x8xf32>
    %24 = tpu.concatenate %20, %21, %22, %23 in 0 : vector<1x8x8xf32>, vector<1x8x8xf32>, vector<1x8x8xf32>, vector<1x8x8xf32> -> vector<4x8x8xf32>
    %25 = arith.truncf %24 : vector<4x8x8xf32> to vector<4x8x8xbf16>
    %26 = vector.extract_strided_slice %15 {offsets = [0, 0], sizes = [8, 8], strides = [1, 1]} : vector<8x64xf32> to vector<8x8xf32>
    %27 = vector.extract_strided_slice %15 {offsets = [0, 8], sizes = [8, 8], strides = [1, 1]} : vector<8x64xf32> to vector<8x8xf32>
    %28 = vector.extract_strided_slice %15 {offsets = [0, 16], sizes = [8, 8], strides = [1, 1]} : vector<8x64xf32> to vector<8x8xf32>
    %29 = vector.extract_strided_slice %15 {offsets = [0, 24], sizes = [8, 8], strides = [1, 1]} : vector<8x64xf32> to vector<8x8xf32>
    %30 = vector.shape_cast %26 : vector<8x8xf32> to vector<1x8x8xf32>
    %31 = vector.shape_cast %27 : vector<8x8xf32> to vector<1x8x8xf32>
    %32 = vector.shape_cast %28 : vector<8x8xf32> to vector<1x8x8xf32>
    %33 = vector.shape_cast %29 : vector<8x8xf32> to vector<1x8x8xf32>
    %34 = tpu.concatenate %30, %31, %32, %33 in 0 : vector<1x8x8xf32>, vector<1x8x8xf32>, vector<1x8x8xf32>, vector<1x8x8xf32> -> vector<4x8x8xf32>
    %35 = arith.truncf %34 : vector<4x8x8xf32> to vector<4x8x8xbf16>
    %36 = vector.extract_strided_slice %15 {offsets = [0, 32], sizes = [8, 8], strides = [1, 1]} : vector<8x64xf32> to vector<8x8xf32>
    %37 = vector.extract_strided_slice %15 {offsets = [0, 40], sizes = [8, 8], strides = [1, 1]} : vector<8x64xf32> to vector<8x8xf32>
    %38 = vector.extract_strided_slice %15 {offsets = [0, 48], sizes = [8, 8], strides = [1, 1]} : vector<8x64xf32> to vector<8x8xf32>
    %39 = vector.extract_strided_slice %15 {offsets = [0, 56], sizes = [8, 8], strides = [1, 1]} : vector<8x64xf32> to vector<8x8xf32>
    %40 = vector.shape_cast %36 : vector<8x8xf32> to vector<1x8x8xf32>
    %41 = vector.shape_cast %37 : vector<8x8xf32> to vector<1x8x8xf32>
    %42 = vector.shape_cast %38 : vector<8x8xf32> to vector<1x8x8xf32>
    %43 = vector.shape_cast %39 : vector<8x8xf32> to vector<1x8x8xf32>
    %44 = tpu.concatenate %40, %41, %42, %43 in 0 : vector<1x8x8xf32>, vector<1x8x8xf32>, vector<1x8x8xf32>, vector<1x8x8xf32> -> vector<4x8x8xf32>
    %45 = arith.truncf %44 : vector<4x8x8xf32> to vector<4x8x8xbf16>
    "tpu.trace_start"() <{level = 10 : i32, message = "hqd,hkd->hqk"}> : () -> ()
    %cst_14 = arith.constant dense<0.000000e+00> : vector<4x8x8xf32>
    %46 = tpu.matmul %25, %35, %cst_14 {dimension_numbers = #tpu.dot_dimension_numbers<[2], [2], [1], [1], [0, 0, 0, 1, 1, 1], [0], [0]>} : vector<4x8x8xbf16>, vector<4x8x8xbf16>, vector<4x8x8xf32> -> vector<4x8x8xf32>
    "tpu.trace_stop"() : () -> ()
    %cst_15 = arith.constant dense<0xFF800000> : vector<4x8xf32>
    %47 = vector.multi_reduction <maximumf>, %46, %cst_15 [2] : vector<4x8x8xf32> to vector<4x8xf32>
    %48 = vector.shape_cast %47 : vector<4x8xf32> to vector<4x8x1xf32>
    %49 = vector.broadcast %48 : vector<4x8x1xf32> to vector<4x8x8xf32>
    %50 = arith.subf %46, %49 : vector<4x8x8xf32>
    %51 = math.exp %50 : vector<4x8x8xf32>
    %cst_16 = arith.constant dense<0.000000e+00> : vector<4x8xf32>
    %52 = vector.multi_reduction <add>, %51, %cst_16 [2] : vector<4x8x8xf32> to vector<4x8xf32>
    %53 = vector.shape_cast %52 : vector<4x8xf32> to vector<4x8x1xf32>
    %54 = tpu.reciprocal %53 {approx = true} : vector<4x8x1xf32> -> vector<4x8x1xf32>
    %55 = vector.broadcast %54 : vector<4x8x1xf32> to vector<4x8x8xf32>
    %56 = arith.mulf %51, %55 : vector<4x8x8xf32>
    %57 = arith.truncf %56 : vector<4x8x8xf32> to vector<4x8x8xbf16>
    "tpu.trace_start"() <{level = 10 : i32, message = "hqk,hkd->hqd"}> : () -> ()
    %cst_17 = arith.constant dense<0.000000e+00> : vector<4x8x8xf32>
    %58 = tpu.matmul %57, %45, %cst_17 {dimension_numbers = #tpu.dot_dimension_numbers<[2], [1], [1], [2], [0, 0, 0, 1, 1, 2], [0], [0]>} : vector<4x8x8xbf16>, vector<4x8x8xbf16>, vector<4x8x8xf32> -> vector<4x8x8xf32>
    "tpu.trace_stop"() : () -> ()
    %59 = vector.extract_strided_slice %58 {offsets = [0, 0, 0], sizes = [1, 8, 8], strides = [1, 1, 1]} : vector<4x8x8xf32> to vector<1x8x8xf32>
    %60 = vector.shape_cast %59 : vector<1x8x8xf32> to vector<8x8xf32>
    %61 = vector.extract_strided_slice %58 {offsets = [1, 0, 0], sizes = [1, 8, 8], strides = [1, 1, 1]} : vector<4x8x8xf32> to vector<1x8x8xf32>
    %62 = vector.shape_cast %61 : vector<1x8x8xf32> to vector<8x8xf32>
    %63 = vector.extract_strided_slice %58 {offsets = [2, 0, 0], sizes = [1, 8, 8], strides = [1, 1, 1]} : vector<4x8x8xf32> to vector<1x8x8xf32>
    %64 = vector.shape_cast %63 : vector<1x8x8xf32> to vector<8x8xf32>
    %65 = vector.extract_strided_slice %58 {offsets = [3, 0, 0], sizes = [1, 8, 8], strides = [1, 1, 1]} : vector<4x8x8xf32> to vector<1x8x8xf32>
    %66 = vector.shape_cast %65 : vector<1x8x8xf32> to vector<8x8xf32>
    %67 = tpu.concatenate %60, %62, %64, %66 in 1 : vector<8x8xf32>, vector<8x8xf32>, vector<8x8xf32>, vector<8x8xf32> -> vector<8x32xf32>
    %68 = arith.truncf %67 : vector<8x32xf32> to vector<8x32xbf16>
    %c0_18 = arith.constant 0 : index
    %c0_19 = arith.constant 0 : index
    %69 = vector.load %arg8[%c0_18, %c0_19] : memref<32x32xbf16, #tpu.memory_space<vmem>>, vector<32x32xbf16>
    %cst_20 = arith.constant dense<0.000000e+00> : vector<8x32xf32>
    %70 = tpu.matmul %68, %69, %cst_20 {dimension_numbers = #tpu.dot_dimension_numbers<[1], [0], [0], [1], [0, 0, 1, 1], [], []>} : vector<8x32xbf16>, vector<32x32xbf16>, vector<8x32xf32> -> vector<8x32xf32>
    %c0_21 = arith.constant 0 : index
    %c0_22 = arith.constant 0 : index
    %71 = vector.load %arg9[%c0_21, %c0_22] : memref<1x32xf32, #tpu.memory_space<vmem>>, vector<1x32xf32>
    %72 = vector.broadcast %71 : vector<1x32xf32> to vector<8x32xf32>
    %73 = arith.addf %70, %72 : vector<8x32xf32>
    %74 = arith.addf %1, %73 : vector<8x32xf32>
    %cst_23 = arith.constant dense<0.000000e+00> : vector<8xf32>
    %75 = vector.multi_reduction <add>, %74, %cst_23 [1] : vector<8x32xf32> to vector<8xf32>
    %76 = vector.shape_cast %75 : vector<8xf32> to vector<8x1xf32>
    %cst_24 = arith.constant 3.200000e+01 : f32
    %77 = vector.broadcast %cst_24 : f32 to vector<8x1xf32>
    %78 = arith.divf %76, %77 : vector<8x1xf32>
    %79 = vector.broadcast %78 : vector<8x1xf32> to vector<8x32xf32>
    %80 = arith.subf %74, %79 : vector<8x32xf32>
    %81 = vector.broadcast %78 : vector<8x1xf32> to vector<8x32xf32>
    %82 = arith.subf %74, %81 : vector<8x32xf32>
    %83 = arith.mulf %80, %82 : vector<8x32xf32>
    %cst_25 = arith.constant dense<0.000000e+00> : vector<8xf32>
    %84 = vector.multi_reduction <add>, %83, %cst_25 [1] : vector<8x32xf32> to vector<8xf32>
    %85 = vector.shape_cast %84 : vector<8xf32> to vector<8x1xf32>
    %cst_26 = arith.constant 3.200000e+01 : f32
    %86 = vector.broadcast %cst_26 : f32 to vector<8x1xf32>
    %87 = arith.divf %85, %86 : vector<8x1xf32>
    %88 = vector.broadcast %78 : vector<8x1xf32> to vector<8x32xf32>
    %89 = arith.subf %74, %88 : vector<8x32xf32>
    %cst_27 = arith.constant 9.99999974E-6 : f32
    %90 = vector.broadcast %cst_27 : f32 to vector<8x1xf32>
    %91 = arith.addf %87, %90 : vector<8x1xf32>
    %92 = math.rsqrt %91 : vector<8x1xf32>
    %93 = vector.broadcast %92 : vector<8x1xf32> to vector<8x32xf32>
    %94 = arith.mulf %89, %93 : vector<8x32xf32>
    %c0_28 = arith.constant 0 : index
    %c0_29 = arith.constant 0 : index
    %95 = vector.load %arg10[%c0_28, %c0_29] : memref<1x32xf32, #tpu.memory_space<vmem>>, vector<1x32xf32>
    %96 = vector.broadcast %95 : vector<1x32xf32> to vector<8x32xf32>
    %97 = arith.mulf %94, %96 : vector<8x32xf32>
    %c0_30 = arith.constant 0 : index
    %c0_31 = arith.constant 0 : index
    %98 = vector.load %arg11[%c0_30, %c0_31] : memref<1x32xf32, #tpu.memory_space<vmem>>, vector<1x32xf32>
    %99 = vector.broadcast %98 : vector<1x32xf32> to vector<8x32xf32>
    %100 = arith.addf %97, %99 : vector<8x32xf32>
    %c0_32 = arith.constant 0 : index
    %c0_33 = arith.constant 0 : index
    %c0_34 = arith.constant 0 : index
    %101 = vector.load %arg12[%c0_32, %c0_33, %c0_34] : memref<1x8x32xf32, #tpu.memory_space<vmem>>, vector<1x8x32xf32>
    %102 = vector.shape_cast %101 : vector<1x8x32xf32> to vector<8x32xf32>
    %103 = vector.shape_cast %100 : vector<8x32xf32> to vector<1x8x32xf32>
    tpu.vector_store %arg12[%c0_32, %c0_33, %c0_34], %103 {strides = array<i32>} : memref<1x8x32xf32, #tpu.memory_space<vmem>>, vector<1x8x32xf32>,
    return
  }
  func.func @transform_0(%arg0: i32, %arg1: i32) -> (i32, i32, i32) {
    %c0_i32 = arith.constant 0 : i32
    %c0_i32_0 = arith.constant 0 : i32
    return %arg0, %arg1, %c0_i32 : i32, i32, i32
  }
  func.func @transform_1(%arg0: i32, %arg1: i32) -> (i32, i32, i32) {
    %c0_i32 = arith.constant 0 : i32
    %c0_i32_0 = arith.constant 0 : i32
    %c0_i32_1 = arith.constant 0 : i32
    return %arg0, %c0_i32, %c0_i32_0 : i32, i32, i32
  }
  func.func @transform_2(%arg0: i32, %arg1: i32) -> (i32, i32) {
    %c0_i32 = arith.constant 0 : i32
    %c0_i32_0 = arith.constant 0 : i32
    %c0_i32_1 = arith.constant 0 : i32
    return %c0_i32, %c0_i32_0 : i32, i32
  }
  func.func @transform_3(%arg0: i32, %arg1: i32) -> (i32, i32) {
    %c0_i32 = arith.constant 0 : i32
    %c0_i32_0 = arith.constant 0 : i32
    %c0_i32_1 = arith.constant 0 : i32
    return %c0_i32, %c0_i32_0 : i32, i32
  }
  func.func @transform_4(%arg0: i32, %arg1: i32) -> (i32, i32) {
    %c0_i32 = arith.constant 0 : i32
    %c0_i32_0 = arith.constant 0 : i32
    %c0_i32_1 = arith.constant 0 : i32
    return %c0_i32, %c0_i32_0 : i32, i32
  }
  func.func @transform_5(%arg0: i32, %arg1: i32) -> (i32, i32) {
    %c0_i32 = arith.constant 0 : i32
    %c0_i32_0 = arith.constant 0 : i32
    %c0_i32_1 = arith.constant 0 : i32
    return %c0_i32, %c0_i32_0 : i32, i32
  }
  func.func @transform_6(%arg0: i32, %arg1: i32) -> (i32, i32) {
    %c0_i32 = arith.constant 0 : i32
    %c0_i32_0 = arith.constant 0 : i32
    %c0_i32_1 = arith.constant 0 : i32
    return %c0_i32, %c0_i32_0 : i32, i32
  }
  func.func @transform_7(%arg0: i32, %arg1: i32) -> (i32, i32) {
    %c0_i32 = arith.constant 0 : i32
    %c0_i32_0 = arith.constant 0 : i32
    %c0_i32_1 = arith.constant 0 : i32
    return %c0_i32, %c0_i32_0 : i32, i32
  }
  func.func @transform_8(%arg0: i32, %arg1: i32) -> (i32, i32) {
    %c0_i32 = arith.constant 0 : i32
    %c0_i32_0 = arith.constant 0 : i32
    %c0_i32_1 = arith.constant 0 : i32
    return %c0_i32, %c0_i32_0 : i32, i32
  }
  func.func @transform_9(%arg0: i32, %arg1: i32) -> (i32, i32) {
    %c0_i32 = arith.constant 0 : i32
    %c0_i32_0 = arith.constant 0 : i32
    %c0_i32_1 = arith.constant 0 : i32
    return %c0_i32, %c0_i32_0 : i32, i32
  }
  func.func @transform_10(%arg0: i32, %arg1: i32) -> (i32, i32, i32) {
    %c0_i32 = arith.constant 0 : i32
    %c0_i32_0 = arith.constant 0 : i32
    return %arg0, %arg1, %c0_i32 : i32, i32, i32
  }
}

module attributes {stable_mosaic.version = 11 : i64} {
  func.func @_fused_mha_ln_kernel(%arg0: i32, %arg1: i32, %arg2: memref<1x8x32xf32, #tpu.memory_space<vmem>>, %arg3: memref<1x8x32xf32, #tpu.memory_space<vmem>>, %arg4: memref<32x32xbf16, #tpu.memory_space<vmem>>, %arg5: memref<1x32xf32, #tpu.memory_space<vmem>>, %arg6: memref<32x64xbf16, #tpu.memory_space<vmem>>, %arg7: memref<1x64xf32, #tpu.memory_space<vmem>>, %arg8: memref<32x32xbf16, #tpu.memory_space<vmem>>, %arg9: memref<1x32xf32, #tpu.memory_space<vmem>>, %arg10: memref<1x32xf32, #tpu.memory_space<vmem>>, %arg11: memref<1x32xf32, #tpu.memory_space<vmem>>, %arg12: memref<1x8x32xf32, #tpu.memory_space<vmem>>) attributes {dimension_semantics = [#tpu.dimension_semantics<parallel>, #tpu.dimension_semantics<parallel>], iteration_bounds = array<i64: 2, 1>, scalar_prefetch = 0 : i64, scratch_operands = 0 : i64, tpu.core_type = #tpu.core_type<tc>, window_params = [{transform_indices = @transform_0, window_bounds = array<i64: 1, 8, 32>}, {transform_indices = @transform_1, window_bounds = array<i64: 1, 8, 32>}, {pipeline_mode = #tpu.pipeline_mode<synchronous>, transform_indices = @transform_2, window_bounds = array<i64: 32, 32>}, {pipeline_mode = #tpu.pipeline_mode<synchronous>, transform_indices = @transform_3, window_bounds = array<i64: 1, 32>}, {pipeline_mode = #tpu.pipeline_mode<synchronous>, transform_indices = @transform_4, window_bounds = array<i64: 32, 64>}, {pipeline_mode = #tpu.pipeline_mode<synchronous>, transform_indices = @transform_5, window_bounds = array<i64: 1, 64>}, {pipeline_mode = #tpu.pipeline_mode<synchronous>, transform_indices = @transform_6, window_bounds = array<i64: 32, 32>}, {pipeline_mode = #tpu.pipeline_mode<synchronous>, transform_indices = @transform_7, window_bounds = array<i64: 1, 32>}, {pipeline_mode = #tpu.pipeline_mode<synchronous>, transform_indices = @transform_8, window_bounds = array<i64: 1, 32>}, {pipeline_mode = #tpu.pipeline_mode<synchronous>, transform_indices = @transform_9, window_bounds = array<i64: 1, 32>}, {transform_indices = @transform_10, window_bounds = array<i64: 1, 8, 32>}]} {
    %c0 = arith.constant 0 : index
    %c0_0 = arith.constant 0 : index
    %c0_1 = arith.constant 0 : index
    %0 = vector.load %arg2[%c0, %c0_0, %c0_1] : memref<1x8x32xf32, #tpu.memory_space<vmem>>, vector<1x8x32xf32>
    %1 = vector.shape_cast %0 : vector<1x8x32xf32> to vector<8x32xf32>
    %2 = arith.truncf %1 : vector<8x32xf32> to vector<8x32xbf16>
    %c0_2 = arith.constant 0 : index
    %c0_3 = arith.constant 0 : index
    %c0_4 = arith.constant 0 : index
    %3 = vector.load %arg3[%c0_2, %c0_3, %c0_4] : memref<1x8x32xf32, #tpu.memory_space<vmem>>, vector<1x8x32xf32>
    %4 = vector.shape_cast %3 : vector<1x8x32xf32> to vector<8x32xf32>
    %5 = arith.truncf %4 : vector<8x32xf32> to vector<8x32xbf16>
    %c0_5 = arith.constant 0 : index
    %c0_6 = arith.constant 0 : index
    %6 = vector.load %arg4[%c0_5, %c0_6] : memref<32x32xbf16, #tpu.memory_space<vmem>>, vector<32x32xbf16>
    %cst = arith.constant dense<0.000000e+00> : vector<8x32xf32>
    %7 = tpu.matmul %2, %6, %cst {dimension_numbers = #tpu.dot_dimension_numbers<[1], [0], [0], [1], [0, 0, 1, 1], [], []>} : vector<8x32xbf16>, vector<32x32xbf16>, vector<8x32xf32> -> vector<8x32xf32>
    %c0_7 = arith.constant 0 : index
    %c0_8 = arith.constant 0 : index
    %8 = vector.load %arg5[%c0_7, %c0_8] : memref<1x32xf32, #tpu.memory_space<vmem>>, vector<1x32xf32>
    %9 = vector.broadcast %8 : vector<1x32xf32> to vector<8x32xf32>
    %10 = arith.addf %7, %9 : vector<8x32xf32>
    %c0_9 = arith.constant 0 : index
    %c0_10 = arith.constant 0 : index
    %11 = vector.load %arg6[%c0_9, %c0_10] : memref<32x64xbf16, #tpu.memory_space<vmem>>, vector<32x64xbf16>
    %cst_11 = arith.constant dense<0.000000e+00> : vector<8x64xf32>
    %12 = tpu.matmul %5, %11, %cst_11 {dimension_numbers = #tpu.dot_dimension_numbers<[1], [0], [0], [1], [0, 0, 1, 1], [], []>} : vector<8x32xbf16>, vector<32x64xbf16>, vector<8x64xf32> -> vector<8x64xf32>
    %c0_12 = arith.constant 0 : index
    %c0_13 = arith.constant 0 : index
    %13 = vector.load %arg7[%c0_12, %c0_13] : memref<1x64xf32, #tpu.memory_space<vmem>>, vector<1x64xf32>
    %14 = vector.broadcast %13 : vector<1x64xf32> to vector<8x64xf32>
    %15 = arith.addf %12, %14 : vector<8x64xf32>
    %16 = vector.extract_strided_slice %10 {offsets = [0, 0], sizes = [8, 8], strides = [1, 1]} : vector<8x32xf32> to vector<8x8xf32>
    %17 = vector.extract_strided_slice %10 {offsets = [0, 8], sizes = [8, 8], strides = [1, 1]} : vector<8x32xf32> to vector<8x8xf32>
    %18 = vector.extract_strided_slice %10 {offsets = [0, 16], sizes = [8, 8], strides = [1, 1]} : vector<8x32xf32> to vector<8x8xf32>
    %19 = vector.extract_strided_slice %10 {offsets = [0, 24], sizes = [8, 8], strides = [1, 1]} : vector<8x32xf32> to vector<8x8xf32>
    %20 = vector.shape_cast %16 : vector<8x8xf32> to vector<1x8x8xf32>
    %21 = vector.shape_cast %17 : vector<8x8xf32> to vector<1x8x8xf32>
    %22 = vector.shape_cast %18 : vector<8x8xf32> to vector<1x8x8xf32>
    %23 = vector.shape_cast %19 : vector<8x8xf32> to vector<1x8x8xf32>
    %24 = tpu.concatenate %20, %21, %22, %23 in 0 : vector<1x8x8xf32>, vector<1x8x8xf32>, vector<1x8x8xf32>, vector<1x8x8xf32> -> vector<4x8x8xf32>
    %25 = arith.truncf %24 : vector<4x8x8xf32> to vector<4x8x8xbf16>
    %26 = vector.extract_strided_slice %15 {offsets = [0, 0], sizes = [8, 8], strides = [1, 1]} : vector<8x64xf32> to vector<8x8xf32>
    %27 = vector.extract_strided_slice %15 {offsets = [0, 8], sizes = [8, 8], strides = [1, 1]} : vector<8x64xf32> to vector<8x8xf32>
    %28 = vector.extract_strided_slice %15 {offsets = [0, 16], sizes = [8, 8], strides = [1, 1]} : vector<8x64xf32> to vector<8x8xf32>
    %29 = vector.extract_strided_slice %15 {offsets = [0, 24], sizes = [8, 8], strides = [1, 1]} : vector<8x64xf32> to vector<8x8xf32>
    %30 = vector.shape_cast %26 : vector<8x8xf32> to vector<1x8x8xf32>
    %31 = vector.shape_cast %27 : vector<8x8xf32> to vector<1x8x8xf32>
    %32 = vector.shape_cast %28 : vector<8x8xf32> to vector<1x8x8xf32>
    %33 = vector.shape_cast %29 : vector<8x8xf32> to vector<1x8x8xf32>
    %34 = tpu.concatenate %30, %31, %32, %33 in 0 : vector<1x8x8xf32>, vector<1x8x8xf32>, vector<1x8x8xf32>, vector<1x8x8xf32> -> vector<4x8x8xf32>
    %35 = arith.truncf %34 : vector<4x8x8xf32> to vector<4x8x8xbf16>
    %36 = vector.extract_strided_slice %15 {offsets = [0, 32], sizes = [8, 8], strides = [1, 1]} : vector<8x64xf32> to vector<8x8xf32>
    %37 = vector.extract_strided_slice %15 {offsets = [0, 40], sizes = [8, 8], strides = [1, 1]} : vector<8x64xf32> to vector<8x8xf32>
    %38 = vector.extract_strided_slice %15 {offsets = [0, 48], sizes = [8, 8], strides = [1, 1]} : vector<8x64xf32> to vector<8x8xf32>
    %39 = vector.extract_strided_slice %15 {offsets = [0, 56], sizes = [8, 8], strides = [1, 1]} : vector<8x64xf32> to vector<8x8xf32>
    %40 = vector.shape_cast %36 : vector<8x8xf32> to vector<1x8x8xf32>
    %41 = vector.shape_cast %37 : vector<8x8xf32> to vector<1x8x8xf32>
    %42 = vector.shape_cast %38 : vector<8x8xf32> to vector<1x8x8xf32>
    %43 = vector.shape_cast %39 : vector<8x8xf32> to vector<1x8x8xf32>
    %44 = tpu.concatenate %40, %41, %42, %43 in 0 : vector<1x8x8xf32>, vector<1x8x8xf32>, vector<1x8x8xf32>, vector<1x8x8xf32> -> vector<4x8x8xf32>
    %45 = arith.truncf %44 : vector<4x8x8xf32> to vector<4x8x8xbf16>
    "tpu.trace_start"() <{level = 10 : i32, message = "hqd,hkd->hqk"}> : () -> ()
    %cst_14 = arith.constant dense<0.000000e+00> : vector<4x8x8xf32>
    %46 = tpu.matmul %25, %35, %cst_14 {dimension_numbers = #tpu.dot_dimension_numbers<[2], [2], [1], [1], [0, 0, 0, 1, 1, 1], [0], [0]>} : vector<4x8x8xbf16>, vector<4x8x8xbf16>, vector<4x8x8xf32> -> vector<4x8x8xf32>
    "tpu.trace_stop"() : () -> ()
    %c8_i32 = arith.constant 8 : i32
    %47 = arith.muli %arg1, %c8_i32 : i32
    %48 = tpu.iota {dimensions = array<i32: 1>} : vector<1x8x8xi32>
    %49 = vector.broadcast %47 : i32 to vector<1x8x8xi32>
    %50 = arith.addi %48, %49 : vector<1x8x8xi32>
    %51 = tpu.iota {dimensions = array<i32: 2>} : vector<1x8x8xi32>
    %52 = arith.cmpi sge, %50, %51 : vector<1x8x8xi32>
    %cst_15 = arith.constant -1.000000e+09 : f32
    %53 = vector.shape_cast %52 : vector<1x8x8xi1> to vector<1x8x8xi1>
    %54 = vector.broadcast %53 : vector<1x8x8xi1> to vector<4x8x8xi1>
    %55 = vector.broadcast %cst_15 : f32 to vector<4x8x8xf32>
    %56 = arith.select %54, %46, %55 : vector<4x8x8xi1>, vector<4x8x8xf32>
    %cst_16 = arith.constant dense<0xFF800000> : vector<4x8xf32>
    %57 = vector.multi_reduction <maximumf>, %56, %cst_16 [2] : vector<4x8x8xf32> to vector<4x8xf32>
    %58 = vector.shape_cast %57 : vector<4x8xf32> to vector<4x8x1xf32>
    %59 = vector.broadcast %58 : vector<4x8x1xf32> to vector<4x8x8xf32>
    %60 = arith.subf %56, %59 : vector<4x8x8xf32>
    %61 = math.exp %60 : vector<4x8x8xf32>
    %cst_17 = arith.constant dense<0.000000e+00> : vector<4x8xf32>
    %62 = vector.multi_reduction <add>, %61, %cst_17 [2] : vector<4x8x8xf32> to vector<4x8xf32>
    %63 = vector.shape_cast %62 : vector<4x8xf32> to vector<4x8x1xf32>
    %64 = tpu.reciprocal %63 {approx = true} : vector<4x8x1xf32> -> vector<4x8x1xf32>
    %65 = vector.broadcast %64 : vector<4x8x1xf32> to vector<4x8x8xf32>
    %66 = arith.mulf %61, %65 : vector<4x8x8xf32>
    %67 = arith.truncf %66 : vector<4x8x8xf32> to vector<4x8x8xbf16>
    "tpu.trace_start"() <{level = 10 : i32, message = "hqk,hkd->hqd"}> : () -> ()
    %cst_18 = arith.constant dense<0.000000e+00> : vector<4x8x8xf32>
    %68 = tpu.matmul %67, %45, %cst_18 {dimension_numbers = #tpu.dot_dimension_numbers<[2], [1], [1], [2], [0, 0, 0, 1, 1, 2], [0], [0]>} : vector<4x8x8xbf16>, vector<4x8x8xbf16>, vector<4x8x8xf32> -> vector<4x8x8xf32>
    "tpu.trace_stop"() : () -> ()
    %69 = vector.extract_strided_slice %68 {offsets = [0, 0, 0], sizes = [1, 8, 8], strides = [1, 1, 1]} : vector<4x8x8xf32> to vector<1x8x8xf32>
    %70 = vector.shape_cast %69 : vector<1x8x8xf32> to vector<8x8xf32>
    %71 = vector.extract_strided_slice %68 {offsets = [1, 0, 0], sizes = [1, 8, 8], strides = [1, 1, 1]} : vector<4x8x8xf32> to vector<1x8x8xf32>
    %72 = vector.shape_cast %71 : vector<1x8x8xf32> to vector<8x8xf32>
    %73 = vector.extract_strided_slice %68 {offsets = [2, 0, 0], sizes = [1, 8, 8], strides = [1, 1, 1]} : vector<4x8x8xf32> to vector<1x8x8xf32>
    %74 = vector.shape_cast %73 : vector<1x8x8xf32> to vector<8x8xf32>
    %75 = vector.extract_strided_slice %68 {offsets = [3, 0, 0], sizes = [1, 8, 8], strides = [1, 1, 1]} : vector<4x8x8xf32> to vector<1x8x8xf32>
    %76 = vector.shape_cast %75 : vector<1x8x8xf32> to vector<8x8xf32>
    %77 = tpu.concatenate %70, %72, %74, %76 in 1 : vector<8x8xf32>, vector<8x8xf32>, vector<8x8xf32>, vector<8x8xf32> -> vector<8x32xf32>
    %78 = arith.truncf %77 : vector<8x32xf32> to vector<8x32xbf16>
    %c0_19 = arith.constant 0 : index
    %c0_20 = arith.constant 0 : index
    %79 = vector.load %arg8[%c0_19, %c0_20] : memref<32x32xbf16, #tpu.memory_space<vmem>>, vector<32x32xbf16>
    %cst_21 = arith.constant dense<0.000000e+00> : vector<8x32xf32>
    %80 = tpu.matmul %78, %79, %cst_21 {dimension_numbers = #tpu.dot_dimension_numbers<[1], [0], [0], [1], [0, 0, 1, 1], [], []>} : vector<8x32xbf16>, vector<32x32xbf16>, vector<8x32xf32> -> vector<8x32xf32>
    %c0_22 = arith.constant 0 : index
    %c0_23 = arith.constant 0 : index
    %81 = vector.load %arg9[%c0_22, %c0_23] : memref<1x32xf32, #tpu.memory_space<vmem>>, vector<1x32xf32>
    %82 = vector.broadcast %81 : vector<1x32xf32> to vector<8x32xf32>
    %83 = arith.addf %80, %82 : vector<8x32xf32>
    %84 = arith.addf %1, %83 : vector<8x32xf32>
    %cst_24 = arith.constant dense<0.000000e+00> : vector<8xf32>
    %85 = vector.multi_reduction <add>, %84, %cst_24 [1] : vector<8x32xf32> to vector<8xf32>
    %86 = vector.shape_cast %85 : vector<8xf32> to vector<8x1xf32>
    %cst_25 = arith.constant 3.200000e+01 : f32
    %87 = vector.broadcast %cst_25 : f32 to vector<8x1xf32>
    %88 = arith.divf %86, %87 : vector<8x1xf32>
    %89 = vector.broadcast %88 : vector<8x1xf32> to vector<8x32xf32>
    %90 = arith.subf %84, %89 : vector<8x32xf32>
    %91 = vector.broadcast %88 : vector<8x1xf32> to vector<8x32xf32>
    %92 = arith.subf %84, %91 : vector<8x32xf32>
    %93 = arith.mulf %90, %92 : vector<8x32xf32>
    %cst_26 = arith.constant dense<0.000000e+00> : vector<8xf32>
    %94 = vector.multi_reduction <add>, %93, %cst_26 [1] : vector<8x32xf32> to vector<8xf32>
    %95 = vector.shape_cast %94 : vector<8xf32> to vector<8x1xf32>
    %cst_27 = arith.constant 3.200000e+01 : f32
    %96 = vector.broadcast %cst_27 : f32 to vector<8x1xf32>
    %97 = arith.divf %95, %96 : vector<8x1xf32>
    %98 = vector.broadcast %88 : vector<8x1xf32> to vector<8x32xf32>
    %99 = arith.subf %84, %98 : vector<8x32xf32>
    %cst_28 = arith.constant 9.99999974E-6 : f32
    %100 = vector.broadcast %cst_28 : f32 to vector<8x1xf32>
    %101 = arith.addf %97, %100 : vector<8x1xf32>
    %102 = math.rsqrt %101 : vector<8x1xf32>
    %103 = vector.broadcast %102 : vector<8x1xf32> to vector<8x32xf32>
    %104 = arith.mulf %99, %103 : vector<8x32xf32>
    %c0_29 = arith.constant 0 : index
    %c0_30 = arith.constant 0 : index
    %105 = vector.load %arg10[%c0_29, %c0_30] : memref<1x32xf32, #tpu.memory_space<vmem>>, vector<1x32xf32>
    %106 = vector.broadcast %105 : vector<1x32xf32> to vector<8x32xf32>
    %107 = arith.mulf %104, %106 : vector<8x32xf32>
    %c0_31 = arith.constant 0 : index
    %c0_32 = arith.constant 0 : index
    %108 = vector.load %arg11[%c0_31, %c0_32] : memref<1x32xf32, #tpu.memory_space<vmem>>, vector<1x32xf32>
    %109 = vector.broadcast %108 : vector<1x32xf32> to vector<8x32xf32>
    %110 = arith.addf %107, %109 : vector<8x32xf32>
    %c0_33 = arith.constant 0 : index
    %c0_34 = arith.constant 0 : index
    %c0_35 = arith.constant 0 : index
    %111 = vector.load %arg12[%c0_33, %c0_34, %c0_35] : memref<1x8x32xf32, #tpu.memory_space<vmem>>, vector<1x8x32xf32>
    %112 = vector.shape_cast %111 : vector<1x8x32xf32> to vector<8x32xf32>
    %113 = vector.shape_cast %110 : vector<8x32xf32> to vector<1x8x32xf32>
    tpu.vector_store %arg12[%c0_33, %c0_34, %c0_35], %113 {strides = array<i32>} : memref<1x8x32xf32, #tpu.memory_space<vmem>>, vector<1x8x32xf32>,
    return
  }
  func.func @transform_0(%arg0: i32, %arg1: i32) -> (i32, i32, i32) {
    %c0_i32 = arith.constant 0 : i32
    %c0_i32_0 = arith.constant 0 : i32
    return %arg0, %arg1, %c0_i32 : i32, i32, i32
  }
  func.func @transform_1(%arg0: i32, %arg1: i32) -> (i32, i32, i32) {
    %c0_i32 = arith.constant 0 : i32
    %c0_i32_0 = arith.constant 0 : i32
    %c0_i32_1 = arith.constant 0 : i32
    return %arg0, %c0_i32, %c0_i32_0 : i32, i32, i32
  }
  func.func @transform_2(%arg0: i32, %arg1: i32) -> (i32, i32) {
    %c0_i32 = arith.constant 0 : i32
    %c0_i32_0 = arith.constant 0 : i32
    %c0_i32_1 = arith.constant 0 : i32
    return %c0_i32, %c0_i32_0 : i32, i32
  }
  func.func @transform_3(%arg0: i32, %arg1: i32) -> (i32, i32) {
    %c0_i32 = arith.constant 0 : i32
    %c0_i32_0 = arith.constant 0 : i32
    %c0_i32_1 = arith.constant 0 : i32
    return %c0_i32, %c0_i32_0 : i32, i32
  }
  func.func @transform_4(%arg0: i32, %arg1: i32) -> (i32, i32) {
    %c0_i32 = arith.constant 0 : i32
    %c0_i32_0 = arith.constant 0 : i32
    %c0_i32_1 = arith.constant 0 : i32
    return %c0_i32, %c0_i32_0 : i32, i32
  }
  func.func @transform_5(%arg0: i32, %arg1: i32) -> (i32, i32) {
    %c0_i32 = arith.constant 0 : i32
    %c0_i32_0 = arith.constant 0 : i32
    %c0_i32_1 = arith.constant 0 : i32
    return %c0_i32, %c0_i32_0 : i32, i32
  }
  func.func @transform_6(%arg0: i32, %arg1: i32) -> (i32, i32) {
    %c0_i32 = arith.constant 0 : i32
    %c0_i32_0 = arith.constant 0 : i32
    %c0_i32_1 = arith.constant 0 : i32
    return %c0_i32, %c0_i32_0 : i32, i32
  }
  func.func @transform_7(%arg0: i32, %arg1: i32) -> (i32, i32) {
    %c0_i32 = arith.constant 0 : i32
    %c0_i32_0 = arith.constant 0 : i32
    %c0_i32_1 = arith.constant 0 : i32
    return %c0_i32, %c0_i32_0 : i32, i32
  }
  func.func @transform_8(%arg0: i32, %arg1: i32) -> (i32, i32) {
    %c0_i32 = arith.constant 0 : i32
    %c0_i32_0 = arith.constant 0 : i32
    %c0_i32_1 = arith.constant 0 : i32
    return %c0_i32, %c0_i32_0 : i32, i32
  }
  func.func @transform_9(%arg0: i32, %arg1: i32) -> (i32, i32) {
    %c0_i32 = arith.constant 0 : i32
    %c0_i32_0 = arith.constant 0 : i32
    %c0_i32_1 = arith.constant 0 : i32
    return %c0_i32, %c0_i32_0 : i32, i32
  }
  func.func @transform_10(%arg0: i32, %arg1: i32) -> (i32, i32, i32) {
    %c0_i32 = arith.constant 0 : i32
    %c0_i32_0 = arith.constant 0 : i32
    return %arg0, %arg1, %c0_i32 : i32, i32, i32
  }
}

</mosaic_0001>

<bundles_post_ra>
// kernel: decoder_forward.8
= control target key start
LH: loop header
LB: loop body
LE: loop exit
PB: predicated region body
PF: predicated region fallthrough
CT: control target
= control target key end

     0   :  { %12 = vsyncpa [#allocation3], 0  ;;  %s755_s0 = inlined_call_operand.hbm [shape: f32[16,32], index: 0, kind: input, shape index: {}]   ;;  %s756_s1 = inlined_call_operand.hbm [shape: bf16[32,64], index: 1, kind: input, shape index: {}]   ;;  %s757_s2 = inlined_call_operand.hbm [shape: f32[1,64], index: 2, kind: input, shape index: {}]   ;;  %s758_s3 = inlined_call_operand.hbm [shape: bf16[64,32], index: 3, kind: input, shape index: {}]   ;;  %s759_s4 = inlined_call_operand.hbm [shape: f32[1,32], index: 4, kind: input, shape index: {}]   ;;  %s760_s5 = inlined_call_operand.hbm [shape: f32[1,32], index: 5, kind: input, shape index: {}]   ;;  %s761_s6 = inlined_call_operand.hbm [shape: f32[1,32], index: 6, kind: input, shape index: {}]   ;;  %s762_s7 = inlined_call_operand.hbm [shape: f32[16,32], index: 7, kind: output, shape index: {}]  }
   0x1   :  { %13 = vsyncpa [#allocation6], 0 }
   0x2   :  { %14 = vsyncpa [#allocation9], 0 }
   0x3   :  { %15 = vsyncpa [#allocation12], 0 }
   0x4   :  { %16 = vsyncpa [#allocation4], 0  ;;  %s592_s24 = smov [#allocation5]   ;;  %s406_s28 = scalar_lea.hbm %s756_s1, 256 }
   0x5   :  { %s34_s25 = sshll.u32 %s592_s24, 4  ;;  %p407_p0 = scmp.ne.s32.totalorder %s756_s1, %s406_s28  ;;  %s35_s25 = int_to_ptr.vmem [resolvable:$true] %s34_s25 }
   0x6   :  { %p410_p1 = scmp.lt.u32.totalorder %s406_s28, %s756_s1 }
   0x8   :  { %p412_p2 = pnand %p410_p1, %p407_p0 }
   0xa   :  { %415 = shalt.err (!%p412_p2)
}
   0xb   :  { %s416_s10 = scalar_lea.vmem %s35_s25, 256  ;;  %p421_p4 = scmp.lt.s32.totalorder %s35_s25, %s35_s25 }
   0xc   :  { %p417_p3 = scmp.ne.s32.totalorder %s35_s25, %s416_s10  ;;  %p422_p5 = scmp.lt.s32.totalorder %s416_s10, %s416_s10 }
   0xe   :  { %p423_p6 = por %p422_p5, %p421_p4 }
  0x10   :  { %p424_p7 = pnand %p423_p6, %p417_p3 }
  0x12   :  { %427 = shalt.err (!%p424_p7)
}
  0x13   :  { %s593_s11 = smov 64   ;;  %s594_s12 = smov 4  }
  0x14   :  { %40 = dma.hbm_to_vmem [thread:$0]  %s756_s1, 256, %s35_s25, [#allocation6], %s593_s11, %s593_s11, %s594_s12  }
  0x15   :  { %s595_s15 = smov [#allocation8]   ;;  %s596_s17 = smov [#allocation11]  }
  0x16   :  { %s56_s16 = sshll.u32 %s595_s15, 4  ;;  %s79_s18 = sshll.u32 %s596_s17, 4  ;;  %s57_s16 = int_to_ptr.vmem [resolvable:$true] %s56_s16  ;;  %s80_s18 = int_to_ptr.vmem [resolvable:$true] %s79_s18 }
  0x17   :  { %s428_s21 = scalar_lea.hbm %s758_s3, 512 }
  0x18   :  { %p429_p8 = scmp.ne.s32.totalorder %s758_s3, %s428_s21  ;;  %p432_p9 = scmp.lt.u32.totalorder %s428_s21, %s758_s3 }
  0x1a   :  { %p434_p10 = pnand %p432_p9, %p429_p8 }
  0x1c   :  { %437 = shalt.err (!%p434_p10)
}
  0x1d   :  { %s438_s1 = scalar_lea.vmem %s57_s16, 512  ;;  %p443_p12 = scmp.lt.s32.totalorder %s57_s16, %s57_s16 }
  0x1e   :  { %p439_p11 = scmp.ne.s32.totalorder %s57_s16, %s438_s1  ;;  %p444_p13 = scmp.lt.s32.totalorder %s438_s1, %s438_s1 }
  0x20   :  { %p445_p0 = por %p444_p13, %p443_p12 }
  0x22   :  { %p446_p1 = pnand %p445_p0, %p439_p11 }
  0x24   :  { %449 = shalt.err (!%p446_p1)
}
  0x25   :  { %62 = dma.hbm_to_vmem [thread:$0]  %s758_s3, 512, %s57_s16, [#allocation9], %s593_s11, %s593_s11, %s594_s12  }
  0x26   :  { %s450_s30 = scalar_lea.hbm %s760_s5, 16 }
  0x27   :  { %p451_p2 = scmp.ne.s32.totalorder %s760_s5, %s450_s30  ;;  %p454_p3 = scmp.lt.u32.totalorder %s450_s30, %s760_s5 }
  0x29   :  { %p456_p4 = pnand %p454_p3, %p451_p2 }
  0x2b   :  { %459 = shalt.err (!%p456_p4)
}
  0x2c   :  { %s460_s14 = scalar_lea.vmem %s80_s18, 16  ;;  %s464_s15 = scalar_lea.vmem %s80_s18, 32 }
  0x2d   :  { %p461_p5 = scmp.ne.s32.totalorder %s80_s18, %s460_s14  ;;  %p465_p6 = scmp.lt.s32.totalorder %s80_s18, %s80_s18 }
  0x2e   :  { %p466_p7 = scmp.lt.s32.totalorder %s464_s15, %s460_s14 }
  0x30   :  { %p467_p8 = por %p466_p7, %p465_p6 }
  0x32   :  { %p468_p9 = pnand %p467_p8, %p461_p5 }
  0x34   :  { %471 = shalt.err (!%p468_p9)
}
  0x35   :  { %82 = dma.hbm_to_vmem [thread:$0]  %s760_s5, 16, %s80_s18, [#allocation12]  }
  0x36   :  { %s597_s12 = smov [#allocation2]   ;;  %s472_s20 = scalar_lea.hbm %s755_s0, 256 }
  0x37   :  { %s22_s16 = sshll.u32 %s597_s12, 4  ;;  %p473_p10 = scmp.ne.s32.totalorder %s755_s0, %s472_s20  ;;  %s23_s16 = int_to_ptr.vmem [resolvable:$true] %s22_s16 }
  0x38   :  { %p476_p11 = scmp.lt.u32.totalorder %s472_s20, %s755_s0 }
  0x3a   :  { %p478_p12 = pnand %p476_p11, %p473_p10 }
  0x3c   :  { %481 = shalt.err (!%p478_p12)
}
  0x3d   :  { %s482_s26 = scalar_lea.vmem %s23_s16, 256  ;;  %p487_p0 = scmp.lt.s32.totalorder %s23_s16, %s23_s16 }
  0x3e   :  { %p483_p13 = scmp.ne.s32.totalorder %s23_s16, %s482_s26  ;;  %p488_p1 = scmp.lt.s32.totalorder %s482_s26, %s482_s26 }
  0x40   :  { %p489_p2 = por %p488_p1, %p487_p0 }
  0x42   :  { %p490_p3 = pnand %p489_p2, %p483_p13 }
  0x44   :  { %493 = shalt.err (!%p490_p3)
}
  0x45   :  { %s598_s5 = smov 128   ;;  %s599_s18 = smov 8  }
  0x46   :  { %28 = dma.hbm_to_vmem [thread:$0]  %s755_s0, 256, %s23_s16, [#allocation3], %s598_s5, %s598_s5, %s599_s18  }
  0x47   :  { %s600_s27 = smov [#allocation7]   ;;  %s601_s29 = smov [#allocation10]  }
  0x48   :  { %s47_s28 = sshll.u32 %s600_s27, 4  ;;  %s69_s30 = sshll.u32 %s601_s29, 4  ;;  %s48_s28 = int_to_ptr.vmem [resolvable:$true] %s47_s28  ;;  %s70_s30 = int_to_ptr.vmem [resolvable:$true] %s69_s30 }
  0x49   :  { %s494_s10 = scalar_lea.hbm %s757_s2, 16 }
  0x4a   :  { %p495_p4 = scmp.ne.s32.totalorder %s757_s2, %s494_s10  ;;  %p498_p5 = scmp.lt.u32.totalorder %s494_s10, %s757_s2 }
  0x4c   :  { %p500_p6 = pnand %p498_p5, %p495_p4 }
  0x4e   :  { %503 = shalt.err (!%p500_p6)
}
  0x4f   :  { %s504_s0 = scalar_lea.vmem %s48_s28, 16  ;;  %s508_s11 = scalar_lea.vmem %s48_s28, 32 }
  0x50   :  { %p505_p7 = scmp.ne.s32.totalorder %s48_s28, %s504_s0  ;;  %p509_p8 = scmp.lt.s32.totalorder %s48_s28, %s48_s28 }
  0x51   :  { %p510_p9 = scmp.lt.s32.totalorder %s508_s11, %s504_s0 }
  0x53   :  { %p511_p10 = por %p510_p9, %p509_p8 }
  0x55   :  { %p512_p11 = pnand %p511_p10, %p505_p7 }
  0x57   :  { %515 = shalt.err (!%p512_p11)
}
  0x58   :  { %50 = dma.hbm_to_vmem [thread:$0]  %s757_s2, 16, %s48_s28, [#allocation6]  }
  0x59   :  { %s516_s20 = scalar_lea.hbm %s759_s4, 16 }
  0x5a   :  { %p517_p12 = scmp.ne.s32.totalorder %s759_s4, %s516_s20  ;;  %p520_p13 = scmp.lt.u32.totalorder %s516_s20, %s759_s4 }
  0x5c   :  { %p522_p0 = pnand %p520_p13, %p517_p12 }
  0x5e   :  { %525 = shalt.err (!%p522_p0)
}
  0x5f   :  { %s526_s26 = scalar_lea.vmem %s70_s30, 16  ;;  %s530_s1 = scalar_lea.vmem %s70_s30, 32 }
  0x60   :  { %p527_p1 = scmp.ne.s32.totalorder %s70_s30, %s526_s26  ;;  %p531_p2 = scmp.lt.s32.totalorder %s70_s30, %s70_s30 }
  0x61   :  { %p532_p3 = scmp.lt.s32.totalorder %s530_s1, %s526_s26 }
  0x63   :  { %p533_p4 = por %p532_p3, %p531_p2 }
  0x65   :  { %p534_p5 = pnand %p533_p4, %p527_p1 }
  0x67   :  { %537 = shalt.err (!%p534_p5)
}
  0x68   :  { %72 = dma.hbm_to_vmem [thread:$0]  %s759_s4, 16, %s70_s30, [#allocation9]  }
  0x69   :  { %s602_s27 = smov [#allocation13]   ;;  %s538_s9 = scalar_lea.hbm %s761_s6, 16 }
  0x6a   :  { %s89_s28 = sshll.u32 %s602_s27, 4  ;;  %p539_p6 = scmp.ne.s32.totalorder %s761_s6, %s538_s9  ;;  %s90_s28 = int_to_ptr.vmem [resolvable:$true] %s89_s28 }
  0x6b   :  { %p542_p7 = scmp.lt.u32.totalorder %s538_s9, %s761_s6 }
  0x6d   :  { %p544_p8 = pnand %p542_p7, %p539_p6 }
  0x6f   :  { %547 = shalt.err (!%p544_p8)
}
  0x70   :  { %s548_s3 = scalar_lea.vmem %s90_s28, 16  ;;  %s552_s4 = scalar_lea.vmem %s90_s28, 32 }
  0x71   :  { %p549_p9 = scmp.ne.s32.totalorder %s90_s28, %s548_s3  ;;  %p553_p10 = scmp.lt.s32.totalorder %s90_s28, %s90_s28 }
  0x72   :  { %p554_p11 = scmp.lt.s32.totalorder %s552_s4, %s548_s3 }
  0x74   :  { %p555_p12 = por %p554_p11, %p553_p10 }
  0x76   :  { %p556_p13 = pnand %p555_p12, %p549_p9 }
  0x78   :  { %559 = shalt.err (!%p556_p13)
}
  0x79   :  { %92 = dma.hbm_to_vmem [thread:$0]  %s761_s6, 16, %s90_s28, [#allocation12]  }
  0x7a   :  { %582 = dma.done.wait [#allocation3], 256  }
  0x7b   :  { %583 = vsyncadd [#allocation3], 4294967040 }
  0x7c   :  { %584 = dma.done.wait [#allocation6], 272  }
  0x7d   :  { %585 = vsyncadd [#allocation6], 4294967024 }
  0x7e   :  { %586 = dma.done.wait [#allocation9], 528  }
  0x7f   :  { %587 = vsyncadd [#allocation9], 4294966768 }
  0x80   :  { %588 = dma.done.wait [#allocation12], 32  }
  0x81   :  { %589 = vsyncadd [#allocation12], 4294967264  ;;  %v603_v0 = vmov 0.0   ;;  %vm604_vm0 = vmmov 0   ;;  %v396_v1 = vld [vmem:[#allocation5] sm:$0xff]   ;;  %v397_v2 = vld [vmem:[#allocation5 + $0x8] sm:$0xff]  }
  0x82   :  { %362 = vmatprep.subr.bf16.mxu0 %v603_v0  ;;  %366 = vmatprep.mubr.msk.bf16.mxu0 %vm604_vm0, %v603_v0  ;;  %v115_v3 = vld [vmem:[#allocation2] sm:$0xff]  ;;  %v116_v4 = vld [vmem:[#allocation2 + $0x8] sm:$0xff]  ;;  %vm141_vm1 = vcmask 261120   ;;  %v400_v8 = vld [vmem:[#allocation8 + $0x10] sm:$0xff]   ;;  %vm228_vm2 = vcmask 523264   ;;  %s605_s6 = smov [#allocation14]  }
  0x83   :  { %370 = vmatprep.subr.bf16.mxu1 %v603_v0  ;;  %378 = vmatprep.mubr.msk.bf16.mxu1 %vm604_vm0, %v603_v0  ;;  %v398_v5 = vld [vmem:[#allocation8] sm:$0xff]   ;;  %v399_v6 = vld [vmem:[#allocation8 + $0x8] sm:$0xff]   ;;  %v117_v7 = vpack.c.bf16 %v116_v4, %v115_v3  ;;  %v401_v9 = vld [vmem:[#allocation8 + $0x18] sm:$0xff]   ;;  %s327_s11 = sshll.u32 %s605_s6, 4  ;;  %s328_s11 = int_to_ptr.vmem [resolvable:$true] %s327_s11 }
  0x84   :  { %363 = vmatpush3.bf16.msra.mxu0 %v396_v1  ;;  %371 = vmatpush3.bf16.msra.mxu1 %v398_v5  ;;  %v342_v10 = vld [vmem:[#allocation7] ss:$0 sm:$0xff]  ;;  %v346_v20 = vld [vmem:[#allocation10] ss:$0 sm:$0xff]  ;;  %v352_v48 = vld [vmem:[#allocation11] ss:$0 sm:$0xff]  ;;  %p565_p1 = scmp.lt.s32.totalorder %s328_s11, %s328_s11 }
  0x85   :  { %364 = vmatprep.subr.bf16.mxu0 %v603_v0  ;;  %372 = vmatprep.subr.bf16.mxu1 %v603_v0  ;;  %v353_v50 = vld [vmem:[#allocation13] ss:$0 sm:$0xff]  ;;  %s560_s12 = scalar_lea.vmem %s328_s11, 256 }
  0x86   :  { %p561_p0 = scmp.ne.s32.totalorder %s328_s11, %s560_s12  ;;  %p566_p2 = scmp.lt.s32.totalorder %s560_s12, %s560_s12 }
  0x88   :  { %365 = vmatpush3.bf16.msra.mxu0 %v397_v2  ;;  %373 = vmatpush3.bf16.msra.mxu1 %v399_v6  ;;  %p567_p3 = por %p566_p2, %p565_p1 }
  0x89   :  { %374 = vmatprep.subr.bf16.mxu1 %v603_v0 }
  0x8a   :  { %p568_p4 = pnand %p567_p3, %p561_p0 }
  0x8b   :  { %367 = vmatmul.mubr.msk.bf16.vlgmr.msra.gmra.mrb[0].mxu0 %vm141_vm1, %v117_v7 }
  0x8c   :  { %375 = vmatpush3.bf16.msra.mxu1 %v400_v8 }
  0x8d   :  { %376 = vmatprep.subr.bf16.mxu1 %v603_v0 }
  0x90   :  { %377 = vmatpush3.bf16.msra.mxu1 %v401_v9 }
 0x15e   :  { %v179_v11 = vpop.f32.mrb[0].mxu0 }
 0x15f   :  { %v180_v12 = vadd.f32 %v342_v10, %v179_v11  ;;  %v368_v13 = vpop.f32.mrb[1].mxu0 }
 0x160   :  { %v182_v14 = vpop.f32.mrb[2].mxu0 }
 0x161   :  { %v183_v15 = vadd.f32 %v342_v10, %v182_v14  ;;  %v369_v16 = vpop.f32.mrb[3].mxu0  ;;  %v186_v17 = vmax.f32 %v180_v12, 0.0 }
 0x163   :  { %v187_v18 = vmax.f32 %v183_v15, 0.0 }
 0x165   :  { %v188_v19 = vpack.c.bf16 %v187_v18, %v186_v17 }
 0x167   :  { %379 = vmatmul.mubr.msk.bf16.vlgmr.msra.gmra.mrb[0].mxu1 %vm228_vm2, %v188_v19 }
 0x23a   :  { %v266_v21 = vpop.f32.mrb[0].mxu1 }
 0x23b   :  { %v267_v22 = vadd.f32 %v346_v20, %v266_v21  ;;  %v380_v23 = vpop.f32.mrb[1].mxu1 }
 0x23c   :  { %v269_v24 = vpop.f32.mrb[2].mxu1 }
 0x23d   :  { %v270_v25 = vadd.f32 %v346_v20, %v269_v24  ;;  %v381_v26 = vpop.f32.mrb[3].mxu1  ;;  %v273_v27 = vadd.f32 %v267_v22, %v115_v3 }
 0x23f   :  { %v275_v28 = vsel %vm141_vm1, %v273_v27, 0.0  ;;  %v274_v29 = vadd.f32 %v270_v25, %v116_v4 }
 0x240   :  { %276 = vadd.xlane.f32.xlu0 %v275_v28 }
 0x241   :  { %v278_v30 = vsel %vm141_vm1, %v274_v29, 0.0 }
 0x244   :  { %279 = vadd.xlane.f32.xlu0 %v278_v30 }
 0x2cd   :  { %v277_v31 = vpop.xlane.xlu0 %276 }
 0x2ce   :  { %v282_v32 = vmul.f32 0.03125, %v277_v31 }
 0x2d0   :  { %v284_v33 = vsub.f32 %v273_v27, %v282_v32 }
 0x2d1   :  { %v280_v34 = vpop.xlane.xlu0 %279 }
 0x2d2   :  { %v283_v35 = vmul.f32 0.03125, %v280_v34  ;;  %v286_v36 = vmul.f32 %v284_v33, %v284_v33 }
 0x2d4   :  { %v285_v37 = vsub.f32 %v274_v29, %v283_v35  ;;  %v288_v38 = vsel %vm141_vm1, %v286_v36, 0.0 }
 0x2d5   :  { %289 = vadd.xlane.f32.xlu1 %v288_v38 }
 0x2d6   :  { %v287_v39 = vmul.f32 %v285_v37, %v285_v37 }
 0x2d8   :  { %v291_v40 = vsel %vm141_vm1, %v287_v39, 0.0 }
 0x2d9   :  { %292 = vadd.xlane.f32.xlu1 %v291_v40 }
 0x362   :  { %v290_v41 = vpop.xlane.xlu1 %289 }
 0x363   :  { %v294_v42 = vmul.f32 0.03125, %v290_v41 }
 0x365   :  { %v296_v43 = vadd.f32 1e-05, %v294_v42 }
 0x366   :  { %v293_v44 = vpop.xlane.xlu1 %292 }
 0x367   :  { %402 = vrsqrt.f32 %v296_v43  ;;  %v295_v45 = vmul.f32 0.03125, %v293_v44 }
 0x369   :  { %v297_v46 = vadd.f32 1e-05, %v295_v45 }
 0x36b   :  { %404 = vrsqrt.f32 %v297_v46 }
 0x371   :  { %v403_v47 = vpop.eup %402 }
 0x372   :  { %v300_v49 = vmul.f32 %v403_v47, %v284_v33 }
 0x374   :  { %v309_v51 = vmul.f32 %v352_v48, %v300_v49 }
 0x375   :  { %v405_v52 = vpop.eup %404 }
 0x376   :  { %v301_v53 = vmul.f32 %v405_v52, %v285_v37  ;;  %v318_v54 = vadd.f32 %v353_v50, %v309_v51 }
 0x378   :  { %v310_v55 = vmul.f32 %v352_v48, %v301_v53  ;;  %320 = vst.msk [vmem:[#allocation14] sm:$0xff] %vm141_vm1, %v318_v54 }
 0x37a   :  { %v319_v56 = vadd.f32 %v353_v50, %v310_v55 }
 0x37c   :  { %321 = vst.msk [vmem:[#allocation14 + $0x8] sm:$0xff] %vm141_vm1, %v319_v56 }
 0x37d   :  { %571 = shalt.err (!%p568_p4)
}
 0x37e   :  { %s572_s19 = scalar_lea.hbm %s762_s7, 256 }
 0x37f   :  { %p573_p5 = scmp.ne.s32.totalorder %s762_s7, %s572_s19  ;;  %p576_p6 = scmp.lt.u32.totalorder %s572_s19, %s762_s7 }
 0x381   :  { %p578_p7 = pnand %p576_p6, %p573_p5 }
 0x383   :  { %581 = shalt.err (!%p578_p7)
}
 0x384   :  { %333 = dma.vmem_to_hbm [thread:$0]  %s328_s11, 256, %s762_s7, [#allocation4], %s598_s5, %s598_s5, %s599_s18  }
 0x385   :  { %590 = dma.done.wait [#allocation4], 256  }
 0x386   :  { %591 = vsyncadd [#allocation4], 4294967040 }
 0x387   :  { %337 = vsyncpa [#allocation3], 1 }
 0x388   :  { %338 = vsyncpa [#allocation6], 1 }
 0x389   :  { %339 = vsyncpa [#allocation9], 1 }
 0x38a   :  { %340 = vsyncpa [#allocation12], 1 }
 0x38b   :  { %341 = vsyncpa [#allocation4], 1 }

// kernel: decoder_forward.6
= control target key start
LH: loop header
LB: loop body
LE: loop exit
PB: predicated region body
PF: predicated region fallthrough
CT: control target
= control target key end

     0   :  { %s2780_s0 = inlined_call_operand.hbm [shape: f32[2,8,32], index: 0, kind: input, shape index: {}, may-alias: {0,1}]   ;;  %s2781_s1 = inlined_call_operand.hbm [shape: f32[2,8,32], index: 1, kind: input, shape index: {}, may-alias: {0,1}]   ;;  %s2782_s2 = inlined_call_operand.hbm [shape: bf16[32,32], index: 2, kind: input, shape index: {}]   ;;  %s2783_s3 = inlined_call_operand.hbm [shape: f32[1,32], index: 3, kind: input, shape index: {}]   ;;  %s2784_s4 = inlined_call_operand.hbm [shape: bf16[32,64], index: 4, kind: input, shape index: {}]   ;;  %s2785_s5 = inlined_call_operand.hbm [shape: f32[1,64], index: 5, kind: input, shape index: {}]   ;;  %s2786_s6 = inlined_call_operand.hbm [shape: bf16[32,32], index: 6, kind: input, shape index: {}]   ;;  %s2787_s7 = inlined_call_operand.hbm [shape: f32[1,32], index: 7, kind: input, shape index: {}]   ;;  %s2788_s8 = inlined_call_operand.hbm [shape: f32[1,32], index: 8, kind: input, shape index: {}]   ;;  %s2789_s9 = inlined_call_operand.hbm [shape: f32[1,32], index: 9, kind: input, shape index: {}]   ;;  %s2790_s10 = inlined_call_operand.hbm [shape: f32[2,8,32], index: 10, kind: output, shape index: {}]  }
   0x1   :  { %2800 = sst [smem:[#allocation30_spill]] %s2781_s1 }
   0x2   :  { %2801 = sst [smem:[#allocation31_spill]] %s2782_s2 }
   0x3   :  { %2802 = sst [smem:[#allocation32_spill]] %s2783_s3 }
   0x4   :  { %2803 = sst [smem:[#allocation33_spill]] %s2784_s4 }
   0x5   :  { %2804 = sst [smem:[#allocation34_spill]] %s2785_s5 }
   0x6   :  { %2805 = sst [smem:[#allocation35_spill]] %s2786_s6 }
   0x7   :  { %2806 = sst [smem:[#allocation36_spill]] %s2787_s7 }
   0x8   :  { %2807 = sst [smem:[#allocation37_spill]] %s2790_s10 }
   0x9   :  { %15 = vsyncpa [#allocation3], 0 }
   0xa   :  { %17 = vsyncpa [#allocation3 + $0x1], 0 }
   0xb   :  { %18 = vsyncpa [#allocation6], 0 }
   0xc   :  { %20 = vsyncpa [#allocation6 + $0x1], 0 }
   0xd   :  { %21 = vsyncpa [#allocation9], 0 }
   0xe   :  { %22 = vsyncpa [#allocation12], 0 }
   0xf   :  { %23 = vsyncpa [#allocation15], 0 }
  0x10   :  { %24 = vsyncpa [#allocation18], 0 }
  0x11   :  { %25 = vsyncpa [#allocation4], 0 }
  0x12   :  { %27 = vsyncpa [#allocation4 + $0x1], 0  ;;  %s2258_s13 = smov 0   ;;  %s2260_s14 = smov 0  }
  0x13   :  { %s2262_s15 = smov 0   ;;  %s2264_s16 = smov 0  }
  0x14   :  { %s2266_s17 = smov 0   ;;  %s2268_s18 = smov 0  }
  0x15 LB: > { %2808 = sst [smem:[#allocation28_spill]] %s2171_s16  ;;  %s2289_s19 = sadd.s32 4294967295, %s2179_s18   ;;  %s2179_s18 = sphi %s2268_s18, %s33_s18   ;;  %s2175_s17 = sphi %s2266_s17, %s2849_s17   ;;  %s2171_s16 = sphi %s2264_s16, %s2848_s16   ;;  %s2167_s15 = sphi %s2262_s15, %s2847_s15   ;;  %s2163_s14 = sphi %s2260_s14, %s2846_s14   ;;  %s2159_s13 = sphi %s2258_s13, %s2845_s13  }
  0x16   : > { %p1457_p0 = scmp.ge.s32.totalorder %s2179_s18, 1  ;;  %p2794_p1 = scmp.eq.s32.totalorder %s2289_s19, 0 }
  0x17   : > { %p300_p2 = scmp.lt.s32.totalorder %s2179_s18, 3  ;;  %s2181_s21 = smov [#allocation7]  }
  0x18   : > { %s312_s22 = sshll.u32 %s2181_s21, 4  ;;  %s2182_s24 = smov [#allocation8]   ;;  %s2298_s22 = int_to_ptr.vmem [resolvable:$true] %s312_s22 }
  0x19   : > { %p2294_p3 = pnand %p1457_p0, %p300_p2  ;;  %s326_s25 = sshll.u32 %s2182_s24, 4  ;;  %s2309_s25 = int_to_ptr.vmem [resolvable:$true] %s326_s25 }
  0x1a   : > { %s2183_s26 = smov [#allocation11]   ;;  %s2812_s2 = sld [smem:[#allocation31_spill]] }
  0x1b   : > { %s2809_s20 = scalar_select %p2294_p3, 1, 0 }
  0x1c   : > { %p1644_p4 = pneg %p2294_p3  ;;  %s2311_s27 = sshll.u32 %s2183_s26, 4  ;;  %s351_s27 = int_to_ptr.vmem [resolvable:$true] %s2311_s27 }
  0x1d   : > { %2810 = sst [smem:[#allocation29_spill]] %s2809_s20 }
  0x1e   : > { %p2305_p6 = pnand %p1644_p4, %p2794_p1 }
  0x20   : > { %s1789_s30 = scalar_lea.hbm %s2812_s2, 256  ;;  %p2321_p8 = pneg %p2305_p6 }
  0x21   : > { %p1790_p7 = scmp.ne.s32.totalorder %s2812_s2, %s1789_s30  ;;  %p1796_p11 = scmp.lt.u32.totalorder %s1789_s30, %s2812_s2 }
  0x23   : > { %p1792_p9 = pnand %p2321_p8, %p1790_p7 }
  0x25   : > { %p1793_p10 = pneg %p1792_p9 }
  0x27   : > { %p1798_p12 = pnand %p1796_p11, %p1793_p10 }
  0x29   : > { %1801 = shalt.err (!%p1798_p12)
}
  0x2a   : > { %s1802_s28 = scalar_lea.vmem %s2298_s22, 256  ;;  %p1810_p4 = scmp.lt.s32.totalorder %s2298_s22, %s2298_s22 }
  0x2b   : > { %p1803_p13 = scmp.ne.s32.totalorder %s2298_s22, %s1802_s28  ;;  %p1811_p5 = scmp.lt.s32.totalorder %s1802_s28, %s1802_s28 }
  0x2d   : > { %p1805_p0 = pnand %p1803_p13, %p2321_p8  ;;  %p1812_p7 = por %p1811_p5, %p1810_p4 }
  0x2f   : > { %p1806_p2 = pneg %p1805_p0 }
  0x31   : > { %p1813_p9 = pnand %p1812_p7, %p1806_p2 }
  0x33   : > { %1816 = shalt.err (!%p1813_p9)
}
  0x34   : > { %s2796_s29 = smov 64   ;;  %s2185_s30 = smov 4  }
  0x35   : > { %1647 = dma.hbm_to_vmem [thread:$0]  (!%p2305_p6), %s2812_s2, 256, %s2298_s22, [#allocation6], %s2796_s29, %s2796_s29, %s2185_s30  }
  0x36   : > { %s2814_s3 = sld [smem:[#allocation32_spill]] }
  0x3c   : > { %s1817_s28 = scalar_lea.hbm %s2814_s3, 16 }
  0x3d   : > { %p1818_p5 = scmp.ne.s32.totalorder %s2814_s3, %s1817_s28  ;;  %p1824_p12 = scmp.lt.u32.totalorder %s1817_s28, %s2814_s3 }
  0x3f   : > { %p1820_p10 = pnand %p1818_p5, %p2321_p8 }
  0x41   : > { %p1821_p11 = pneg %p1820_p10 }
  0x43   : > { %p1826_p13 = pnand %p1824_p12, %p1821_p11 }
  0x45   : > { %1829 = shalt.err (!%p1826_p13)
}
  0x46   : > { %s1830_s22 = scalar_lea.vmem %s2309_s25, 16  ;;  %s1837_s10 = scalar_lea.vmem %s2309_s25, 32 }
  0x47   : > { %p1831_p0 = scmp.ne.s32.totalorder %s2309_s25, %s1830_s22  ;;  %p1838_p7 = scmp.lt.s32.totalorder %s2309_s25, %s2309_s25 }
  0x48   : > { %p1839_p9 = scmp.lt.s32.totalorder %s1837_s10, %s1830_s22 }
  0x49   : > { %p1833_p2 = pnand %p1831_p0, %p2321_p8 }
  0x4a   : > { %p1840_p5 = por %p1839_p9, %p1838_p7 }
  0x4b   : > { %p1834_p4 = pneg %p1833_p2 }
  0x4d   : > { %p1841_p10 = pnand %p1840_p5, %p1834_p4 }
  0x4f   : > { %1844 = shalt.err (!%p1841_p10)
}
  0x50   : > { %1650 = dma.hbm_to_vmem [thread:$0]  (!%p2305_p6), %s2814_s3, 16, %s2309_s25, [#allocation9]  }
  0x51   : > { %s2815_s5 = sld [smem:[#allocation34_spill]] }
  0x57   : > { %s1845_s12 = scalar_lea.hbm %s2815_s5, 16 }
  0x58   : > { %p1846_p11 = scmp.ne.s32.totalorder %s2815_s5, %s1845_s12  ;;  %p1852_p0 = scmp.lt.u32.totalorder %s1845_s12, %s2815_s5 }
  0x5a   : > { %p1848_p12 = pnand %p1846_p11, %p2321_p8 }
  0x5c   : > { %p1849_p13 = pneg %p1848_p12 }
  0x5e   : > { %p1854_p2 = pnand %p1852_p0, %p1849_p13 }
  0x60   : > { %1857 = shalt.err (!%p1854_p2)
}
  0x61   : > { %s1858_s10 = scalar_lea.vmem %s351_s27, 16  ;;  %s1865_s25 = scalar_lea.vmem %s351_s27, 32 }
  0x62   : > { %p1859_p4 = scmp.ne.s32.totalorder %s351_s27, %s1858_s10  ;;  %p1866_p5 = scmp.lt.s32.totalorder %s351_s27, %s351_s27 }
  0x63   : > { %p1867_p10 = scmp.lt.s32.totalorder %s1865_s25, %s1858_s10 }
  0x64   : > { %p1861_p7 = pnand %p1859_p4, %p2321_p8 }
  0x65   : > { %p1868_p1 = por %p1867_p10, %p1866_p5 }
  0x66   : > { %p1862_p9 = pneg %p1861_p7 }
  0x68   : > { %p1869_p3 = pnand %p1868_p1, %p1862_p9 }
  0x6a   : > { %1872 = shalt.err (!%p1869_p3)
}
  0x6b   : > { %1656 = dma.hbm_to_vmem [thread:$0]  (!%p2305_p6), %s2815_s5, 16, %s351_s27, [#allocation12]  }
  0x6c   : > { %s2186_s20 = smov [#allocation14]   ;;  %s2187_s12 = smov [#allocation10]  }
  0x6d   : > { %s374_s11 = sshll.u32 %s2186_s20, 4  ;;  %s336_s24 = sshll.u32 %s2187_s12, 4  ;;  %s375_s11 = int_to_ptr.vmem [resolvable:$true] %s374_s11  ;;  %s337_s24 = int_to_ptr.vmem [resolvable:$true] %s336_s24 }
  0x6e   : > { %s2816_s7 = sld [smem:[#allocation36_spill]] }
  0x74   : > { %s1873_s22 = scalar_lea.hbm %s2816_s7, 16 }
  0x75   : > { %p1874_p1 = scmp.ne.s32.totalorder %s2816_s7, %s1873_s22  ;;  %p1880_p12 = scmp.lt.u32.totalorder %s1873_s22, %s2816_s7 }
  0x77   : > { %p1876_p3 = pnand %p1874_p1, %p2321_p8 }
  0x79   : > { %p1877_p11 = pneg %p1876_p3 }
  0x7b   : > { %p1882_p13 = pnand %p1880_p12, %p1877_p11 }
  0x7d   : > { %1885 = shalt.err (!%p1882_p13)
}
  0x7e   : > { %s1886_s27 = scalar_lea.vmem %s375_s11, 16  ;;  %s1893_s16 = scalar_lea.vmem %s375_s11, 32 }
  0x7f   : > { %p1887_p0 = scmp.ne.s32.totalorder %s375_s11, %s1886_s27  ;;  %p1894_p7 = scmp.lt.s32.totalorder %s375_s11, %s375_s11 }
  0x80   : > { %p1895_p9 = scmp.lt.s32.totalorder %s1893_s16, %s1886_s27 }
  0x81   : > { %p1889_p2 = pnand %p1887_p0, %p2321_p8 }
  0x82   : > { %p1896_p5 = por %p1895_p9, %p1894_p7 }
  0x83   : > { %p1890_p4 = pneg %p1889_p2 }
  0x85   : > { %p1897_p10 = pnand %p1896_p5, %p1890_p4 }
  0x87   : > { %1900 = shalt.err (!%p1897_p10)
}
  0x88   : > { %1662 = dma.hbm_to_vmem [thread:$0]  (!%p2305_p6), %s2816_s7, 16, %s375_s11, [#allocation15]  }
  0x89   : > { %s2817_s4 = sld [smem:[#allocation33_spill]] }
  0x8f   : > { %s1901_s28 = scalar_lea.hbm %s2817_s4, 256 }
  0x90   : > { %p1902_p1 = scmp.ne.s32.totalorder %s2817_s4, %s1901_s28  ;;  %p1908_p12 = scmp.lt.u32.totalorder %s1901_s28, %s2817_s4 }
  0x92   : > { %p1904_p3 = pnand %p1902_p1, %p2321_p8 }
  0x94   : > { %p1905_p11 = pneg %p1904_p3 }
  0x96   : > { %p1910_p13 = pnand %p1908_p12, %p1905_p11 }
  0x98   : > { %1913 = shalt.err (!%p1910_p13)
}
  0x99   : > { %s1914_s27 = scalar_lea.vmem %s337_s24, 256  ;;  %p1922_p7 = scmp.lt.s32.totalorder %s337_s24, %s337_s24 }
  0x9a   : > { %p1915_p0 = scmp.ne.s32.totalorder %s337_s24, %s1914_s27  ;;  %p1923_p9 = scmp.lt.s32.totalorder %s1914_s27, %s1914_s27 }
  0x9c   : > { %p1917_p2 = pnand %p1915_p0, %p2321_p8  ;;  %p1924_p5 = por %p1923_p9, %p1922_p7 }
  0x9e   : > { %p1918_p4 = pneg %p1917_p2 }
  0xa0   : > { %p1925_p10 = pnand %p1924_p5, %p1918_p4 }
  0xa2   : > { %1928 = shalt.err (!%p1925_p10)
}
  0xa3   : > { %s2818_s11 = smov 64   ;;  %s2188_s12 = smov [#allocation13]  }
  0xa4   : > { %1653 = dma.hbm_to_vmem [thread:$0]  (!%p2305_p6), %s2817_s4, 256, %s337_s24, [#allocation9], %s2818_s11, %s2818_s11, %s2185_s30  }
  0xa5   : > { %s360_s29 = sshll.u32 %s2188_s12, 4  ;;  %s2189_s26 = smov [#allocation16]   ;;  %s361_s29 = int_to_ptr.vmem [resolvable:$true] %s360_s29 }
  0xa6   : > { %s385_s28 = sshll.u32 %s2189_s26, 4  ;;  %s2819_s6 = sld [smem:[#allocation35_spill]]  ;;  %s386_s28 = int_to_ptr.vmem [resolvable:$true] %s385_s28 }
  0xac   : > { %s1929_s25 = scalar_lea.hbm %s2819_s6, 256 }
  0xad   : > { %p1930_p1 = scmp.ne.s32.totalorder %s2819_s6, %s1929_s25  ;;  %p1936_p12 = scmp.lt.u32.totalorder %s1929_s25, %s2819_s6 }
  0xaf   : > { %p1932_p3 = pnand %p1930_p1, %p2321_p8 }
  0xb1   : > { %p1933_p11 = pneg %p1932_p3 }
  0xb3   : > { %p1938_p13 = pnand %p1936_p12, %p1933_p11 }
  0xb5   : > { %1941 = shalt.err (!%p1938_p13)
}
  0xb6   : > { %s1942_s24 = scalar_lea.vmem %s361_s29, 256  ;;  %p1950_p7 = scmp.lt.s32.totalorder %s361_s29, %s361_s29 }
  0xb7   : > { %p1943_p0 = scmp.ne.s32.totalorder %s361_s29, %s1942_s24  ;;  %p1951_p9 = scmp.lt.s32.totalorder %s1942_s24, %s1942_s24 }
  0xb9   : > { %p1945_p2 = pnand %p1943_p0, %p2321_p8  ;;  %p1952_p5 = por %p1951_p9, %p1950_p7 }
  0xbb   : > { %p1946_p4 = pneg %p1945_p2 }
  0xbd   : > { %p1953_p10 = pnand %p1952_p5, %p1946_p4 }
  0xbf   : > { %1956 = shalt.err (!%p1953_p10)
}
  0xc0   : > { %1659 = dma.hbm_to_vmem [thread:$0]  (!%p2305_p6), %s2819_s6, 256, %s361_s29, [#allocation12], %s2818_s11, %s2818_s11, %s2185_s30  }
  0xc1   : > { %s1957_s22 = scalar_lea.hbm %s2788_s8, 16 }
  0xc2   : > { %p1958_p1 = scmp.ne.s32.totalorder %s2788_s8, %s1957_s22  ;;  %p1964_p12 = scmp.lt.u32.totalorder %s1957_s22, %s2788_s8 }
  0xc4   : > { %p1960_p3 = pnand %p1958_p1, %p2321_p8 }
  0xc6   : > { %p1961_p11 = pneg %p1960_p3 }
  0xc8   : > { %p1966_p13 = pnand %p1964_p12, %p1961_p11 }
  0xca   : > { %1969 = shalt.err (!%p1966_p13)
}
  0xcb   : > { %s1970_s16 = scalar_lea.vmem %s386_s28, 16  ;;  %s1977_s30 = scalar_lea.vmem %s386_s28, 32 }
  0xcc   : > { %p1971_p0 = scmp.ne.s32.totalorder %s386_s28, %s1970_s16  ;;  %p1978_p7 = scmp.lt.s32.totalorder %s386_s28, %s386_s28 }
  0xcd   : > { %p1979_p9 = scmp.lt.s32.totalorder %s1977_s30, %s1970_s16 }
  0xce   : > { %p1973_p2 = pnand %p1971_p0, %p2321_p8 }
  0xcf   : > { %p1980_p5 = por %p1979_p9, %p1978_p7 }
  0xd0   : > { %p1974_p4 = pneg %p1973_p2 }
  0xd2   : > { %p1981_p10 = pnand %p1980_p5, %p1974_p4 }
  0xd4   : > { %1984 = shalt.err (!%p1981_p10)
}
  0xd5   : > { %1665 = dma.hbm_to_vmem [thread:$0]  (!%p2305_p6), %s2788_s8, 16, %s386_s28, [#allocation15]  }
  0xd6   : > { %s2190_s24 = smov [#allocation17]   ;;  %s1985_s26 = scalar_lea.hbm %s2789_s9, 16 }
  0xd7   : > { %s396_s2 = sshll.u32 %s2190_s24, 4  ;;  %p1986_p1 = scmp.ne.s32.totalorder %s2789_s9, %s1985_s26  ;;  %s397_s2 = int_to_ptr.vmem [resolvable:$true] %s396_s2 }
  0xd8   : > { %p1992_p12 = scmp.lt.u32.totalorder %s1985_s26, %s2789_s9 }
  0xd9   : > { %p1988_p3 = pnand %p1986_p1, %p2321_p8 }
  0xdb   : > { %p1989_p11 = pneg %p1988_p3 }
  0xdd   : > { %p1994_p13 = pnand %p1992_p12, %p1989_p11 }
  0xdf   : > { %1997 = shalt.err (!%p1994_p13)
}
  0xe0   : > { %s1998_s28 = scalar_lea.vmem %s397_s2, 16  ;;  %s2005_s27 = scalar_lea.vmem %s397_s2, 32 }
  0xe1   : > { %p1999_p0 = scmp.ne.s32.totalorder %s397_s2, %s1998_s28  ;;  %p2006_p7 = scmp.lt.s32.totalorder %s397_s2, %s397_s2 }
  0xe2   : > { %p2007_p9 = scmp.lt.s32.totalorder %s2005_s27, %s1998_s28 }
  0xe3   : > { %p2001_p2 = pnand %p1999_p0, %p2321_p8 }
  0xe4   : > { %p2008_p5 = por %p2007_p9, %p2006_p7 }
  0xe5   : > { %p2002_p4 = pneg %p2001_p2 }
  0xe7   : > { %p2009_p10 = pnand %p2008_p5, %p2002_p4 }
  0xe9   : > { %2012 = shalt.err (!%p2009_p10)
}
  0xea   : > { %1668 = dma.hbm_to_vmem [thread:$0]  (!%p2305_p6), %s2789_s9, 16, %s397_s2, [#allocation18]  }
  0xeb   : > { %s1456_s21 = sadd.s32 4294967294, %s2179_s18   ;;  %s45_s11 = sadd.s32 1, %s2175_s17 }
  0xec   : > { %p47_p8 = scmp.ge.s32.totalorder %s45_s11, 2  ;;  %s54_s23 = sadd.s32 1, %s2167_s15 }
  0xed   : > { %p61_p1 = scmp.ne.s32.totalorder %s2167_s15, %s2163_s14  ;;  %p62_p3 = scmp.eq.s32.totalorder %s2179_s18, 0 }
  0xee   : > { %s2851_s11 = smov (%p47_p8, %s45_s11), 0  ;;  %p67_p12 = scmp.ne.s32.totalorder %s2163_s14, %s2159_s13 }
  0xef   : > { %p2492_p11 = por %p62_p3, %p61_p1  ;;  %s49_s24 = ssub.s32 %s2175_s17, %s2851_s11 }
  0xf0   : > { %p287_p6 = scmp.eq.s32.totalorder %s2289_s19, 1  ;;  %p52_p13 = scmp.eq.s32.totalorder %s49_s24, 0 }
  0xf1   : > { %p2821_p0 = scmp.eq.s32.totalorder %s2289_s19, 0  ;;  %p293_p7 = scmp.eq.s32.totalorder %s1456_s21, 1 }
  0xf2   : > { %p2507_p4 = por %p287_p6, %p61_p1  ;;  %p1688_p5 = scmp.lt.s32.totalorder %s2179_s18, 2 }
  0xf3   : > { %p2503_p2 = por %p2821_p0, %p67_p12  ;;  %p2514_p9 = por %p293_p7, %p67_p12 }
  0xf4   : > { %s2823_s20 = scalar_select %p2507_p4, 1, 0 }
  0xf5   : > { %s2822_s2 = scalar_select %p2503_p2, 1, 0 }
  0xf6   : > { %s2512_s12 = scalar_select %p52_p13, %s2167_s15, %s54_s23  }
  0xf7   : > { %s2824_s26 = scalar_select %p2514_p9, 1, 0 }
  0xf8   : > { %s407_s22 = sand.u32 1, %s2167_s15   ;;  %s1468_s10 = sshll.u32 %s2175_s17, 7 }
  0xf9   : > { %s2521_s25 = sshll.u32 %s407_s22, 3  ;;  %s2526_s27 = scalar_lea.hbm %s2780_s0, %s1468_s10 }
  0xfa   : > { %s411_s16 = scalar_lea.vmem [#allocation2], %s2521_s25  ;;  %p2531_p10 = pnand %p1688_p5, %p2492_p11 }
  0xfb   : > { %s419_s30 = sshll.u32 %s411_s16, 4  ;;  %s2826_s1 = sld [smem:[#allocation30_spill]]  ;;  %s2535_s30 = int_to_ptr.vmem [resolvable:$true] %s419_s30 }
  0xfc   : > { %s408_s3 = scalar_lea.sflag [#allocation3], %s407_s22  ;;  %s2013_s4 = scalar_lea.hbm %s2526_s27, 128 }
  0xfd   : > { %p2014_p8 = scmp.ne.s32.totalorder %s2526_s27, %s2013_s4  ;;  %p2015_p1 = pneg %p2531_p10 }
  0xfe   : > { %s2018_s5 = scalar_lea.hbm %s2780_s0, 256  ;;  %p2019_p12 = scmp.lt.u32.totalorder %s2526_s27, %s2780_s0 }
  0xff   : > { %p2016_p3 = pnand %p2015_p1, %p2014_p8  ;;  %p2020_p6 = scmp.lt.u32.totalorder %s2018_s5, %s2013_s4 }
 0x100   : > { %p2022_p0 = scmp.lt.u32.totalorder %s2013_s4, %s2526_s27 }
 0x101   : > { %s2540_s28 = scalar_lea.hbm %s2826_s1, %s1468_s10  ;;  %p2017_p11 = pneg %p2016_p3 }
 0x102   : > { %p2021_p13 = por %p2020_p6, %p2019_p12 }
 0x104   : > { %p2023_p7 = por %p2022_p0, %p2021_p13 }
 0x106   : > { %p2024_p5 = pnand %p2023_p7, %p2017_p11 }
 0x108   : > { %2027 = shalt.err (!%p2024_p5)
}
 0x109   : > { %s2028_s22 = scalar_lea.vmem %s2535_s30, 128  ;;  %s2191_s10 = smov [#allocation2]  }
 0x10a   : > { %p2029_p8 = scmp.ne.s32.totalorder %s2535_s30, %s2028_s22  ;;  %s2033_s23 = sshll.u32 %s2191_s10, 4  ;;  %s2034_s23 = int_to_ptr.vmem [resolvable:$false] %s2033_s23 }
 0x10b   : > { %s2035_s6 = scalar_lea.vmem %s2034_s23, 256  ;;  %p2036_p4 = scmp.lt.s32.totalorder %s2535_s30, %s2034_s23 }
 0x10c   : > { %p2031_p3 = pnand %p2029_p8, %p2015_p1  ;;  %p2037_p12 = scmp.lt.s32.totalorder %s2035_s6, %s2028_s22 }
 0x10e   : > { %p2032_p9 = pneg %p2031_p3  ;;  %p2038_p6 = por %p2037_p12, %p2036_p4 }
 0x110   : > { %p2039_p13 = pnand %p2038_p6, %p2032_p9 }
 0x112   : > { %2042 = shalt.err (!%p2039_p13)
}
 0x113   : > { %1672 = dma.hbm_to_vmem [thread:$0]  (!%p2531_p10), %s2526_s27, 128, %s2535_s30, %s408_s3  }
 0x114   : > { %s426_s4 = sand.u32 1, %s2179_s18   ;;  %s430_s5 = scalar_lea.vmem [#allocation5], %s2521_s25 }
 0x115   : > { %s437_s7 = sshll.u32 %s430_s5, 4  ;;  %s427_s24 = scalar_lea.sflag [#allocation6], %s426_s4  ;;  %s438_s7 = int_to_ptr.vmem [resolvable:$true] %s437_s7 }
 0x116   : > { %s2043_s29 = scalar_lea.hbm %s2540_s28, 128  ;;  %s2048_s10 = scalar_lea.hbm %s2826_s1, 256 }
 0x117   : > { %p2044_p4 = scmp.ne.s32.totalorder %s2540_s28, %s2043_s29  ;;  %p2049_p0 = scmp.lt.u32.totalorder %s2540_s28, %s2826_s1 }
 0x118   : > { %p2050_p7 = scmp.lt.u32.totalorder %s2048_s10, %s2043_s29  ;;  %p2052_p8 = scmp.lt.u32.totalorder %s2043_s29, %s2540_s28 }
 0x119   : > { %p2046_p9 = pnand %p2044_p4, %p2015_p1 }
 0x11a   : > { %p2051_p5 = por %p2050_p7, %p2049_p0 }
 0x11b   : > { %p2047_p11 = pneg %p2046_p9 }
 0x11c   : > { %p2053_p3 = por %p2052_p8, %p2051_p5 }
 0x11e   : > { %p2054_p12 = pnand %p2053_p3, %p2047_p11 }
 0x120   : > { %2057 = shalt.err (!%p2054_p12)
}
 0x121   : > { %s2058_s3 = scalar_lea.vmem %s438_s7, 128  ;;  %s2192_s25 = smov [#allocation5]  }
 0x122   : > { %p2059_p6 = scmp.ne.s32.totalorder %s438_s7, %s2058_s3  ;;  %s2063_s27 = sshll.u32 %s2192_s25, 4  ;;  %s2064_s27 = int_to_ptr.vmem [resolvable:$false] %s2063_s27 }
 0x123   : > { %s2065_s30 = scalar_lea.vmem %s2064_s27, 256  ;;  %p2066_p9 = scmp.lt.s32.totalorder %s438_s7, %s2064_s27 }
 0x124   : > { %p2061_p13 = pnand %p2059_p6, %p2015_p1  ;;  %p2067_p2 = scmp.lt.s32.totalorder %s2065_s30, %s2058_s3 }
 0x126   : > { %p2062_p4 = pneg %p2061_p13  ;;  %p2068_p0 = por %p2067_p2, %p2066_p9 }
 0x128   : > { %p2069_p7 = pnand %p2068_p0, %p2062_p4 }
 0x12a   : > { %2072 = shalt.err (!%p2069_p7)
}
 0x12b   : > { %1675 = dma.hbm_to_vmem [thread:$0]  (!%p2531_p10), %s2540_s28, 128, %s438_s7, %s427_s24  }
 0x12c   : > { %s2827_s4 = sld [smem:[#allocation29_spill]] }
 0x132   : > { %p2828_p11 = scmp.ne.s32.totalorder %s2827_s4, 0 }
 0x133   : > { %s2591_s5 = sand.u32 (!%p2828_p11), 1, %s2163_s14   ;;  %p2829_p2 = scmp.ne.s32.totalorder (!%p2828_p11), %s2822_s2, 0 }
 0x134   : > { %446 = sbr.rel (%p2828_p11) target bundleno = 2095 (0x82f), region = 60  ;;  %s2594_s29 = sshll.u32 (!%p2828_p11), %s2591_s5, 3 }
 0x135   : > { %s449_s16 = scalar_lea.sflag (!%p2828_p11), [#allocation3], %s2591_s5  ;;  %s452_s22 = scalar_lea.vmem (!%p2828_p11), [#allocation2], %s2594_s29 }
 0x13b   : > { %2126 = dma.done.wait (%p2829_p2), %s449_s16, 128  }
 0x13c   : > { %2128 = vsyncadd (%p2829_p2), %s449_s16, 4294967168  ;;  %s457_s21 = sand.u32 1, %s2289_s19   ;;  %s461_s7 = scalar_lea.vmem [#allocation5], %s2594_s29 }
 0x13d   : > { %s458_s28 = scalar_lea.sflag [#allocation6], %s457_s21 }
 0x13e   : > { %2130 = dma.done.wait (%p2829_p2), %s458_s28, 128  }
 0x13f   : > { %2132 = vsyncadd (%p2829_p2), %s458_s28, 4294967168  ;;  %p2830_p10 = scmp.eq.s32.totalorder %s2289_s19, 0 }
 0x141   : > { %2134 = dma.done.wait (%p2830_p10), [#allocation6], 256   ;;  %p2831_p1 = pmov %p2830_p10 }
 0x143   : > { %2136 = vsyncadd (%p2831_p1), [#allocation6], 4294967040  ;;  %p2832_p5 = pmov %p2831_p1 }
 0x144   : > { %p2833_p8 = pmov %p2831_p1 }
 0x145   : > { %2138 = dma.done.wait (%p2832_p5), [#allocation9], 272  }
 0x146   : > { %2140 = vsyncadd (%p2833_p8), [#allocation9], 4294967024  ;;  %p2834_p3 = pmov %p2831_p1 }
 0x147   : > { %p2835_p12 = pmov %p2831_p1 }
 0x148   : > { %2142 = dma.done.wait (%p2834_p3), [#allocation12], 272  }
 0x149   : > { %2144 = vsyncadd (%p2835_p12), [#allocation12], 4294967024  ;;  %p2836_p6 = pmov %p2831_p1 }
 0x14a   : > { %p2837_p13 = pmov %p2831_p1 }
 0x14b   : > { %2146 = dma.done.wait (%p2836_p6), [#allocation15], 32  }
 0x14c   : > { %2148 = vsyncadd (%p2837_p13), [#allocation15], 4294967264  ;;  %p2838_p4 = pmov %p2831_p1 }
 0x14d   : > { %p2839_p9 = pmov %p2831_p1 }
 0x14e   : > { %2150 = dma.done.wait (%p2838_p4), [#allocation18], 16  }
 0x14f   : > { %2152 = vsyncadd (%p2839_p9), [#allocation18], 4294967280  ;;  %v2193_v0 = vmov 0.0   ;;  %vm2194_vm0 = vmmov 0   ;;  %v1765_v1 = vld [vmem:[#allocation7] sm:$0xff]   ;;  %v1766_v2 = vld [vmem:[#allocation10] sm:$0xff]   ;;  %v887_v39 = vlaneseq }
 0x150   : > { %1534 = vmatprep.subr.bf16.mxu0 %v2193_v0  ;;  %1542 = vmatprep.subr.bf16.mxu1 %v2193_v0  ;;  %v1767_v3 = vld [vmem:[#allocation7 + $0x8] sm:$0xff]   ;;  %v1768_v4 = vld [vmem:[#allocation10 + $0x8] sm:$0xff]   ;;  %vm563_vm1 = vcmask 261120   ;;  %v1483_v9 = vld [vmem:[#allocation8] ss:$0 sm:$0xff]  ;;  %s2195_s19 = smov 120  }
 0x151   : > { %1538 = vmatprep.mubr.msk.bf16.mxu0 %vm2194_vm0, %v2193_v0  ;;  %1546 = vmatprep.mubr.msk.bf16.mxu1 %vm2194_vm0, %v2193_v0  ;;  %v2638_v5 = vld [vmem:[%s452_s22] sm:$0xff]  ;;  %v538_v6 = vld [vmem:[%s461_s7] sm:$0xff]  ;;  %vm701_vm2 = vcmask 64512   ;;  %s2196_s2 = smov 104   ;;  %s2197_s24 = smov 112   ;;  %v888_v40 = vshrl.u32 %v887_v39, 7 }
 0x152   : > { %1535 = vmatpush3.bf16.msra.mxu0 %v1765_v1  ;;  %1543 = vmatpush3.bf16.msra.mxu1 %v1766_v2  ;;  %v537_v7 = vpack.c.bf16 %v2638_v5, %v2638_v5  ;;  %v539_v8 = vpack.c.bf16 %v538_v6, %v538_v6  ;;  %v1487_v10 = vld [vmem:[#allocation11] ss:$0 sm:$0xff]  ;;  %v892_v41 = vand.u32 127, %v887_v39  ;;  %s2198_s10 = smov 96   ;;  %vm954_vm4 = vcmask 1043456   ;;  %s2199_s23 = smov 8  }
 0x153   : > { %1536 = vmatprep.subr.bf16.mxu0 %v2193_v0  ;;  %1544 = vmatprep.subr.bf16.mxu1 %v2193_v0  ;;  %s2200_s6 = smov 16   ;;  %s2201_s3 = smov 24   ;;  %vm1158_vm5 = vcmask 130048   ;;  %vm1160_vm6 = vcmask 195584  }
 0x154   : > { %vm893_vm3 = vcmp.ge.s32.totalorder %v888_v40, %v892_v41  ;;  %s2840_s25 = sld [smem:[#allocation28_spill]]  ;;  %s534_s30 = scalar_lea.vmem [#allocation19], %s2594_s29 }
 0x155   : > { %s1276_s4 = sshll.u32 %s534_s30, 4  ;;  %s2841_s21 = sld [smem:[#allocation37_spill]]  ;;  %s2732_s4 = int_to_ptr.vmem [resolvable:$true] %s1276_s4 }
 0x156   : > { %1537 = vmatpush3.bf16.msra.mxu0 %v1767_v3  ;;  %1545 = vmatpush3.bf16.msra.mxu1 %v1768_v4  ;;  %s1262_s7 = scalar_lea.sflag [#allocation4], %s2591_s5  ;;  %p2842_p7 = scmp.ne.s32.totalorder %s2823_s20, 0 }
 0x157   : > { %1550 = vmatprep.subr.bf16.mxu0 %v2193_v0  ;;  %1556 = vmatprep.subr.bf16.mxu1 %v2193_v0  ;;  %s2202_s29 = smov [#allocation19]  }
 0x159   : > { %1539 = vmatmul.mubr.msk.bf16.vlgmr.msra.gmra.mrb[0].mxu0 %vm563_vm1, %v537_v7  ;;  %1547 = vmatmul.mubr.msk.bf16.vlgmr.msra.gmra.mrb[0].mxu1 %vm563_vm1, %v539_v8 }
 0x15a   : > { %1552 = vmatprep.mubr.msk.bf16.mxu0 %vm2194_vm0, %v2193_v0  ;;  %1558 = vmatprep.mubr.msk.bf16.mxu1 %vm2194_vm0, %v2193_v0  ;;  %s1506_s27 = sshll.u32 %s2840_s25, 7 }
 0x15b   : > { %s2730_s28 = scalar_lea.hbm %s2841_s21, %s1506_s27 }
 0x22c   : > { %v601_v11 = vpop.f32.mrb[0].mxu0  ;;  %v667_v13 = vpop.f32.mrb[0].mxu1 }
 0x22d   : > { %v602_v12 = vadd.f32 %v1483_v9, %v601_v11  ;;  %v1540_v14 = vpop.f32.mrb[1].mxu0  ;;  %v668_v15 = vadd.f32 %v1487_v10, %v667_v13  ;;  %v1548_v16 = vpop.f32.mrb[1].mxu1 }
 0x22e   : > { %v604_v17 = vpop.f32.mrb[2].mxu0  ;;  %v670_v18 = vpop.f32.mrb[2].mxu1 }
 0x22f   : > { %674 = vrot.lane.b32.xlu1 %v602_v12, %s2195_s19  ;;  %v1541_v19 = vpop.f32.mrb[3].mxu0  ;;  %688 = vrot.lane.b32.xlu0 %v668_v15, %s2195_s19  ;;  %v1549_v20 = vpop.f32.mrb[3].mxu1  ;;  %v2650_v21 = vpack.c.bf16 %v668_v15, %v668_v15  ;;  %v683_v23 = vpack.c.bf16 %v602_v12, %v602_v12  ;;  %s2073_s19 = scalar_lea.vmem %s2732_s4, 128 }
 0x230   : > { %p2074_p0 = scmp.ne.s32.totalorder %s2732_s4, %s2073_s19 }
 0x231   : > { %v706_v22 = vsel %vm701_vm2, %v2650_v21, 0 }
 0x232   : > { %1551 = vmatpush3.bf16.xpose.msra.mxu0 %v706_v22  ;;  %p2075_p11 = pnand %p2074_p0, %p2842_p7 }
 0x233   : > { %694 = vrot.lane.b32.xlu1 %v668_v15, %s2196_s2  ;;  %691 = vrot.lane.b32.xlu0 %v668_v15, %s2197_s24 }
 0x234   : > { %1562 = vmatprep.subr.bf16.mxu0 %v2193_v0  ;;  %p2076_p2 = pneg %p2075_p11 }
 0x237   : > { %680 = vrot.lane.b32.xlu1 %v602_v12, %s2196_s2  ;;  %677 = vrot.lane.b32.xlu0 %v602_v12, %s2197_s24  ;;  %s2077_s2 = sshll.u32 %s2202_s29, 4  ;;  %s2078_s2 = int_to_ptr.vmem [resolvable:$false] %s2077_s2 }
 0x238   : > { %s2079_s24 = scalar_lea.vmem %s2078_s2, 256  ;;  %p2080_p10 = scmp.lt.s32.totalorder %s2732_s4, %s2078_s2 }
 0x239   : > { %1553 = vmatmul.mubr.msk.bf16.vlgmr.msra.gmra.mrb[4].mxu0 %vm701_vm2, %v683_v23  ;;  %p2081_p1 = scmp.lt.s32.totalorder %s2079_s24, %s2073_s19 }
 0x23a   : > { %1564 = vmatprep.mubr.msk.bf16.mxu0 %vm2194_vm0, %v2193_v0 }
 0x23b   : > { %p2082_p5 = por %p2081_p1, %p2080_p10 }
 0x23d   : > { %p2083_p8 = pnand %p2082_p5, %p2076_p2 }
 0x2a1   : > { %v675_v24 = vpop.permute.xlu1 %674  ;;  %v689_v25 = vpop.permute.xlu0 %688 }
 0x2a2   : > { %v2658_v26 = vpack.c.bf16 %v689_v25, %v689_v25  ;;  %v684_v33 = vpack.c.bf16 %v675_v24, %v675_v24 }
 0x2a4   : > { %v752_v27 = vsel %vm701_vm2, %v2658_v26, 0 }
 0x2a5   : > { %1557 = vmatpush3.bf16.xpose.msra.mxu1 %v752_v27  ;;  %v692_v28 = vpop.permute.xlu0 %691  ;;  %v695_v29 = vpop.permute.xlu1 %694 }
 0x2a6   : > { %v2662_v30 = vpack.c.bf16 %v692_v28, %v692_v28  ;;  %1568 = vmatprep.subr.bf16.mxu1 %v2193_v0  ;;  %v2667_v32 = vpack.c.bf16 %v695_v29, %v695_v29 }
 0x2a8   : > { %v798_v31 = vsel %vm701_vm2, %v2662_v30, 0  ;;  %v844_v35 = vsel %vm701_vm2, %v2667_v32, 0 }
 0x2a9   : > { %1563 = vmatpush3.bf16.xpose.msra.mxu0 %v798_v31  ;;  %v678_v34 = vpop.permute.xlu0 %677  ;;  %v681_v37 = vpop.permute.xlu1 %680 }
 0x2aa   : > { %1574 = vmatprep.subr.bf16.mxu0 %v2193_v0  ;;  %v685_v36 = vpack.c.bf16 %v678_v34, %v678_v34  ;;  %v686_v38 = vpack.c.bf16 %v681_v37, %v681_v37 }
 0x2ac   : > { %1559 = vmatmul.mubr.msk.bf16.vlgmr.msra.gmra.mrb[4].mxu1 %vm701_vm2, %v684_v33 }
 0x2ad   : > { %1569 = vmatpush3.bf16.xpose.msra.mxu1 %v844_v35  ;;  %1570 = vmatprep.mubr.msk.bf16.mxu1 %vm2194_vm0, %v2193_v0 }
 0x2ae   : > { %1580 = vmatprep.subr.bf16.mxu1 %v2193_v0 }
 0x2b0   : > { %1565 = vmatmul.mubr.msk.bf16.vlgmr.msra.gmra.mrb[8].mxu0 %vm701_vm2, %v685_v36 }
 0x2b1   : > { %1576 = vmatprep.mubr.msk.bf16.mxu0 %vm2194_vm0, %v2193_v0 }
 0x2b4   : > { %1571 = vmatmul.mubr.msk.bf16.vlgmr.msra.gmra.mrb[8].mxu1 %vm701_vm2, %v686_v38 }
 0x2b5   : > { %1582 = vmatprep.mubr.msk.bf16.mxu1 %vm2194_vm0, %v2193_v0 }
 0x30c   : > { %v742_v42 = vpop.f32.mrb[4].mxu0 }
 0x30d   : > { %v896_v43 = vsel %vm893_vm3, %v742_v42, -1e+09  ;;  %v1554_v44 = vpop.f32.mrb[5].mxu0 }
 0x30e   : > { %v745_v45 = vpop.f32.mrb[6].mxu0  ;;  %v900_v46 = vsel %vm701_vm2, %v896_v43, -inf }
 0x30f   : > { %901 = vmax.xlane.f32.xlu0 %v900_v46  ;;  %v1555_v47 = vpop.f32.mrb[7].mxu0 }
 0x37f   : > { %v788_v48 = vpop.f32.mrb[4].mxu1 }
 0x380   : > { %v897_v49 = vsel %vm893_vm3, %v788_v48, -1e+09  ;;  %v1560_v50 = vpop.f32.mrb[5].mxu1 }
 0x381   : > { %v791_v51 = vpop.f32.mrb[6].mxu1  ;;  %v903_v52 = vsel %vm701_vm2, %v897_v49, -inf }
 0x382   : > { %904 = vmax.xlane.f32.xlu1 %v903_v52  ;;  %v1561_v53 = vpop.f32.mrb[7].mxu1  ;;  %v1769_v52 = vld [vmem:[#allocation13] sm:$0xff]  }
 0x383   : > { %v834_v54 = vpop.f32.mrb[8].mxu0  ;;  %v1770_v53 = vld [vmem:[#allocation13 + $0x8] sm:$0xff]  }
 0x384   : > { %v898_v55 = vsel %vm893_vm3, %v834_v54, -1e+09  ;;  %v1566_v56 = vpop.f32.mrb[9].mxu0 }
 0x385   : > { %v837_v57 = vpop.f32.mrb[10].mxu0  ;;  %v906_v58 = vsel %vm701_vm2, %v898_v55, -inf }
 0x386   : > { %907 = vmax.xlane.f32.xlu0 %v906_v58  ;;  %v1567_v59 = vpop.f32.mrb[11].mxu0 }
 0x387   : > { %v880_v60 = vpop.f32.mrb[8].mxu1 }
 0x388   : > { %v899_v61 = vsel %vm893_vm3, %v880_v60, -1e+09  ;;  %v1572_v62 = vpop.f32.mrb[9].mxu1 }
 0x389   : > { %v883_v63 = vpop.f32.mrb[10].mxu1  ;;  %v909_v1 = vsel %vm701_vm2, %v899_v61, -inf }
 0x38a   : > { %v1573_v2 = vpop.f32.mrb[11].mxu1  ;;  %910 = vmax.xlane.f32.xlu0 %v909_v1 }
 0x393   : > { %949 = vrot.lane.b32.xlu1 %v2650_v21, %s2198_s10 }
 0x39c   : > { %v902_v3 = vpop.xlane.xlu0 %901 }
 0x39d   : > { %v912_v4 = vsub.f32 %v896_v43, %v902_v3 }
 0x39f   : > { %v916_v6 = vmul.f32 1.442695, %v912_v4 }
 0x3a1   : > { %1771 = vpow2.f32 %v916_v6 }
 0x3ab   : > { %v1772_v7 = vpop.eup %1771 }
 0x3ac   : > { %v924_v8 = vsel %vm701_vm2, %v1772_v7, 0.0 }
 0x3b7   : > { %925 = vadd.xlane.f32.xlu1 %v924_v8 }
 0x40f   : > { %v905_v9 = vpop.xlane.xlu1 %904 }
 0x410   : > { %v913_v10 = vsub.f32 %v897_v49, %v905_v9 }
 0x412   : > { %v918_v11 = vmul.f32 1.442695, %v913_v10  ;;  %v1499_v10 = vld [vmem:[#allocation14] ss:$0 sm:$0xff] }
 0x413   : > { %v950_v12 = vpop.permute.xlu1 %949  ;;  %v908_v13 = vpop.xlane.xlu0 %907 }
 0x414   : > { %1773 = vpow2.f32 %v918_v11  ;;  %v956_v14 = vsel %vm954_vm4, %v950_v12, 0  ;;  %v914_v15 = vsub.f32 %v898_v55, %v908_v13 }
 0x415   : > { %1575 = vmatpush3.bf16.msra.mxu0 %v956_v14 }
 0x416   : > { %v920_v16 = vmul.f32 1.442695, %v914_v15  ;;  %1586 = vmatprep.subr.bf16.mxu0 %v2193_v0 }
 0x417   : > { %v911_v17 = vpop.xlane.xlu0 %910 }
 0x418   : > { %1775 = vpow2.f32 %v920_v16  ;;  %v915_v18 = vsub.f32 %v899_v61, %v911_v17 }
 0x41a   : > { %v922_v19 = vmul.f32 1.442695, %v915_v18 }
 0x41c   : > { %1777 = vpow2.f32 %v922_v19 }
 0x41e   : > { %v1774_v20 = vpop.eup %1773 }
 0x41f   : > { %v927_v21 = vsel %vm701_vm2, %v1774_v20, 0.0 }
 0x420   : > { %928 = vadd.xlane.f32.xlu0 %v927_v21 }
 0x422   : > { %v1776_v22 = vpop.eup %1775 }
 0x423   : > { %v930_v23 = vsel %vm701_vm2, %v1776_v22, 0.0 }
 0x424   : > { %931 = vadd.xlane.f32.xlu1 %v930_v23 }
 0x426   : > { %v1778_v24 = vpop.eup %1777 }
 0x427   : > { %v933_v25 = vsel %vm701_vm2, %v1778_v24, 0.0 }
 0x428   : > { %934 = vadd.xlane.f32.xlu0 %v933_v25 }
 0x435   : > { %1048 = vrot.lane.b32.xlu1 %v2662_v30, %s2198_s10 }
 0x439   : > { %1097 = vrot.lane.b32.xlu1 %v2667_v32, %s2198_s10 }
 0x43e   : > { %999 = vrot.lane.b32.xlu0 %v2658_v26, %s2198_s10 }
 0x444   : > { %v926_v27 = vpop.xlane.xlu1 %925 }
 0x445   : > { %1779 = vrcp.f32 %v926_v27 }
 0x44f   : > { %v1780_v28 = vpop.eup %1779 }
 0x450   : > { %v940_v29 = vmul.f32 %v1780_v28, %v1772_v7 }
 0x452   : > { %v944_v31 = vpack.c.bf16 %v940_v29, %v940_v29  ;;  %v1504_v29 = vld [vmem:[#allocation17] ss:$0 sm:$0xff] }
 0x454   : > { %1577 = vmatmul.mubr.msk.bf16.vlgmr.msra.gmra.mrb[12].mxu0 %vm701_vm2, %v944_v31 }
 0x455   : > { %1588 = vmatprep.mubr.msk.bf16.mxu0 %vm2194_vm0, %v2193_v0 }
 0x4ad   : > { %v929_v33 = vpop.xlane.xlu0 %928 }
 0x4ae   : > { %1781 = vrcp.f32 %v929_v33 }
 0x4b1   : > { %v932_v34 = vpop.xlane.xlu1 %931 }
 0x4b2   : > { %1783 = vrcp.f32 %v932_v34 }
 0x4b5   : > { %v1049_v30 = vpop.permute.xlu1 %1048  ;;  %v935_v35 = vpop.xlane.xlu0 %934 }
 0x4b6   : > { %v1054_v32 = vsel %vm954_vm4, %v1049_v30, 0  ;;  %1785 = vrcp.f32 %v935_v35 }
 0x4b7   : > { %1587 = vmatpush3.bf16.msra.mxu0 %v1054_v32 }
 0x4b8   : > { %v1782_v26 = vpop.eup %1781  ;;  %1598 = vmatprep.subr.bf16.mxu0 %v2193_v0 }
 0x4b9   : > { %v941_v36 = vmul.f32 %v1782_v26, %v1774_v20  ;;  %v1000_v37 = vpop.permute.xlu0 %999  ;;  %v1098_v39 = vpop.permute.xlu1 %1097 }
 0x4ba   : > { %v1005_v38 = vsel %vm954_vm4, %v1000_v37, 0  ;;  %v1103_v43 = vsel %vm954_vm4, %v1098_v39, 0 }
 0x4bb   : > { %1581 = vmatpush3.bf16.msra.mxu1 %v1005_v38  ;;  %v945_v40 = vpack.c.bf16 %v941_v36, %v941_v36 }
 0x4bc   : > { %v1784_v41 = vpop.eup %1783  ;;  %1592 = vmatprep.subr.bf16.mxu1 %v2193_v0 }
 0x4bd   : > { %v942_v42 = vmul.f32 %v1784_v41, %v1776_v22 }
 0x4be   : > { %1583 = vmatmul.mubr.msk.bf16.vlgmr.msra.gmra.mrb[12].mxu1 %vm701_vm2, %v945_v40 }
 0x4bf   : > { %1593 = vmatpush3.bf16.msra.mxu1 %v1103_v43  ;;  %v946_v44 = vpack.c.bf16 %v942_v42, %v942_v42  ;;  %1594 = vmatprep.mubr.msk.bf16.mxu1 %vm2194_vm0, %v2193_v0 }
 0x4c0   : > { %v1786_v45 = vpop.eup %1785 }
 0x4c1   : > { %v943_v46 = vmul.f32 %v1786_v45, %v1778_v24  ;;  %1589 = vmatmul.mubr.msk.bf16.vlgmr.msra.gmra.mrb[16].mxu0 %vm701_vm2, %v946_v44 }
 0x4c2   : > { %1602 = vmatprep.mubr.msk.bf16.mxu0 %vm2194_vm0, %v2193_v0  ;;  %1599 = vmatpush3.bf16.msra.mxu0 %v1769_v52 }
 0x4c3   : > { %v947_v47 = vpack.c.bf16 %v943_v46, %v943_v46  ;;  %1600 = vmatprep.subr.bf16.mxu0 %v2193_v0 }
 0x4c6   : > { %1595 = vmatmul.mubr.msk.bf16.vlgmr.msra.gmra.mrb[16].mxu1 %vm701_vm2, %v947_v47  ;;  %1601 = vmatpush3.bf16.msra.mxu0 %v1770_v53 }
 0x527   : > { %v992_v48 = vpop.f32.mrb[12].mxu0 }
 0x528   : > { %v1578_v49 = vpop.f32.mrb[13].mxu0 }
 0x529   : > { %v995_v50 = vpop.f32.mrb[14].mxu0 }
 0x52a   : > { %v1579_v51 = vpop.f32.mrb[15].mxu0 }
 0x591   : > { %v1041_v54 = vpop.f32.mrb[12].mxu1 }
 0x592   : > { %1146 = vrot.lane.b32.xlu0 %v1041_v54, %s2199_s23  ;;  %v1584_v55 = vpop.f32.mrb[13].mxu1 }
 0x593   : > { %v1044_v56 = vpop.f32.mrb[14].mxu1 }
 0x594   : > { %v1585_v57 = vpop.f32.mrb[15].mxu1  ;;  %v1090_v58 = vpop.f32.mrb[16].mxu0 }
 0x595   : > { %1150 = vrot.lane.b32.xlu1 %v1090_v58, %s2200_s6  ;;  %v1590_v59 = vpop.f32.mrb[17].mxu0 }
 0x596   : > { %v1093_v60 = vpop.f32.mrb[18].mxu0 }
 0x597   : > { %v1591_v61 = vpop.f32.mrb[19].mxu0 }
 0x599   : > { %v1139_v62 = vpop.f32.mrb[16].mxu1 }
 0x59a   : > { %1154 = vrot.lane.b32.xlu0 %v1139_v62, %s2201_s3  ;;  %v1596_v63 = vpop.f32.mrb[17].mxu1 }
 0x59b   : > { %v1142_v1 = vpop.f32.mrb[18].mxu1 }
 0x59c   : > { %v1597_v0 = vpop.f32.mrb[19].mxu1 }
 0x604   : > { %v1147_v2 = vpop.permute.xlu0 %1146 }
 0x605   : > { %v1157_v4 = vsel %vm701_vm2, %v992_v48, %v1147_v2 }
 0x607   : > { %v1151_v3 = vpop.permute.xlu1 %1150 }
 0x608   : > { %v1159_v6 = vsel %vm1158_vm5, %v1157_v4, %v1151_v3 }
 0x60c   : > { %v1155_v7 = vpop.permute.xlu0 %1154 }
 0x60d   : > { %v1161_v8 = vsel %vm1160_vm6, %v1159_v6, %v1155_v7 }
 0x60e   : > { %v1162_v9 = vpack.c.bf16 %v1161_v8, %v1161_v8 }
 0x610   : > { %1603 = vmatmul.mubr.msk.bf16.vlgmr.msra.gmra.mrb[20].mxu0 %vm563_vm1, %v1162_v9 }
 0x6e3   : > { %v1223_v11 = vpop.f32.mrb[20].mxu0 }
 0x6e4   : > { %v1224_v12 = vadd.f32 %v1499_v10, %v1223_v11  ;;  %v1604_v13 = vpop.f32.mrb[21].mxu0 }
 0x6e5   : > { %v1226_v14 = vpop.f32.mrb[22].mxu0 }
 0x6e6   : > { %v1605_v15 = vpop.f32.mrb[23].mxu0  ;;  %v1229_v16 = vadd.f32 %v1224_v12, %v2638_v5  ;;  %v1503_v5 = vld [vmem:[#allocation16] ss:$0 sm:$0xff] }
 0x6e8   : > { %v1230_v17 = vsel %vm563_vm1, %v1229_v16, 0.0 }
 0x6e9   : > { %1231 = vadd.xlane.f32.xlu1 %v1230_v17 }
 0x776   : > { %v1232_v18 = vpop.xlane.xlu1 %1231 }
 0x777   : > { %v1234_v19 = vmul.f32 0.03125, %v1232_v18 }
 0x779   : > { %v1235_v20 = vsub.f32 %v1229_v16, %v1234_v19 }
 0x77b   : > { %v1236_v21 = vmul.f32 %v1235_v20, %v1235_v20 }
 0x77d   : > { %v1237_v22 = vsel %vm563_vm1, %v1236_v21, 0.0 }
 0x77e   : > { %1238 = vadd.xlane.f32.xlu0 %v1237_v22 }
 0x80b   : > { %v1239_v23 = vpop.xlane.xlu0 %1238 }
 0x80c   : > { %v1240_v24 = vmul.f32 0.03125, %v1239_v23 }
 0x80e   : > { %v1241_v25 = vadd.f32 1e-05, %v1240_v24 }
 0x810   : > { %1787 = vrsqrt.f32 %v1241_v25 }
 0x81a   : > { %v1788_v27 = vpop.eup %1787 }
 0x81b   : > { %v1243_v28 = vmul.f32 %v1788_v27, %v1235_v20 }
 0x81d   : > { %v1251_v31 = vmul.f32 %v1503_v5, %v1243_v28 }
 0x81f   : > { %v1259_v33 = vadd.f32 %v1504_v29, %v1251_v31 }
 0x821   : > { %1260 = vst.msk [vmem:[%s534_s30] sm:$0xff] %vm563_vm1, %v1259_v33 }
 0x822   : > { %2086 = shalt.err (!%p2083_p8)
}
 0x823   : > { %s2087_s5 = scalar_lea.hbm %s2730_s28, 128  ;;  %s2091_s6 = scalar_lea.hbm %s2841_s21, 256 }
 0x824   : > { %p2088_p3 = scmp.ne.s32.totalorder %s2730_s28, %s2087_s5  ;;  %p2092_p13 = scmp.lt.u32.totalorder %s2730_s28, %s2841_s21 }
 0x825   : > { %p2093_p4 = scmp.lt.u32.totalorder %s2091_s6, %s2087_s5  ;;  %p2095_p0 = scmp.lt.u32.totalorder %s2087_s5, %s2730_s28 }
 0x826   : > { %p2089_p12 = pnand %p2088_p3, %p2842_p7 }
 0x827   : > { %p2094_p9 = por %p2093_p4, %p2092_p13 }
 0x828   : > { %p2090_p6 = pneg %p2089_p12 }
 0x829   : > { %p2096_p11 = por %p2095_p0, %p2094_p9 }
 0x82b   : > { %p2097_p2 = pnand %p2096_p11, %p2090_p6 }
 0x82d   : > { %2100 = shalt.err (!%p2097_p2)
}
 0x82e   : > { %1642 = dma.vmem_to_hbm [thread:$0]  (%p2842_p7), %s2732_s4, 128, %s2730_s28, %s1262_s7  }
 0x82f PF: > { %s1288_s27 = sand.u32 1, %s2159_s13   ;;  %p2843_p10 = scmp.ne.s32.totalorder %s2824_s26, 0 }
 0x830   : > { %p2844_p1 = scmp.ge.s32.totalorder %s2179_s18, 2  ;;  %s1289_s30 = scalar_lea.sflag [#allocation4], %s1288_s27 }
 0x832   : > { %p1677_p5 = pnand %p2844_p1, %p2843_p10 }
 0x834   : > { %2154 = dma.done.wait (!%p1677_p5), %s1289_s30, 128  }
 0x835   : > { %2156 = vsyncadd (!%p1677_p5), %s1289_s30, 4294967168  ;;  %s33_s18 = sadd.s32 1, %s2179_s18   ;;  %s2845_s13 = smov %s2163_s14 }
 0x836   : > { %p30_p8 = scmp.ge.s32.totalorder %s33_s18, 4   ;;  %s2846_s14 = smov %s2167_s15 }
 0x837   : > { %s2847_s15 = smov %s2512_s12  ;;  %s2848_s16 = smov %s2175_s17 }
 0x838   : > { %s2849_s17 = smov %s2851_s11  ;;  %32 = sbr.rel (!%p30_p8) target bundleno = 21 (0x15), region = 150 }
 0x83f   :  { %1294 = vsyncpa [#allocation3], 1 }
 0x840   :  { %1296 = vsyncpa [#allocation3 + $0x1], 1 }
 0x841   :  { %1297 = vsyncpa [#allocation6], 1 }
 0x842   :  { %1299 = vsyncpa [#allocation6 + $0x1], 1 }
 0x843   :  { %1300 = vsyncpa [#allocation9], 1 }
 0x844   :  { %1301 = vsyncpa [#allocation12], 1 }
 0x845   :  { %1302 = vsyncpa [#allocation15], 1 }
 0x846   :  { %1303 = vsyncpa [#allocation18], 1 }
 0x847   :  { %1304 = vsyncpa [#allocation4], 1 }
 0x848   :  { %1306 = vsyncpa [#allocation4 + $0x1], 1 }

// kernel: decoder_forward.7
= control target key start
LH: loop header
LB: loop body
LE: loop exit
PB: predicated region body
PF: predicated region fallthrough
CT: control target
= control target key end

     0   :  { %s2762_s0 = inlined_call_operand.hbm [shape: f32[2,8,32], index: 0, kind: input, shape index: {}]   ;;  %s2763_s1 = inlined_call_operand.hbm [shape: f32[2,8,32], index: 1, kind: input, shape index: {}]   ;;  %s2764_s2 = inlined_call_operand.hbm [shape: bf16[32,32], index: 2, kind: input, shape index: {}]   ;;  %s2765_s3 = inlined_call_operand.hbm [shape: f32[1,32], index: 3, kind: input, shape index: {}]   ;;  %s2766_s4 = inlined_call_operand.hbm [shape: bf16[32,64], index: 4, kind: input, shape index: {}]   ;;  %s2767_s5 = inlined_call_operand.hbm [shape: f32[1,64], index: 5, kind: input, shape index: {}]   ;;  %s2768_s6 = inlined_call_operand.hbm [shape: bf16[32,32], index: 6, kind: input, shape index: {}]   ;;  %s2769_s7 = inlined_call_operand.hbm [shape: f32[1,32], index: 7, kind: input, shape index: {}]   ;;  %s2770_s8 = inlined_call_operand.hbm [shape: f32[1,32], index: 8, kind: input, shape index: {}]   ;;  %s2771_s9 = inlined_call_operand.hbm [shape: f32[1,32], index: 9, kind: input, shape index: {}]   ;;  %s2772_s10 = inlined_call_operand.hbm [shape: f32[2,8,32], index: 10, kind: output, shape index: {}]  }
   0x1   :  { %2782 = sst [smem:[#allocation30_spill]] %s2763_s1 }
   0x2   :  { %2783 = sst [smem:[#allocation31_spill]] %s2764_s2 }
   0x3   :  { %2784 = sst [smem:[#allocation32_spill]] %s2765_s3 }
   0x4   :  { %2785 = sst [smem:[#allocation33_spill]] %s2766_s4 }
   0x5   :  { %2786 = sst [smem:[#allocation34_spill]] %s2767_s5 }
   0x6   :  { %2787 = sst [smem:[#allocation35_spill]] %s2768_s6 }
   0x7   :  { %2788 = sst [smem:[#allocation36_spill]] %s2769_s7 }
   0x8   :  { %2789 = sst [smem:[#allocation37_spill]] %s2772_s10 }
   0x9   :  { %15 = vsyncpa [#allocation3], 0 }
   0xa   :  { %17 = vsyncpa [#allocation3 + $0x1], 0 }
   0xb   :  { %18 = vsyncpa [#allocation6], 0 }
   0xc   :  { %20 = vsyncpa [#allocation6 + $0x1], 0 }
   0xd   :  { %21 = vsyncpa [#allocation9], 0 }
   0xe   :  { %22 = vsyncpa [#allocation12], 0 }
   0xf   :  { %23 = vsyncpa [#allocation15], 0 }
  0x10   :  { %24 = vsyncpa [#allocation18], 0 }
  0x11   :  { %25 = vsyncpa [#allocation4], 0 }
  0x12   :  { %27 = vsyncpa [#allocation4 + $0x1], 0  ;;  %s2244_s13 = smov 0   ;;  %s2246_s14 = smov 0  }
  0x13   :  { %s2248_s15 = smov 0   ;;  %s2250_s16 = smov 0  }
  0x14   :  { %s2252_s17 = smov 0   ;;  %s2254_s18 = smov 0  }
  0x15 LB: > { %2790 = sst [smem:[#allocation28_spill]] %s2157_s16  ;;  %s2275_s19 = sadd.s32 4294967295, %s2165_s18   ;;  %s2165_s18 = sphi %s2254_s18, %s33_s18   ;;  %s2161_s17 = sphi %s2252_s17, %s2831_s17   ;;  %s2157_s16 = sphi %s2250_s16, %s2830_s16   ;;  %s2153_s15 = sphi %s2248_s15, %s2829_s15   ;;  %s2149_s14 = sphi %s2246_s14, %s2828_s14   ;;  %s2145_s13 = sphi %s2244_s13, %s2827_s13  }
  0x16   : > { %p1443_p0 = scmp.ge.s32.totalorder %s2165_s18, 1  ;;  %p2776_p1 = scmp.eq.s32.totalorder %s2275_s19, 0 }
  0x17   : > { %p300_p2 = scmp.lt.s32.totalorder %s2165_s18, 3  ;;  %s2167_s21 = smov [#allocation7]  }
  0x18   : > { %s312_s22 = sshll.u32 %s2167_s21, 4  ;;  %s2168_s24 = smov [#allocation8]   ;;  %s2284_s22 = int_to_ptr.vmem [resolvable:$true] %s312_s22 }
  0x19   : > { %p2280_p3 = pnand %p1443_p0, %p300_p2  ;;  %s326_s25 = sshll.u32 %s2168_s24, 4  ;;  %s2295_s25 = int_to_ptr.vmem [resolvable:$true] %s326_s25 }
  0x1a   : > { %s2169_s26 = smov [#allocation11]   ;;  %s2794_s2 = sld [smem:[#allocation31_spill]] }
  0x1b   : > { %s2791_s20 = scalar_select %p2280_p3, 1, 0 }
  0x1c   : > { %p1630_p4 = pneg %p2280_p3  ;;  %s2297_s27 = sshll.u32 %s2169_s26, 4  ;;  %s351_s27 = int_to_ptr.vmem [resolvable:$true] %s2297_s27 }
  0x1d   : > { %2792 = sst [smem:[#allocation29_spill]] %s2791_s20 }
  0x1e   : > { %p2291_p6 = pnand %p1630_p4, %p2776_p1 }
  0x20   : > { %s1775_s30 = scalar_lea.hbm %s2794_s2, 256  ;;  %p2307_p8 = pneg %p2291_p6 }
  0x21   : > { %p1776_p7 = scmp.ne.s32.totalorder %s2794_s2, %s1775_s30  ;;  %p1782_p11 = scmp.lt.u32.totalorder %s1775_s30, %s2794_s2 }
  0x23   : > { %p1778_p9 = pnand %p2307_p8, %p1776_p7 }
  0x25   : > { %p1779_p10 = pneg %p1778_p9 }
  0x27   : > { %p1784_p12 = pnand %p1782_p11, %p1779_p10 }
  0x29   : > { %1787 = shalt.err (!%p1784_p12)
}
  0x2a   : > { %s1788_s28 = scalar_lea.vmem %s2284_s22, 256  ;;  %p1796_p4 = scmp.lt.s32.totalorder %s2284_s22, %s2284_s22 }
  0x2b   : > { %p1789_p13 = scmp.ne.s32.totalorder %s2284_s22, %s1788_s28  ;;  %p1797_p5 = scmp.lt.s32.totalorder %s1788_s28, %s1788_s28 }
  0x2d   : > { %p1791_p0 = pnand %p1789_p13, %p2307_p8  ;;  %p1798_p7 = por %p1797_p5, %p1796_p4 }
  0x2f   : > { %p1792_p2 = pneg %p1791_p0 }
  0x31   : > { %p1799_p9 = pnand %p1798_p7, %p1792_p2 }
  0x33   : > { %1802 = shalt.err (!%p1799_p9)
}
  0x34   : > { %s2778_s29 = smov 64   ;;  %s2171_s30 = smov 4  }
  0x35   : > { %1633 = dma.hbm_to_vmem [thread:$0]  (!%p2291_p6), %s2794_s2, 256, %s2284_s22, [#allocation6], %s2778_s29, %s2778_s29, %s2171_s30  }
  0x36   : > { %s2796_s3 = sld [smem:[#allocation32_spill]] }
  0x3c   : > { %s1803_s28 = scalar_lea.hbm %s2796_s3, 16 }
  0x3d   : > { %p1804_p5 = scmp.ne.s32.totalorder %s2796_s3, %s1803_s28  ;;  %p1810_p12 = scmp.lt.u32.totalorder %s1803_s28, %s2796_s3 }
  0x3f   : > { %p1806_p10 = pnand %p1804_p5, %p2307_p8 }
  0x41   : > { %p1807_p11 = pneg %p1806_p10 }
  0x43   : > { %p1812_p13 = pnand %p1810_p12, %p1807_p11 }
  0x45   : > { %1815 = shalt.err (!%p1812_p13)
}
  0x46   : > { %s1816_s22 = scalar_lea.vmem %s2295_s25, 16  ;;  %s1823_s10 = scalar_lea.vmem %s2295_s25, 32 }
  0x47   : > { %p1817_p0 = scmp.ne.s32.totalorder %s2295_s25, %s1816_s22  ;;  %p1824_p7 = scmp.lt.s32.totalorder %s2295_s25, %s2295_s25 }
  0x48   : > { %p1825_p9 = scmp.lt.s32.totalorder %s1823_s10, %s1816_s22 }
  0x49   : > { %p1819_p2 = pnand %p1817_p0, %p2307_p8 }
  0x4a   : > { %p1826_p5 = por %p1825_p9, %p1824_p7 }
  0x4b   : > { %p1820_p4 = pneg %p1819_p2 }
  0x4d   : > { %p1827_p10 = pnand %p1826_p5, %p1820_p4 }
  0x4f   : > { %1830 = shalt.err (!%p1827_p10)
}
  0x50   : > { %1636 = dma.hbm_to_vmem [thread:$0]  (!%p2291_p6), %s2796_s3, 16, %s2295_s25, [#allocation9]  }
  0x51   : > { %s2797_s5 = sld [smem:[#allocation34_spill]] }
  0x57   : > { %s1831_s12 = scalar_lea.hbm %s2797_s5, 16 }
  0x58   : > { %p1832_p11 = scmp.ne.s32.totalorder %s2797_s5, %s1831_s12  ;;  %p1838_p0 = scmp.lt.u32.totalorder %s1831_s12, %s2797_s5 }
  0x5a   : > { %p1834_p12 = pnand %p1832_p11, %p2307_p8 }
  0x5c   : > { %p1835_p13 = pneg %p1834_p12 }
  0x5e   : > { %p1840_p2 = pnand %p1838_p0, %p1835_p13 }
  0x60   : > { %1843 = shalt.err (!%p1840_p2)
}
  0x61   : > { %s1844_s10 = scalar_lea.vmem %s351_s27, 16  ;;  %s1851_s25 = scalar_lea.vmem %s351_s27, 32 }
  0x62   : > { %p1845_p4 = scmp.ne.s32.totalorder %s351_s27, %s1844_s10  ;;  %p1852_p5 = scmp.lt.s32.totalorder %s351_s27, %s351_s27 }
  0x63   : > { %p1853_p10 = scmp.lt.s32.totalorder %s1851_s25, %s1844_s10 }
  0x64   : > { %p1847_p7 = pnand %p1845_p4, %p2307_p8 }
  0x65   : > { %p1854_p1 = por %p1853_p10, %p1852_p5 }
  0x66   : > { %p1848_p9 = pneg %p1847_p7 }
  0x68   : > { %p1855_p3 = pnand %p1854_p1, %p1848_p9 }
  0x6a   : > { %1858 = shalt.err (!%p1855_p3)
}
  0x6b   : > { %1642 = dma.hbm_to_vmem [thread:$0]  (!%p2291_p6), %s2797_s5, 16, %s351_s27, [#allocation12]  }
  0x6c   : > { %s2172_s20 = smov [#allocation14]   ;;  %s2173_s12 = smov [#allocation10]  }
  0x6d   : > { %s374_s11 = sshll.u32 %s2172_s20, 4  ;;  %s336_s24 = sshll.u32 %s2173_s12, 4  ;;  %s375_s11 = int_to_ptr.vmem [resolvable:$true] %s374_s11  ;;  %s337_s24 = int_to_ptr.vmem [resolvable:$true] %s336_s24 }
  0x6e   : > { %s2798_s7 = sld [smem:[#allocation36_spill]] }
  0x74   : > { %s1859_s22 = scalar_lea.hbm %s2798_s7, 16 }
  0x75   : > { %p1860_p1 = scmp.ne.s32.totalorder %s2798_s7, %s1859_s22  ;;  %p1866_p12 = scmp.lt.u32.totalorder %s1859_s22, %s2798_s7 }
  0x77   : > { %p1862_p3 = pnand %p1860_p1, %p2307_p8 }
  0x79   : > { %p1863_p11 = pneg %p1862_p3 }
  0x7b   : > { %p1868_p13 = pnand %p1866_p12, %p1863_p11 }
  0x7d   : > { %1871 = shalt.err (!%p1868_p13)
}
  0x7e   : > { %s1872_s27 = scalar_lea.vmem %s375_s11, 16  ;;  %s1879_s16 = scalar_lea.vmem %s375_s11, 32 }
  0x7f   : > { %p1873_p0 = scmp.ne.s32.totalorder %s375_s11, %s1872_s27  ;;  %p1880_p7 = scmp.lt.s32.totalorder %s375_s11, %s375_s11 }
  0x80   : > { %p1881_p9 = scmp.lt.s32.totalorder %s1879_s16, %s1872_s27 }
  0x81   : > { %p1875_p2 = pnand %p1873_p0, %p2307_p8 }
  0x82   : > { %p1882_p5 = por %p1881_p9, %p1880_p7 }
  0x83   : > { %p1876_p4 = pneg %p1875_p2 }
  0x85   : > { %p1883_p10 = pnand %p1882_p5, %p1876_p4 }
  0x87   : > { %1886 = shalt.err (!%p1883_p10)
}
  0x88   : > { %1648 = dma.hbm_to_vmem [thread:$0]  (!%p2291_p6), %s2798_s7, 16, %s375_s11, [#allocation15]  }
  0x89   : > { %s2799_s4 = sld [smem:[#allocation33_spill]] }
  0x8f   : > { %s1887_s28 = scalar_lea.hbm %s2799_s4, 256 }
  0x90   : > { %p1888_p1 = scmp.ne.s32.totalorder %s2799_s4, %s1887_s28  ;;  %p1894_p12 = scmp.lt.u32.totalorder %s1887_s28, %s2799_s4 }
  0x92   : > { %p1890_p3 = pnand %p1888_p1, %p2307_p8 }
  0x94   : > { %p1891_p11 = pneg %p1890_p3 }
  0x96   : > { %p1896_p13 = pnand %p1894_p12, %p1891_p11 }
  0x98   : > { %1899 = shalt.err (!%p1896_p13)
}
  0x99   : > { %s1900_s27 = scalar_lea.vmem %s337_s24, 256  ;;  %p1908_p7 = scmp.lt.s32.totalorder %s337_s24, %s337_s24 }
  0x9a   : > { %p1901_p0 = scmp.ne.s32.totalorder %s337_s24, %s1900_s27  ;;  %p1909_p9 = scmp.lt.s32.totalorder %s1900_s27, %s1900_s27 }
  0x9c   : > { %p1903_p2 = pnand %p1901_p0, %p2307_p8  ;;  %p1910_p5 = por %p1909_p9, %p1908_p7 }
  0x9e   : > { %p1904_p4 = pneg %p1903_p2 }
  0xa0   : > { %p1911_p10 = pnand %p1910_p5, %p1904_p4 }
  0xa2   : > { %1914 = shalt.err (!%p1911_p10)
}
  0xa3   : > { %s2800_s11 = smov 64   ;;  %s2174_s12 = smov [#allocation13]  }
  0xa4   : > { %1639 = dma.hbm_to_vmem [thread:$0]  (!%p2291_p6), %s2799_s4, 256, %s337_s24, [#allocation9], %s2800_s11, %s2800_s11, %s2171_s30  }
  0xa5   : > { %s360_s29 = sshll.u32 %s2174_s12, 4  ;;  %s2175_s26 = smov [#allocation16]   ;;  %s361_s29 = int_to_ptr.vmem [resolvable:$true] %s360_s29 }
  0xa6   : > { %s385_s28 = sshll.u32 %s2175_s26, 4  ;;  %s2801_s6 = sld [smem:[#allocation35_spill]]  ;;  %s386_s28 = int_to_ptr.vmem [resolvable:$true] %s385_s28 }
  0xac   : > { %s1915_s25 = scalar_lea.hbm %s2801_s6, 256 }
  0xad   : > { %p1916_p1 = scmp.ne.s32.totalorder %s2801_s6, %s1915_s25  ;;  %p1922_p12 = scmp.lt.u32.totalorder %s1915_s25, %s2801_s6 }
  0xaf   : > { %p1918_p3 = pnand %p1916_p1, %p2307_p8 }
  0xb1   : > { %p1919_p11 = pneg %p1918_p3 }
  0xb3   : > { %p1924_p13 = pnand %p1922_p12, %p1919_p11 }
  0xb5   : > { %1927 = shalt.err (!%p1924_p13)
}
  0xb6   : > { %s1928_s24 = scalar_lea.vmem %s361_s29, 256  ;;  %p1936_p7 = scmp.lt.s32.totalorder %s361_s29, %s361_s29 }
  0xb7   : > { %p1929_p0 = scmp.ne.s32.totalorder %s361_s29, %s1928_s24  ;;  %p1937_p9 = scmp.lt.s32.totalorder %s1928_s24, %s1928_s24 }
  0xb9   : > { %p1931_p2 = pnand %p1929_p0, %p2307_p8  ;;  %p1938_p5 = por %p1937_p9, %p1936_p7 }
  0xbb   : > { %p1932_p4 = pneg %p1931_p2 }
  0xbd   : > { %p1939_p10 = pnand %p1938_p5, %p1932_p4 }
  0xbf   : > { %1942 = shalt.err (!%p1939_p10)
}
  0xc0   : > { %1645 = dma.hbm_to_vmem [thread:$0]  (!%p2291_p6), %s2801_s6, 256, %s361_s29, [#allocation12], %s2800_s11, %s2800_s11, %s2171_s30  }
  0xc1   : > { %s1943_s22 = scalar_lea.hbm %s2770_s8, 16 }
  0xc2   : > { %p1944_p1 = scmp.ne.s32.totalorder %s2770_s8, %s1943_s22  ;;  %p1950_p12 = scmp.lt.u32.totalorder %s1943_s22, %s2770_s8 }
  0xc4   : > { %p1946_p3 = pnand %p1944_p1, %p2307_p8 }
  0xc6   : > { %p1947_p11 = pneg %p1946_p3 }
  0xc8   : > { %p1952_p13 = pnand %p1950_p12, %p1947_p11 }
  0xca   : > { %1955 = shalt.err (!%p1952_p13)
}
  0xcb   : > { %s1956_s16 = scalar_lea.vmem %s386_s28, 16  ;;  %s1963_s30 = scalar_lea.vmem %s386_s28, 32 }
  0xcc   : > { %p1957_p0 = scmp.ne.s32.totalorder %s386_s28, %s1956_s16  ;;  %p1964_p7 = scmp.lt.s32.totalorder %s386_s28, %s386_s28 }
  0xcd   : > { %p1965_p9 = scmp.lt.s32.totalorder %s1963_s30, %s1956_s16 }
  0xce   : > { %p1959_p2 = pnand %p1957_p0, %p2307_p8 }
  0xcf   : > { %p1966_p5 = por %p1965_p9, %p1964_p7 }
  0xd0   : > { %p1960_p4 = pneg %p1959_p2 }
  0xd2   : > { %p1967_p10 = pnand %p1966_p5, %p1960_p4 }
  0xd4   : > { %1970 = shalt.err (!%p1967_p10)
}
  0xd5   : > { %1651 = dma.hbm_to_vmem [thread:$0]  (!%p2291_p6), %s2770_s8, 16, %s386_s28, [#allocation15]  }
  0xd6   : > { %s2176_s24 = smov [#allocation17]   ;;  %s1971_s26 = scalar_lea.hbm %s2771_s9, 16 }
  0xd7   : > { %s396_s2 = sshll.u32 %s2176_s24, 4  ;;  %p1972_p1 = scmp.ne.s32.totalorder %s2771_s9, %s1971_s26  ;;  %s397_s2 = int_to_ptr.vmem [resolvable:$true] %s396_s2 }
  0xd8   : > { %p1978_p12 = scmp.lt.u32.totalorder %s1971_s26, %s2771_s9 }
  0xd9   : > { %p1974_p3 = pnand %p1972_p1, %p2307_p8 }
  0xdb   : > { %p1975_p11 = pneg %p1974_p3 }
  0xdd   : > { %p1980_p13 = pnand %p1978_p12, %p1975_p11 }
  0xdf   : > { %1983 = shalt.err (!%p1980_p13)
}
  0xe0   : > { %s1984_s28 = scalar_lea.vmem %s397_s2, 16  ;;  %s1991_s27 = scalar_lea.vmem %s397_s2, 32 }
  0xe1   : > { %p1985_p0 = scmp.ne.s32.totalorder %s397_s2, %s1984_s28  ;;  %p1992_p7 = scmp.lt.s32.totalorder %s397_s2, %s397_s2 }
  0xe2   : > { %p1993_p9 = scmp.lt.s32.totalorder %s1991_s27, %s1984_s28 }
  0xe3   : > { %p1987_p2 = pnand %p1985_p0, %p2307_p8 }
  0xe4   : > { %p1994_p5 = por %p1993_p9, %p1992_p7 }
  0xe5   : > { %p1988_p4 = pneg %p1987_p2 }
  0xe7   : > { %p1995_p10 = pnand %p1994_p5, %p1988_p4 }
  0xe9   : > { %1998 = shalt.err (!%p1995_p10)
}
  0xea   : > { %1654 = dma.hbm_to_vmem [thread:$0]  (!%p2291_p6), %s2771_s9, 16, %s397_s2, [#allocation18]  }
  0xeb   : > { %s1442_s21 = sadd.s32 4294967294, %s2165_s18   ;;  %s45_s11 = sadd.s32 1, %s2161_s17 }
  0xec   : > { %p47_p8 = scmp.ge.s32.totalorder %s45_s11, 2  ;;  %s54_s23 = sadd.s32 1, %s2153_s15 }
  0xed   : > { %p61_p1 = scmp.ne.s32.totalorder %s2153_s15, %s2149_s14  ;;  %p62_p3 = scmp.eq.s32.totalorder %s2165_s18, 0 }
  0xee   : > { %s2833_s11 = smov (%p47_p8, %s45_s11), 0  ;;  %p67_p12 = scmp.ne.s32.totalorder %s2149_s14, %s2145_s13 }
  0xef   : > { %p2478_p11 = por %p62_p3, %p61_p1  ;;  %s49_s24 = ssub.s32 %s2161_s17, %s2833_s11 }
  0xf0   : > { %p287_p6 = scmp.eq.s32.totalorder %s2275_s19, 1  ;;  %p52_p13 = scmp.eq.s32.totalorder %s49_s24, 0 }
  0xf1   : > { %p2803_p0 = scmp.eq.s32.totalorder %s2275_s19, 0  ;;  %p293_p7 = scmp.eq.s32.totalorder %s1442_s21, 1 }
  0xf2   : > { %p2493_p4 = por %p287_p6, %p61_p1  ;;  %p1674_p5 = scmp.lt.s32.totalorder %s2165_s18, 2 }
  0xf3   : > { %p2489_p2 = por %p2803_p0, %p67_p12  ;;  %p2500_p9 = por %p293_p7, %p67_p12 }
  0xf4   : > { %s2805_s20 = scalar_select %p2493_p4, 1, 0 }
  0xf5   : > { %s2804_s2 = scalar_select %p2489_p2, 1, 0 }
  0xf6   : > { %s2498_s12 = scalar_select %p52_p13, %s2153_s15, %s54_s23  }
  0xf7   : > { %s2806_s26 = scalar_select %p2500_p9, 1, 0 }
  0xf8   : > { %s407_s22 = sand.u32 1, %s2153_s15   ;;  %s1454_s10 = sshll.u32 %s2161_s17, 7 }
  0xf9   : > { %s2507_s25 = sshll.u32 %s407_s22, 3  ;;  %s2512_s27 = scalar_lea.hbm %s2762_s0, %s1454_s10 }
  0xfa   : > { %s411_s16 = scalar_lea.vmem [#allocation2], %s2507_s25  ;;  %p2517_p10 = pnand %p1674_p5, %p2478_p11 }
  0xfb   : > { %s419_s30 = sshll.u32 %s411_s16, 4  ;;  %s2808_s1 = sld [smem:[#allocation30_spill]]  ;;  %s2521_s30 = int_to_ptr.vmem [resolvable:$true] %s419_s30 }
  0xfc   : > { %s408_s3 = scalar_lea.sflag [#allocation3], %s407_s22  ;;  %s1999_s4 = scalar_lea.hbm %s2512_s27, 128 }
  0xfd   : > { %p2000_p8 = scmp.ne.s32.totalorder %s2512_s27, %s1999_s4  ;;  %p2001_p1 = pneg %p2517_p10 }
  0xfe   : > { %s2004_s5 = scalar_lea.hbm %s2762_s0, 256  ;;  %p2005_p12 = scmp.lt.u32.totalorder %s2512_s27, %s2762_s0 }
  0xff   : > { %p2002_p3 = pnand %p2001_p1, %p2000_p8  ;;  %p2006_p6 = scmp.lt.u32.totalorder %s2004_s5, %s1999_s4 }
 0x100   : > { %p2008_p0 = scmp.lt.u32.totalorder %s1999_s4, %s2512_s27 }
 0x101   : > { %s2526_s28 = scalar_lea.hbm %s2808_s1, %s1454_s10  ;;  %p2003_p11 = pneg %p2002_p3 }
 0x102   : > { %p2007_p13 = por %p2006_p6, %p2005_p12 }
 0x104   : > { %p2009_p7 = por %p2008_p0, %p2007_p13 }
 0x106   : > { %p2010_p5 = pnand %p2009_p7, %p2003_p11 }
 0x108   : > { %2013 = shalt.err (!%p2010_p5)
}
 0x109   : > { %s2014_s22 = scalar_lea.vmem %s2521_s30, 128  ;;  %s2177_s10 = smov [#allocation2]  }
 0x10a   : > { %p2015_p8 = scmp.ne.s32.totalorder %s2521_s30, %s2014_s22  ;;  %s2019_s23 = sshll.u32 %s2177_s10, 4  ;;  %s2020_s23 = int_to_ptr.vmem [resolvable:$false] %s2019_s23 }
 0x10b   : > { %s2021_s6 = scalar_lea.vmem %s2020_s23, 256  ;;  %p2022_p4 = scmp.lt.s32.totalorder %s2521_s30, %s2020_s23 }
 0x10c   : > { %p2017_p3 = pnand %p2015_p8, %p2001_p1  ;;  %p2023_p12 = scmp.lt.s32.totalorder %s2021_s6, %s2014_s22 }
 0x10e   : > { %p2018_p9 = pneg %p2017_p3  ;;  %p2024_p6 = por %p2023_p12, %p2022_p4 }
 0x110   : > { %p2025_p13 = pnand %p2024_p6, %p2018_p9 }
 0x112   : > { %2028 = shalt.err (!%p2025_p13)
}
 0x113   : > { %1658 = dma.hbm_to_vmem [thread:$0]  (!%p2517_p10), %s2512_s27, 128, %s2521_s30, %s408_s3  }
 0x114   : > { %s426_s4 = sand.u32 1, %s2165_s18   ;;  %s430_s5 = scalar_lea.vmem [#allocation5], %s2507_s25 }
 0x115   : > { %s437_s7 = sshll.u32 %s430_s5, 4  ;;  %s427_s24 = scalar_lea.sflag [#allocation6], %s426_s4  ;;  %s438_s7 = int_to_ptr.vmem [resolvable:$true] %s437_s7 }
 0x116   : > { %s2029_s29 = scalar_lea.hbm %s2526_s28, 128  ;;  %s2034_s10 = scalar_lea.hbm %s2808_s1, 256 }
 0x117   : > { %p2030_p4 = scmp.ne.s32.totalorder %s2526_s28, %s2029_s29  ;;  %p2035_p0 = scmp.lt.u32.totalorder %s2526_s28, %s2808_s1 }
 0x118   : > { %p2036_p7 = scmp.lt.u32.totalorder %s2034_s10, %s2029_s29  ;;  %p2038_p8 = scmp.lt.u32.totalorder %s2029_s29, %s2526_s28 }
 0x119   : > { %p2032_p9 = pnand %p2030_p4, %p2001_p1 }
 0x11a   : > { %p2037_p5 = por %p2036_p7, %p2035_p0 }
 0x11b   : > { %p2033_p11 = pneg %p2032_p9 }
 0x11c   : > { %p2039_p3 = por %p2038_p8, %p2037_p5 }
 0x11e   : > { %p2040_p12 = pnand %p2039_p3, %p2033_p11 }
 0x120   : > { %2043 = shalt.err (!%p2040_p12)
}
 0x121   : > { %s2044_s3 = scalar_lea.vmem %s438_s7, 128  ;;  %s2178_s25 = smov [#allocation5]  }
 0x122   : > { %p2045_p6 = scmp.ne.s32.totalorder %s438_s7, %s2044_s3  ;;  %s2049_s27 = sshll.u32 %s2178_s25, 4  ;;  %s2050_s27 = int_to_ptr.vmem [resolvable:$false] %s2049_s27 }
 0x123   : > { %s2051_s30 = scalar_lea.vmem %s2050_s27, 256  ;;  %p2052_p9 = scmp.lt.s32.totalorder %s438_s7, %s2050_s27 }
 0x124   : > { %p2047_p13 = pnand %p2045_p6, %p2001_p1  ;;  %p2053_p2 = scmp.lt.s32.totalorder %s2051_s30, %s2044_s3 }
 0x126   : > { %p2048_p4 = pneg %p2047_p13  ;;  %p2054_p0 = por %p2053_p2, %p2052_p9 }
 0x128   : > { %p2055_p7 = pnand %p2054_p0, %p2048_p4 }
 0x12a   : > { %2058 = shalt.err (!%p2055_p7)
}
 0x12b   : > { %1661 = dma.hbm_to_vmem [thread:$0]  (!%p2517_p10), %s2526_s28, 128, %s438_s7, %s427_s24  }
 0x12c   : > { %s2809_s4 = sld [smem:[#allocation29_spill]] }
 0x132   : > { %p2810_p11 = scmp.ne.s32.totalorder %s2809_s4, 0 }
 0x133   : > { %s2577_s5 = sand.u32 (!%p2810_p11), 1, %s2149_s14   ;;  %p2811_p2 = scmp.ne.s32.totalorder (!%p2810_p11), %s2804_s2, 0 }
 0x134   : > { %446 = sbr.rel (%p2810_p11) target bundleno = 2094 (0x82e), region = 60  ;;  %s2580_s29 = sshll.u32 (!%p2810_p11), %s2577_s5, 3 }
 0x135   : > { %s449_s16 = scalar_lea.sflag (!%p2810_p11), [#allocation3], %s2577_s5  ;;  %s452_s22 = scalar_lea.vmem (!%p2810_p11), [#allocation2], %s2580_s29 }
 0x13b   : > { %2112 = dma.done.wait (%p2811_p2), %s449_s16, 128  }
 0x13c   : > { %2114 = vsyncadd (%p2811_p2), %s449_s16, 4294967168  ;;  %s457_s21 = sand.u32 1, %s2275_s19   ;;  %s461_s7 = scalar_lea.vmem [#allocation5], %s2580_s29 }
 0x13d   : > { %s458_s28 = scalar_lea.sflag [#allocation6], %s457_s21 }
 0x13e   : > { %2116 = dma.done.wait (%p2811_p2), %s458_s28, 128  }
 0x13f   : > { %2118 = vsyncadd (%p2811_p2), %s458_s28, 4294967168  ;;  %p2812_p10 = scmp.eq.s32.totalorder %s2275_s19, 0 }
 0x141   : > { %2120 = dma.done.wait (%p2812_p10), [#allocation6], 256   ;;  %p2813_p1 = pmov %p2812_p10 }
 0x143   : > { %2122 = vsyncadd (%p2813_p1), [#allocation6], 4294967040  ;;  %p2814_p5 = pmov %p2813_p1 }
 0x144   : > { %p2815_p8 = pmov %p2813_p1 }
 0x145   : > { %2124 = dma.done.wait (%p2814_p5), [#allocation9], 272  }
 0x146   : > { %2126 = vsyncadd (%p2815_p8), [#allocation9], 4294967024  ;;  %p2816_p3 = pmov %p2813_p1 }
 0x147   : > { %p2817_p12 = pmov %p2813_p1 }
 0x148   : > { %2128 = dma.done.wait (%p2816_p3), [#allocation12], 272  }
 0x149   : > { %2130 = vsyncadd (%p2817_p12), [#allocation12], 4294967024  ;;  %p2818_p6 = pmov %p2813_p1 }
 0x14a   : > { %p2819_p13 = pmov %p2813_p1 }
 0x14b   : > { %2132 = dma.done.wait (%p2818_p6), [#allocation15], 32  }
 0x14c   : > { %2134 = vsyncadd (%p2819_p13), [#allocation15], 4294967264  ;;  %p2820_p4 = pmov %p2813_p1 }
 0x14d   : > { %p2821_p9 = pmov %p2813_p1 }
 0x14e   : > { %2136 = dma.done.wait (%p2820_p4), [#allocation18], 16  }
 0x14f   : > { %2138 = vsyncadd (%p2821_p9), [#allocation18], 4294967280  ;;  %v2179_v0 = vmov 0.0   ;;  %vm2180_vm0 = vmmov 0   ;;  %v1751_v1 = vld [vmem:[#allocation7] sm:$0xff]   ;;  %v1752_v2 = vld [vmem:[#allocation10] sm:$0xff]  }
 0x150   : > { %1520 = vmatprep.subr.bf16.mxu0 %v2179_v0  ;;  %1528 = vmatprep.subr.bf16.mxu1 %v2179_v0  ;;  %v1753_v3 = vld [vmem:[#allocation7 + $0x8] sm:$0xff]   ;;  %v1754_v4 = vld [vmem:[#allocation10 + $0x8] sm:$0xff]   ;;  %vm563_vm1 = vcmask 261120   ;;  %v1469_v9 = vld [vmem:[#allocation8] ss:$0 sm:$0xff]  ;;  %s2181_s19 = smov 120  }
 0x151   : > { %1524 = vmatprep.mubr.msk.bf16.mxu0 %vm2180_vm0, %v2179_v0  ;;  %1532 = vmatprep.mubr.msk.bf16.mxu1 %vm2180_vm0, %v2179_v0  ;;  %v2624_v5 = vld [vmem:[%s452_s22] sm:$0xff]  ;;  %v538_v6 = vld [vmem:[%s461_s7] sm:$0xff]  ;;  %vm701_vm2 = vcmask 64512   ;;  %s2182_s2 = smov 104   ;;  %s2183_s24 = smov 112   ;;  %vm940_vm3 = vcmask 1043456  }
 0x152   : > { %1521 = vmatpush3.bf16.msra.mxu0 %v1751_v1  ;;  %1529 = vmatpush3.bf16.msra.mxu1 %v1752_v2  ;;  %v537_v7 = vpack.c.bf16 %v2624_v5, %v2624_v5  ;;  %v539_v8 = vpack.c.bf16 %v538_v6, %v538_v6  ;;  %v1473_v10 = vld [vmem:[#allocation11] ss:$0 sm:$0xff]  ;;  %s2184_s10 = smov 96   ;;  %s2185_s23 = smov 8   ;;  %vm1144_vm4 = vcmask 130048   ;;  %vm1146_vm5 = vcmask 195584  }
 0x153   : > { %1522 = vmatprep.subr.bf16.mxu0 %v2179_v0  ;;  %1530 = vmatprep.subr.bf16.mxu1 %v2179_v0  ;;  %s2186_s6 = smov 16   ;;  %s2187_s3 = smov 24  }
 0x154   : > { %s2822_s25 = sld [smem:[#allocation28_spill]]  ;;  %s534_s30 = scalar_lea.vmem [#allocation19], %s2580_s29 }
 0x155   : > { %s1262_s4 = sshll.u32 %s534_s30, 4  ;;  %s2823_s21 = sld [smem:[#allocation37_spill]]  ;;  %s2714_s4 = int_to_ptr.vmem [resolvable:$true] %s1262_s4 }
 0x156   : > { %1523 = vmatpush3.bf16.msra.mxu0 %v1753_v3  ;;  %1531 = vmatpush3.bf16.msra.mxu1 %v1754_v4  ;;  %s1248_s7 = scalar_lea.sflag [#allocation4], %s2577_s5  ;;  %p2824_p7 = scmp.ne.s32.totalorder %s2805_s20, 0 }
 0x157   : > { %1536 = vmatprep.subr.bf16.mxu0 %v2179_v0  ;;  %1542 = vmatprep.subr.bf16.mxu1 %v2179_v0  ;;  %s2188_s29 = smov [#allocation19]  }
 0x159   : > { %1525 = vmatmul.mubr.msk.bf16.vlgmr.msra.gmra.mrb[0].mxu0 %vm563_vm1, %v537_v7  ;;  %1533 = vmatmul.mubr.msk.bf16.vlgmr.msra.gmra.mrb[0].mxu1 %vm563_vm1, %v539_v8 }
 0x15a   : > { %1538 = vmatprep.mubr.msk.bf16.mxu0 %vm2180_vm0, %v2179_v0  ;;  %1544 = vmatprep.mubr.msk.bf16.mxu1 %vm2180_vm0, %v2179_v0  ;;  %s1492_s27 = sshll.u32 %s2822_s25, 7 }
 0x15b   : > { %s2712_s28 = scalar_lea.hbm %s2823_s21, %s1492_s27 }
 0x22c   : > { %v601_v11 = vpop.f32.mrb[0].mxu0  ;;  %v667_v13 = vpop.f32.mrb[0].mxu1 }
 0x22d   : > { %v602_v12 = vadd.f32 %v1469_v9, %v601_v11  ;;  %v1526_v14 = vpop.f32.mrb[1].mxu0  ;;  %v668_v15 = vadd.f32 %v1473_v10, %v667_v13  ;;  %v1534_v16 = vpop.f32.mrb[1].mxu1 }
 0x22e   : > { %v604_v17 = vpop.f32.mrb[2].mxu0  ;;  %v670_v18 = vpop.f32.mrb[2].mxu1 }
 0x22f   : > { %674 = vrot.lane.b32.xlu1 %v602_v12, %s2181_s19  ;;  %v1527_v19 = vpop.f32.mrb[3].mxu0  ;;  %688 = vrot.lane.b32.xlu0 %v668_v15, %s2181_s19  ;;  %v1535_v20 = vpop.f32.mrb[3].mxu1  ;;  %v2636_v21 = vpack.c.bf16 %v668_v15, %v668_v15  ;;  %v683_v23 = vpack.c.bf16 %v602_v12, %v602_v12  ;;  %s2059_s19 = scalar_lea.vmem %s2714_s4, 128 }
 0x230   : > { %p2060_p0 = scmp.ne.s32.totalorder %s2714_s4, %s2059_s19 }
 0x231   : > { %v706_v22 = vsel %vm701_vm2, %v2636_v21, 0 }
 0x232   : > { %1537 = vmatpush3.bf16.xpose.msra.mxu0 %v706_v22  ;;  %p2061_p11 = pnand %p2060_p0, %p2824_p7 }
 0x233   : > { %694 = vrot.lane.b32.xlu1 %v668_v15, %s2182_s2  ;;  %691 = vrot.lane.b32.xlu0 %v668_v15, %s2183_s24 }
 0x234   : > { %1548 = vmatprep.subr.bf16.mxu0 %v2179_v0  ;;  %p2062_p2 = pneg %p2061_p11 }
 0x237   : > { %680 = vrot.lane.b32.xlu1 %v602_v12, %s2182_s2  ;;  %677 = vrot.lane.b32.xlu0 %v602_v12, %s2183_s24  ;;  %s2063_s2 = sshll.u32 %s2188_s29, 4  ;;  %s2064_s2 = int_to_ptr.vmem [resolvable:$false] %s2063_s2 }
 0x238   : > { %s2065_s24 = scalar_lea.vmem %s2064_s2, 256  ;;  %p2066_p10 = scmp.lt.s32.totalorder %s2714_s4, %s2064_s2 }
 0x239   : > { %1539 = vmatmul.mubr.msk.bf16.vlgmr.msra.gmra.mrb[4].mxu0 %vm701_vm2, %v683_v23  ;;  %p2067_p1 = scmp.lt.s32.totalorder %s2065_s24, %s2059_s19 }
 0x23a   : > { %1550 = vmatprep.mubr.msk.bf16.mxu0 %vm2180_vm0, %v2179_v0 }
 0x23b   : > { %p2068_p5 = por %p2067_p1, %p2066_p10 }
 0x23d   : > { %p2069_p8 = pnand %p2068_p5, %p2062_p2 }
 0x2a1   : > { %v675_v24 = vpop.permute.xlu1 %674  ;;  %v689_v25 = vpop.permute.xlu0 %688 }
 0x2a2   : > { %v2644_v26 = vpack.c.bf16 %v689_v25, %v689_v25  ;;  %v684_v33 = vpack.c.bf16 %v675_v24, %v675_v24 }
 0x2a4   : > { %v752_v27 = vsel %vm701_vm2, %v2644_v26, 0 }
 0x2a5   : > { %1543 = vmatpush3.bf16.xpose.msra.mxu1 %v752_v27  ;;  %v692_v28 = vpop.permute.xlu0 %691  ;;  %v695_v29 = vpop.permute.xlu1 %694 }
 0x2a6   : > { %v2648_v30 = vpack.c.bf16 %v692_v28, %v692_v28  ;;  %1554 = vmatprep.subr.bf16.mxu1 %v2179_v0  ;;  %v2653_v32 = vpack.c.bf16 %v695_v29, %v695_v29 }
 0x2a8   : > { %v798_v31 = vsel %vm701_vm2, %v2648_v30, 0  ;;  %v844_v35 = vsel %vm701_vm2, %v2653_v32, 0 }
 0x2a9   : > { %1549 = vmatpush3.bf16.xpose.msra.mxu0 %v798_v31  ;;  %v678_v34 = vpop.permute.xlu0 %677  ;;  %v681_v37 = vpop.permute.xlu1 %680 }
 0x2aa   : > { %1560 = vmatprep.subr.bf16.mxu0 %v2179_v0  ;;  %v685_v36 = vpack.c.bf16 %v678_v34, %v678_v34  ;;  %v686_v38 = vpack.c.bf16 %v681_v37, %v681_v37 }
 0x2ac   : > { %1545 = vmatmul.mubr.msk.bf16.vlgmr.msra.gmra.mrb[4].mxu1 %vm701_vm2, %v684_v33 }
 0x2ad   : > { %1555 = vmatpush3.bf16.xpose.msra.mxu1 %v844_v35  ;;  %1556 = vmatprep.mubr.msk.bf16.mxu1 %vm2180_vm0, %v2179_v0 }
 0x2ae   : > { %1566 = vmatprep.subr.bf16.mxu1 %v2179_v0 }
 0x2b0   : > { %1551 = vmatmul.mubr.msk.bf16.vlgmr.msra.gmra.mrb[8].mxu0 %vm701_vm2, %v685_v36 }
 0x2b1   : > { %1562 = vmatprep.mubr.msk.bf16.mxu0 %vm2180_vm0, %v2179_v0 }
 0x2b4   : > { %1557 = vmatmul.mubr.msk.bf16.vlgmr.msra.gmra.mrb[8].mxu1 %vm701_vm2, %v686_v38 }
 0x2b5   : > { %1568 = vmatprep.mubr.msk.bf16.mxu1 %vm2180_vm0, %v2179_v0 }
 0x30c   : > { %v742_v39 = vpop.f32.mrb[4].mxu0 }
 0x30d   : > { %v1540_v40 = vpop.f32.mrb[5].mxu0  ;;  %v886_v41 = vsel %vm701_vm2, %v742_v39, -inf }
 0x30e   : > { %887 = vmax.xlane.f32.xlu0 %v886_v41  ;;  %v745_v42 = vpop.f32.mrb[6].mxu0 }
 0x30f   : > { %v1541_v43 = vpop.f32.mrb[7].mxu0 }
 0x37f   : > { %v788_v44 = vpop.f32.mrb[4].mxu1 }
 0x380   : > { %v1546_v45 = vpop.f32.mrb[5].mxu1  ;;  %v889_v46 = vsel %vm701_vm2, %v788_v44, -inf }
 0x381   : > { %890 = vmax.xlane.f32.xlu1 %v889_v46  ;;  %v791_v47 = vpop.f32.mrb[6].mxu1  ;;  %v1755_v45 = vld [vmem:[#allocation13] sm:$0xff]   ;;  %v1756_v46 = vld [vmem:[#allocation13 + $0x8] sm:$0xff]  }
 0x382   : > { %v1547_v48 = vpop.f32.mrb[7].mxu1 }
 0x383   : > { %v834_v49 = vpop.f32.mrb[8].mxu0 }
 0x384   : > { %v1552_v50 = vpop.f32.mrb[9].mxu0  ;;  %v892_v51 = vsel %vm701_vm2, %v834_v49, -inf }
 0x385   : > { %893 = vmax.xlane.f32.xlu0 %v892_v51  ;;  %v837_v52 = vpop.f32.mrb[10].mxu0 }
 0x386   : > { %v1553_v53 = vpop.f32.mrb[11].mxu0 }
 0x387   : > { %v880_v54 = vpop.f32.mrb[8].mxu1 }
 0x388   : > { %v1558_v55 = vpop.f32.mrb[9].mxu1  ;;  %v895_v56 = vsel %vm701_vm2, %v880_v54, -inf }
 0x389   : > { %v883_v57 = vpop.f32.mrb[10].mxu1  ;;  %896 = vmax.xlane.f32.xlu0 %v895_v56 }
 0x38a   : > { %v1559_v58 = vpop.f32.mrb[11].mxu1 }
 0x392   : > { %935 = vrot.lane.b32.xlu1 %v2636_v21, %s2184_s10 }
 0x39b   : > { %v888_v59 = vpop.xlane.xlu0 %887 }
 0x39c   : > { %v898_v60 = vsub.f32 %v742_v39, %v888_v59 }
 0x39e   : > { %v902_v61 = vmul.f32 1.442695, %v898_v60 }
 0x3a0   : > { %1757 = vpow2.f32 %v902_v61 }
 0x3aa   : > { %v1758_v62 = vpop.eup %1757 }
 0x3ab   : > { %v910_v63 = vsel %vm701_vm2, %v1758_v62, 0.0 }
 0x3b6   : > { %911 = vadd.xlane.f32.xlu1 %v910_v63 }
 0x40e   : > { %v891_v1 = vpop.xlane.xlu1 %890 }
 0x40f   : > { %v899_v2 = vsub.f32 %v788_v44, %v891_v1 }
 0x411   : > { %v904_v3 = vmul.f32 1.442695, %v899_v2  ;;  %v1485_v2 = vld [vmem:[#allocation14] ss:$0 sm:$0xff] }
 0x412   : > { %v936_v4 = vpop.permute.xlu1 %935  ;;  %v894_v6 = vpop.xlane.xlu0 %893 }
 0x413   : > { %1759 = vpow2.f32 %v904_v3  ;;  %v942_v7 = vsel %vm940_vm3, %v936_v4, 0  ;;  %v900_v8 = vsub.f32 %v834_v49, %v894_v6 }
 0x414   : > { %1561 = vmatpush3.bf16.msra.mxu0 %v942_v7 }
 0x415   : > { %v906_v9 = vmul.f32 1.442695, %v900_v8  ;;  %1572 = vmatprep.subr.bf16.mxu0 %v2179_v0 }
 0x416   : > { %v897_v10 = vpop.xlane.xlu0 %896 }
 0x417   : > { %1761 = vpow2.f32 %v906_v9  ;;  %v901_v11 = vsub.f32 %v880_v54, %v897_v10 }
 0x419   : > { %v908_v12 = vmul.f32 1.442695, %v901_v11 }
 0x41b   : > { %1763 = vpow2.f32 %v908_v12 }
 0x41d   : > { %v1760_v13 = vpop.eup %1759 }
 0x41e   : > { %v913_v14 = vsel %vm701_vm2, %v1760_v13, 0.0 }
 0x41f   : > { %914 = vadd.xlane.f32.xlu0 %v913_v14 }
 0x421   : > { %v1762_v15 = vpop.eup %1761 }
 0x422   : > { %v916_v16 = vsel %vm701_vm2, %v1762_v15, 0.0 }
 0x423   : > { %917 = vadd.xlane.f32.xlu1 %v916_v16 }
 0x425   : > { %v1764_v17 = vpop.eup %1763 }
 0x426   : > { %v919_v18 = vsel %vm701_vm2, %v1764_v17, 0.0 }
 0x427   : > { %920 = vadd.xlane.f32.xlu0 %v919_v18 }
 0x434   : > { %1034 = vrot.lane.b32.xlu1 %v2648_v30, %s2184_s10 }
 0x438   : > { %1083 = vrot.lane.b32.xlu1 %v2653_v32, %s2184_s10 }
 0x43d   : > { %985 = vrot.lane.b32.xlu0 %v2644_v26, %s2184_s10 }
 0x443   : > { %v912_v19 = vpop.xlane.xlu1 %911 }
 0x444   : > { %1765 = vrcp.f32 %v912_v19 }
 0x44e   : > { %v1766_v20 = vpop.eup %1765 }
 0x44f   : > { %v926_v21 = vmul.f32 %v1766_v20, %v1758_v62 }
 0x451   : > { %v930_v22 = vpack.c.bf16 %v926_v21, %v926_v21  ;;  %v1490_v21 = vld [vmem:[#allocation17] ss:$0 sm:$0xff] }
 0x453   : > { %1563 = vmatmul.mubr.msk.bf16.vlgmr.msra.gmra.mrb[12].mxu0 %vm701_vm2, %v930_v22 }
 0x454   : > { %1574 = vmatprep.mubr.msk.bf16.mxu0 %vm2180_vm0, %v2179_v0 }
 0x4ac   : > { %v915_v23 = vpop.xlane.xlu0 %914 }
 0x4ad   : > { %1767 = vrcp.f32 %v915_v23 }
 0x4b0   : > { %v918_v24 = vpop.xlane.xlu1 %917 }
 0x4b1   : > { %1769 = vrcp.f32 %v918_v24 }
 0x4b4   : > { %v1035_v25 = vpop.permute.xlu1 %1034  ;;  %v921_v27 = vpop.xlane.xlu0 %920 }
 0x4b5   : > { %v1040_v28 = vsel %vm940_vm3, %v1035_v25, 0  ;;  %1771 = vrcp.f32 %v921_v27 }
 0x4b6   : > { %1573 = vmatpush3.bf16.msra.mxu0 %v1040_v28 }
 0x4b7   : > { %v1768_v26 = vpop.eup %1767  ;;  %1584 = vmatprep.subr.bf16.mxu0 %v2179_v0 }
 0x4b8   : > { %v927_v29 = vmul.f32 %v1768_v26, %v1760_v13  ;;  %v986_v30 = vpop.permute.xlu0 %985  ;;  %v1084_v32 = vpop.permute.xlu1 %1083 }
 0x4b9   : > { %v991_v31 = vsel %vm940_vm3, %v986_v30, 0  ;;  %v1089_v36 = vsel %vm940_vm3, %v1084_v32, 0 }
 0x4ba   : > { %1567 = vmatpush3.bf16.msra.mxu1 %v991_v31  ;;  %v931_v33 = vpack.c.bf16 %v927_v29, %v927_v29 }
 0x4bb   : > { %v1770_v34 = vpop.eup %1769  ;;  %1578 = vmatprep.subr.bf16.mxu1 %v2179_v0 }
 0x4bc   : > { %v928_v35 = vmul.f32 %v1770_v34, %v1762_v15 }
 0x4bd   : > { %1569 = vmatmul.mubr.msk.bf16.vlgmr.msra.gmra.mrb[12].mxu1 %vm701_vm2, %v931_v33 }
 0x4be   : > { %1579 = vmatpush3.bf16.msra.mxu1 %v1089_v36  ;;  %v932_v37 = vpack.c.bf16 %v928_v35, %v928_v35  ;;  %1580 = vmatprep.mubr.msk.bf16.mxu1 %vm2180_vm0, %v2179_v0 }
 0x4bf   : > { %v1772_v38 = vpop.eup %1771 }
 0x4c0   : > { %v929_v39 = vmul.f32 %v1772_v38, %v1764_v17  ;;  %1575 = vmatmul.mubr.msk.bf16.vlgmr.msra.gmra.mrb[16].mxu0 %vm701_vm2, %v932_v37 }
 0x4c1   : > { %1588 = vmatprep.mubr.msk.bf16.mxu0 %vm2180_vm0, %v2179_v0  ;;  %1585 = vmatpush3.bf16.msra.mxu0 %v1755_v45 }
 0x4c2   : > { %v933_v40 = vpack.c.bf16 %v929_v39, %v929_v39  ;;  %1586 = vmatprep.subr.bf16.mxu0 %v2179_v0 }
 0x4c5   : > { %1581 = vmatmul.mubr.msk.bf16.vlgmr.msra.gmra.mrb[16].mxu1 %vm701_vm2, %v933_v40  ;;  %1587 = vmatpush3.bf16.msra.mxu0 %v1756_v46 }
 0x526   : > { %v978_v41 = vpop.f32.mrb[12].mxu0 }
 0x527   : > { %v1564_v42 = vpop.f32.mrb[13].mxu0 }
 0x528   : > { %v981_v43 = vpop.f32.mrb[14].mxu0 }
 0x529   : > { %v1565_v44 = vpop.f32.mrb[15].mxu0 }
 0x590   : > { %v1027_v47 = vpop.f32.mrb[12].mxu1 }
 0x591   : > { %1132 = vrot.lane.b32.xlu0 %v1027_v47, %s2185_s23  ;;  %v1570_v48 = vpop.f32.mrb[13].mxu1 }
 0x592   : > { %v1030_v49 = vpop.f32.mrb[14].mxu1 }
 0x593   : > { %v1571_v50 = vpop.f32.mrb[15].mxu1  ;;  %v1076_v51 = vpop.f32.mrb[16].mxu0 }
 0x594   : > { %1136 = vrot.lane.b32.xlu1 %v1076_v51, %s2186_s6  ;;  %v1576_v52 = vpop.f32.mrb[17].mxu0 }
 0x595   : > { %v1079_v53 = vpop.f32.mrb[18].mxu0 }
 0x596   : > { %v1577_v54 = vpop.f32.mrb[19].mxu0 }
 0x598   : > { %v1125_v55 = vpop.f32.mrb[16].mxu1 }
 0x599   : > { %1140 = vrot.lane.b32.xlu0 %v1125_v55, %s2187_s3  ;;  %v1582_v56 = vpop.f32.mrb[17].mxu1 }
 0x59a   : > { %v1128_v57 = vpop.f32.mrb[18].mxu1 }
 0x59b   : > { %v1583_v0 = vpop.f32.mrb[19].mxu1 }
 0x603   : > { %v1133_v58 = vpop.permute.xlu0 %1132 }
 0x604   : > { %v1143_v60 = vsel %vm701_vm2, %v978_v41, %v1133_v58 }
 0x606   : > { %v1137_v59 = vpop.permute.xlu1 %1136 }
 0x607   : > { %v1145_v61 = vsel %vm1144_vm4, %v1143_v60, %v1137_v59 }
 0x60b   : > { %v1141_v62 = vpop.permute.xlu0 %1140 }
 0x60c   : > { %v1147_v63 = vsel %vm1146_vm5, %v1145_v61, %v1141_v62 }
 0x60d   : > { %v1148_v1 = vpack.c.bf16 %v1147_v63, %v1147_v63 }
 0x60f   : > { %1589 = vmatmul.mubr.msk.bf16.vlgmr.msra.gmra.mrb[20].mxu0 %vm563_vm1, %v1148_v1 }
 0x6e2   : > { %v1209_v3 = vpop.f32.mrb[20].mxu0 }
 0x6e3   : > { %v1210_v4 = vadd.f32 %v1485_v2, %v1209_v3  ;;  %v1590_v6 = vpop.f32.mrb[21].mxu0 }
 0x6e4   : > { %v1212_v7 = vpop.f32.mrb[22].mxu0 }
 0x6e5   : > { %v1591_v8 = vpop.f32.mrb[23].mxu0  ;;  %v1215_v9 = vadd.f32 %v1210_v4, %v2624_v5  ;;  %v1489_v5 = vld [vmem:[#allocation16] ss:$0 sm:$0xff] }
 0x6e7   : > { %v1216_v10 = vsel %vm563_vm1, %v1215_v9, 0.0 }
 0x6e8   : > { %1217 = vadd.xlane.f32.xlu1 %v1216_v10 }
 0x775   : > { %v1218_v11 = vpop.xlane.xlu1 %1217 }
 0x776   : > { %v1220_v12 = vmul.f32 0.03125, %v1218_v11 }
 0x778   : > { %v1221_v13 = vsub.f32 %v1215_v9, %v1220_v12 }
 0x77a   : > { %v1222_v14 = vmul.f32 %v1221_v13, %v1221_v13 }
 0x77c   : > { %v1223_v15 = vsel %vm563_vm1, %v1222_v14, 0.0 }
 0x77d   : > { %1224 = vadd.xlane.f32.xlu0 %v1223_v15 }
 0x80a   : > { %v1225_v16 = vpop.xlane.xlu0 %1224 }
 0x80b   : > { %v1226_v17 = vmul.f32 0.03125, %v1225_v16 }
 0x80d   : > { %v1227_v18 = vadd.f32 1e-05, %v1226_v17 }
 0x80f   : > { %1773 = vrsqrt.f32 %v1227_v18 }
 0x819   : > { %v1774_v19 = vpop.eup %1773 }
 0x81a   : > { %v1229_v20 = vmul.f32 %v1774_v19, %v1221_v13 }
 0x81c   : > { %v1237_v22 = vmul.f32 %v1489_v5, %v1229_v20 }
 0x81e   : > { %v1245_v23 = vadd.f32 %v1490_v21, %v1237_v22 }
 0x820   : > { %1246 = vst.msk [vmem:[%s534_s30] sm:$0xff] %vm563_vm1, %v1245_v23 }
 0x821   : > { %2072 = shalt.err (!%p2069_p8)
}
 0x822   : > { %s2073_s5 = scalar_lea.hbm %s2712_s28, 128  ;;  %s2077_s6 = scalar_lea.hbm %s2823_s21, 256 }
 0x823   : > { %p2074_p3 = scmp.ne.s32.totalorder %s2712_s28, %s2073_s5  ;;  %p2078_p13 = scmp.lt.u32.totalorder %s2712_s28, %s2823_s21 }
 0x824   : > { %p2079_p4 = scmp.lt.u32.totalorder %s2077_s6, %s2073_s5  ;;  %p2081_p0 = scmp.lt.u32.totalorder %s2073_s5, %s2712_s28 }
 0x825   : > { %p2075_p12 = pnand %p2074_p3, %p2824_p7 }
 0x826   : > { %p2080_p9 = por %p2079_p4, %p2078_p13 }
 0x827   : > { %p2076_p6 = pneg %p2075_p12 }
 0x828   : > { %p2082_p11 = por %p2081_p0, %p2080_p9 }
 0x82a   : > { %p2083_p2 = pnand %p2082_p11, %p2076_p6 }
 0x82c   : > { %2086 = shalt.err (!%p2083_p2)
}
 0x82d   : > { %1628 = dma.vmem_to_hbm [thread:$0]  (%p2824_p7), %s2714_s4, 128, %s2712_s28, %s1248_s7  }
 0x82e PF: > { %s1274_s27 = sand.u32 1, %s2145_s13   ;;  %p2825_p10 = scmp.ne.s32.totalorder %s2806_s26, 0 }
 0x82f   : > { %p2826_p1 = scmp.ge.s32.totalorder %s2165_s18, 2  ;;  %s1275_s30 = scalar_lea.sflag [#allocation4], %s1274_s27 }
 0x831   : > { %p1663_p5 = pnand %p2826_p1, %p2825_p10 }
 0x833   : > { %2140 = dma.done.wait (!%p1663_p5), %s1275_s30, 128  }
 0x834   : > { %2142 = vsyncadd (!%p1663_p5), %s1275_s30, 4294967168  ;;  %s33_s18 = sadd.s32 1, %s2165_s18   ;;  %s2827_s13 = smov %s2149_s14 }
 0x835   : > { %p30_p8 = scmp.ge.s32.totalorder %s33_s18, 4   ;;  %s2828_s14 = smov %s2153_s15 }
 0x836   : > { %s2829_s15 = smov %s2498_s12  ;;  %s2830_s16 = smov %s2161_s17 }
 0x837   : > { %s2831_s17 = smov %s2833_s11  ;;  %32 = sbr.rel (!%p30_p8) target bundleno = 21 (0x15), region = 150 }
 0x83e   :  { %1280 = vsyncpa [#allocation3], 1 }
 0x83f   :  { %1282 = vsyncpa [#allocation3 + $0x1], 1 }
 0x840   :  { %1283 = vsyncpa [#allocation6], 1 }
 0x841   :  { %1285 = vsyncpa [#allocation6 + $0x1], 1 }
 0x842   :  { %1286 = vsyncpa [#allocation9], 1 }
 0x843   :  { %1287 = vsyncpa [#allocation12], 1 }
 0x844   :  { %1288 = vsyncpa [#allocation15], 1 }
 0x845   :  { %1289 = vsyncpa [#allocation18], 1 }
 0x846   :  { %1290 = vsyncpa [#allocation4], 1 }
 0x847   :  { %1292 = vsyncpa [#allocation4 + $0x1], 1 }

</bundles_post_ra>
